<compile_context>
chip_gen: v6e
topology: v6e:2x2x1
jax: 0.10.0
libtpu: 0.0.40
codegen_flags: <defaults>
</compile_context>

<pallas_src>
import jax
import jax.numpy as jnp
from jax.experimental import pallas as pl
from jax.experimental.pallas import tpu as pltpu

_BN_EPS = 1e-5


# ---------------------------------------------------------------------------
# Fused kernel: expand 1x1 (+quirk padding) -> depthwise 3x3 -> project 1x1
# ---------------------------------------------------------------------------
def _make_fused_kernel(*, h, w, cin, hidden, cout, stride, expand, toh, wo,
                       use_res):
    pe = 1 if expand else 0          # the padding=1-on-a-1x1-conv quirk
    hp = h + 2 * pe + 2              # + zero ring for the depthwise padding=1
    wp = w + 2 * pe + 2

    def kernel(*refs):
        if expand:
            (x_ref, w_exp_ref, s_exp_ref, b_exp_ref, w_dw_ref, s_dw_ref,
             b_dw_ref, w_proj_ref, s_proj_ref, b_proj_ref, o_ref,
             hid_ref) = refs
        else:
            (x_ref, w_dw_ref, s_dw_ref, b_dw_ref, w_proj_ref, s_proj_ref,
             b_proj_ref, o_ref, hid_ref) = refs

        r = pl.program_id(1)

        # -- stage 1 (once per image): build the padded hidden activation in
        #    VMEM scratch, writing each region exactly once.
        #    Outermost ring = depthwise zero padding; for the expand path the
        #    next ring is clip(bn_bias, 0, 6) (1x1 conv over its quirk zero
        #    padding); interior = ReLU6(BN(x @ W_expand)).
        @pl.when(r == 0)
        def _():
            zrow = jnp.zeros((1, wp, hidden), jnp.float32)
            hid_ref[0:1] = zrow
            hid_ref[hp - 1:hp] = zrow
            zcol = jnp.zeros((hp - 2, 1, hidden), jnp.float32)
            hid_ref[1:hp - 1, 0:1, :] = zcol
            hid_ref[1:hp - 1, wp - 1:wp, :] = zcol
            if expand:
                ring = jnp.clip(b_exp_ref[...], 0.0, 6.0).reshape(1, 1, hidden)
                rrow = jnp.broadcast_to(ring, (1, wp - 2, hidden))
                rcol = jnp.broadcast_to(ring, (h, 1, hidden))
                hid_ref[1:2, 1:wp - 1, :] = rrow
                hid_ref[hp - 2:hp - 1, 1:wp - 1, :] = rrow
                hid_ref[2:hp - 2, 1:2, :] = rcol
                hid_ref[2:hp - 2, wp - 2:wp - 1, :] = rcol
                # expansion for the whole image in ONE bf16 MXU matmul
                x_flat = x_ref[0].reshape(h * w, cin).astype(jnp.bfloat16)
                y = jnp.dot(x_flat, w_exp_ref[...],
                            preferred_element_type=jnp.float32)
                y = jnp.clip(y * s_exp_ref[...] + b_exp_ref[...], 0.0, 6.0)
                hid_ref[2:2 + h, 2:2 + w, :] = y.reshape(h, w, hidden)
            else:
                hid_ref[1:1 + h, 1:1 + w, :] = x_ref[0].astype(jnp.float32)

        # -- stage 2+3 (per output-row tile): depthwise 3x3 + BN + ReLU6 at
        #    the requested stride, then ONE tile-wide 1x1 projection matmul +
        #    BN (+ residual) and ONE tile-wide store, entirely out of VMEM.
        o0 = r * toh                       # first output row of this tile
        row0 = stride * o0                 # matching row in the padded buffer
        w_dw = w_dw_ref[...]               # (9, hidden) f32, loaded once

        if stride == 1:
            # 9 contiguous tile-wide tap reads; accumulator initialized with
            # the first tap product (no zero-fill pass).
            acc = None
            for di in range(3):
                for dj in range(3):
                    k = 3 * di + dj
                    tap = hid_ref[pl.ds(row0 + di, toh), pl.ds(dj, wo), :]
                    c = tap * w_dw[k:k + 1, :]
                    acc = c if acc is None else acc + c
            acc = acc.reshape(toh * wo, hidden)
        else:
            # stride>1: 3 column-strided slabs reused across the 3 row taps;
            # per-row results are concatenated into one tile-wide buffer so
            # the projection / store below are still a single op per tile.
            nrows = stride * (toh - 1) + 3
            slabs = [hid_ref[pl.ds(row0, nrows),
                             pl.ds(dj, wo, stride=stride), :]
                     for dj in range(3)]
            rows = []
            for t in range(toh):           # static, fully unrolled
                racc = None
                for di in range(3):
                    src = stride * t + di  # row inside the slab (static)
                    for dj in range(3):
                        k = 3 * di + dj
                        c = slabs[dj][src] * w_dw[k:k + 1, :]
                        racc = c if racc is None else racc + c
                rows.append(racc)          # (wo, hidden) f32
            acc = jnp.concatenate(rows, axis=0)   # (toh*wo, hidden)

        acc = jnp.clip(acc * s_dw_ref[...] + b_dw_ref[...], 0.0, 6.0)

        # single bf16 MXU matmul per tile (M = toh*wo), f32 accumulation
        y = jnp.dot(acc.astype(jnp.bfloat16), w_proj_ref[...],
                    preferred_element_type=jnp.float32)
        y = y * s_proj_ref[...] + b_proj_ref[...]
        y = y.reshape(toh, wo, cout)
        if use_res:
            y = y + x_ref[0, pl.ds(o0, toh), :, :].astype(jnp.float32)
        o_ref[0] = y.astype(o_ref.dtype)   # single tile-wide store

    return kernel


# ---------------------------------------------------------------------------
# Row-tile sizing: largest divisor of ho whose per-tile buffers fit the
# budget; stop once the projection M (= toh*wo) is big enough to fill the MXU.
# ---------------------------------------------------------------------------
def _pick_row_tile(ho, wo, hidden, cout, *, max_rows=None,
                   budget_bytes=6 << 20, target_m=1024):
    limit = ho if max_rows is None else max(1, min(ho, max_rows))
    best = 1
    per_m = hidden * 6 + cout * 12   # f32 acc + bf16 MXU copy + f32 proj/out
    for cand in range(1, limit + 1):
        if ho % cand:
            continue
        if cand * wo * per_m > budget_bytes:
            break
        best = cand
        if cand * wo >= target_m:
            break
    return best


# ---------------------------------------------------------------------------
# InvertedResidual forward (NCHW in / NCHW out, like the PyTorch module)
# ---------------------------------------------------------------------------
def inverted_residual_forward(x_nchw, params, *, stride, expand_ratio,
                              in_channels, out_channels, max_row_tile=None):
    expand = expand_ratio != 1
    use_res = (stride == 1) and (in_channels == out_channels)
    if use_res and expand:
        # The padding=1 quirk on the 1x1 expand makes the output (H+2, W+2);
        # the PyTorch forward would fail on the residual add for this config.
        raise ValueError("residual path requires expand_ratio == 1 (the "
                         "padding=1 quirk on the 1x1 expand changes H, W)")

    x = jnp.transpose(x_nchw, (0, 2, 3, 1))            # -> NHWC (keep dtype)
    n, h, w, cin = x.shape
    hidden = params["w_dw"].shape[-1]
    cout = params["w_proj"].shape[-1]

    pe = 1 if expand else 0
    hp, wp = h + 2 * pe + 2, w + 2 * pe + 2
    ho = (hp - 3) // stride + 1
    wo = (wp - 3) // stride + 1
    toh = _pick_row_tile(ho, wo, hidden, cout, max_rows=max_row_tile)
    n_row_tiles = ho // toh

    kernel = _make_fused_kernel(h=h, w=w, cin=cin, hidden=hidden, cout=cout,
                                stride=stride, expand=expand, toh=toh, wo=wo,
                                use_res=use_res)

    # VMEM request tied to the actual working set (persistent scratch +
    # double-buffered input/output blocks + per-tile temporaries + headroom);
    # keeps well clear of v7x's 64 MiB when the shapes allow it.
    itm = x.dtype.itemsize
    need = (hp * wp * hidden * 4                 # padded hidden scratch (f32)
            + 2 * h * w * cin * itm              # double-buffered x block
            + 2 * toh * wo * cout * itm          # double-buffered out block
            + toh * wo * (hidden * 6 + cout * 12)  # per-tile temporaries
            + 2 * (cin + cout + 24) * hidden * 4   # resident weights/BN
            + (2 << 20))
    vmem_limit = int(min(max(32 << 20, 2 * need), 96 << 20))

    def _const(shape):
        return pl.BlockSpec(shape, lambda b, r: (0, 0))

    in_specs = [pl.BlockSpec((1, h, w, cin), lambda b, r: (b, 0, 0, 0))]
    args = [x]
    if expand:
        in_specs += [_const((cin, hidden)), _const((1, hidden)),
                     _const((1, hidden))]
        args += [params["w_exp"].astype(jnp.bfloat16),
                 params["s_exp"].reshape(1, hidden).astype(jnp.float32),
                 params["b_exp"].reshape(1, hidden).astype(jnp.float32)]
    in_specs += [_const((9, hidden)), _const((1, hidden)), _const((1, hidden)),
                 _const((hidden, cout)), _const((1, cout)), _const((1, cout))]
    args += [params["w_dw"].reshape(9, hidden).astype(jnp.float32),
             params["s_dw"].reshape(1, hidden).astype(jnp.float32),
             params["b_dw"].reshape(1, hidden).astype(jnp.float32),
             params["w_proj"].astype(jnp.bfloat16),
             params["s_proj"].reshape(1, cout).astype(jnp.float32),
             params["b_proj"].reshape(1, cout).astype(jnp.float32)]

    out = pl.pallas_call(
        kernel,
        out_shape=jax.ShapeDtypeStruct((n, ho, wo, cout), x.dtype),
        grid=(n, n_row_tiles),
        in_specs=in_specs,
        out_specs=pl.BlockSpec((1, toh, wo, cout), lambda b, r: (b, r, 0, 0)),
        scratch_shapes=[pltpu.VMEM((hp, wp, hidden), jnp.float32)],
        compiler_params=pltpu.CompilerParams(
            dimension_semantics=("parallel", "arbitrary"),
            vmem_limit_bytes=vmem_limit),
    )(*args)
    return jnp.transpose(out, (0, 3, 1, 2))  # -> NCHW


# ---------------------------------------------------------------------------
# Deterministic parameter construction (inference-mode BN folded to scale/bias)
# ---------------------------------------------------------------------------
def make_params(key, in_channels, out_channels, expand_ratio):
    hidden = int(round(in_channels * expand_ratio))
    ks = jax.random.split(key, 16)

    def bn_fold(kg, kb, km, kv, c):
        gamma = 1.0 + 0.1 * jax.random.normal(kg, (c,), jnp.float32)
        beta = 0.1 * jax.random.normal(kb, (c,), jnp.float32)
        mean = 0.05 * jax.random.normal(km, (c,), jnp.float32)
        var = jax.random.uniform(kv, (c,), jnp.float32, 0.5, 1.5)
        scale = gamma * jax.lax.rsqrt(var + _BN_EPS)
        bias = beta - mean * scale
        return scale, bias

    p = {}
    if expand_ratio != 1:
        p["w_exp"] = 0.2 * jax.random.normal(ks[0], (in_channels, hidden),
                                             jnp.float32)
        p["s_exp"], p["b_exp"] = bn_fold(ks[1], ks[2], ks[3], ks[4], hidden)
    p["w_dw"] = 0.2 * jax.random.normal(ks[5], (3, 3, hidden), jnp.float32)
    p["s_dw"], p["b_dw"] = bn_fold(ks[6], ks[7], ks[8], ks[9], hidden)
    p["w_proj"] = 0.2 * jax.random.normal(ks[10], (hidden, out_channels),
                                          jnp.float32)
    p["s_proj"], p["b_proj"] = bn_fold(ks[11], ks[12], ks[13], ks[14],
                                       out_channels)
    return p


# ---------------------------------------------------------------------------
# Pure-JAX reference (independent of the kernels) for validation
# ---------------------------------------------------------------------------
def reference_forward(x_nchw, params, *, stride, expand_ratio, in_channels,
                      out_channels):
    dn = ("NHWC", "HWIO", "NHWC")
    x = jnp.transpose(x_nchw, (0, 2, 3, 1))
    h = x
    if expand_ratio != 1:
        hidden = params["w_exp"].shape[1]
        w = params["w_exp"].reshape(1, 1, in_channels, hidden)
        h = jax.lax.conv_general_dilated(h, w, (1, 1), ((1, 1), (1, 1)),
                                         dimension_numbers=dn)
        h = jnp.clip(h * params["s_exp"] + params["b_exp"], 0.0, 6.0)
    hidden = h.shape[-1]
    wdw = params["w_dw"].reshape(3, 3, 1, hidden)
    h = jax.lax.conv_general_dilated(h, wdw, (stride, stride),
                                     ((1, 1), (1, 1)), dimension_numbers=dn,
                                     feature_group_count=hidden)
    h = jnp.clip(h * params["s_dw"] + params["b_dw"], 0.0, 6.0)
    wp = params["w_proj"].reshape(1, 1, hidden, out_channels)
    h = jax.lax.conv_general_dilated(h, wp, (1, 1), ((0, 0), (0, 0)),
                                     dimension_numbers=dn)
    h = h * params["s_proj"] + params["b_proj"]
    if stride == 1 and in_channels == out_channels:
        h = h + x
    return jnp.transpose(h, (0, 3, 1, 2))


if __name__ == "__main__":
    key = jax.random.PRNGKey(0)
    kx, kp1, kp2, kp3 = jax.random.split(key, 4)

    configs = [
        # (in_ch, out_ch, stride, expand_ratio, max_row_tile)
        (8, 16, 2, 6, None),  # expansion (padding=1 1x1 quirk), stride-2
        (8, 8, 1, 1, 4),      # no expansion, stride-1, residual; 4 row tiles
        (8, 16, 1, 6, 6),     # expansion, stride-1, no residual; 3 row tiles
    ]

    x = jax.random.normal(kx, (2, 8, 16, 16), jnp.float32)  # NCHW, like PyTorch
    pkeys = [kp1, kp2, kp3]

    for (cin, cout, stride, er, mrt), pk in zip(configs, pkeys):
        params = make_params(pk, cin, cout, er)
        out = inverted_residual_forward(x, params, stride=stride,
                                        expand_ratio=er, in_channels=cin,
                                        out_channels=cout, max_row_tile=mrt)
        out = jax.block_until_ready(out)
        ref = reference_forward(x, params, stride=stride, expand_ratio=er,
                                in_channels=cin, out_channels=cout)
        assert out.shape == ref.shape, (out.shape, ref.shape)
        # bf16 MXU compute (f32 accumulation) -> slightly relaxed tolerance.
        err = float(jnp.max(jnp.abs(out - ref)))
        assert jnp.allclose(out, ref, rtol=2e-2, atol=3e-2), err

    print("KERNEL_OK")
</pallas_src>

<mosaic_0001>
module attributes {stable_mosaic.version = 11 : i64} {
  func.func @kernel(%arg0: i32, %arg1: i32, %arg2: memref<1x16x16x8xf32, #tpu.memory_space<vmem>>, %arg3: memref<8x48xbf16, #tpu.memory_space<vmem>>, %arg4: memref<1x48xf32, #tpu.memory_space<vmem>>, %arg5: memref<1x48xf32, #tpu.memory_space<vmem>>, %arg6: memref<9x48xf32, #tpu.memory_space<vmem>>, %arg7: memref<1x48xf32, #tpu.memory_space<vmem>>, %arg8: memref<1x48xf32, #tpu.memory_space<vmem>>, %arg9: memref<48x16xbf16, #tpu.memory_space<vmem>>, %arg10: memref<1x16xf32, #tpu.memory_space<vmem>>, %arg11: memref<1x16xf32, #tpu.memory_space<vmem>>, %arg12: memref<1x9x9x16xf32, #tpu.memory_space<vmem>>, %arg13: memref<20x20x48xf32, #tpu.memory_space<vmem>>) attributes {dimension_semantics = [#tpu.dimension_semantics<parallel>, #tpu.dimension_semantics<arbitrary>], iteration_bounds = array<i64: 2, 1>, scalar_prefetch = 0 : i64, scratch_operands = 1 : i64, tpu.core_type = #tpu.core_type<tc>, window_params = [{transform_indices = @transform_0, window_bounds = array<i64: 1, 16, 16, 8>}, {pipeline_mode = #tpu.pipeline_mode<synchronous>, transform_indices = @transform_1, window_bounds = array<i64: 8, 48>}, {pipeline_mode = #tpu.pipeline_mode<synchronous>, transform_indices = @transform_2, window_bounds = array<i64: 1, 48>}, {pipeline_mode = #tpu.pipeline_mode<synchronous>, transform_indices = @transform_3, window_bounds = array<i64: 1, 48>}, {pipeline_mode = #tpu.pipeline_mode<synchronous>, transform_indices = @transform_4, window_bounds = array<i64: 9, 48>}, {pipeline_mode = #tpu.pipeline_mode<synchronous>, transform_indices = @transform_5, window_bounds = array<i64: 1, 48>}, {pipeline_mode = #tpu.pipeline_mode<synchronous>, transform_indices = @transform_6, window_bounds = array<i64: 1, 48>}, {pipeline_mode = #tpu.pipeline_mode<synchronous>, transform_indices = @transform_7, window_bounds = array<i64: 48, 16>}, {pipeline_mode = #tpu.pipeline_mode<synchronous>, transform_indices = @transform_8, window_bounds = array<i64: 1, 16>}, {pipeline_mode = #tpu.pipeline_mode<synchronous>, transform_indices = @transform_9, window_bounds = array<i64: 1, 16>}, {transform_indices = @transform_10, window_bounds = array<i64: 1, 9, 9, 16>}]} {
    %c0_i32 = arith.constant 0 : i32
    %0 = arith.cmpi eq, %arg1, %c0_i32 : i32
    %1 = arith.extui %0 : i1 to i32
    %c0_i32_0 = arith.constant 0 : i32
    %2 = arith.cmpi ne, %1, %c0_i32_0 : i32
    scf.if %2 {
      %cst_22 = arith.constant 0.000000e+00 : f32
      %513 = vector.broadcast %cst_22 : f32 to vector<1x20x48xf32>
      %c0_23 = arith.constant 0 : index
      %c0_24 = arith.constant 0 : index
      %c0_25 = arith.constant 0 : index
      %514 = vector.load %arg13[%c0_23, %c0_24, %c0_25] : memref<20x20x48xf32, #tpu.memory_space<vmem>>, vector<1x20x48xf32>
      tpu.vector_store %arg13[%c0_23, %c0_24, %c0_25], %513 {strides = array<i32>} : memref<20x20x48xf32, #tpu.memory_space<vmem>>, vector<1x20x48xf32>,
      %c19 = arith.constant 19 : index
      %c0_26 = arith.constant 0 : index
      %c0_27 = arith.constant 0 : index
      %515 = vector.load %arg13[%c19, %c0_26, %c0_27] : memref<20x20x48xf32, #tpu.memory_space<vmem>>, vector<1x20x48xf32>
      tpu.vector_store %arg13[%c19, %c0_26, %c0_27], %513 {strides = array<i32>} : memref<20x20x48xf32, #tpu.memory_space<vmem>>, vector<1x20x48xf32>,
      %cst_28 = arith.constant 0.000000e+00 : f32
      %516 = vector.broadcast %cst_28 : f32 to vector<18x1x48xf32>
      %c1_29 = arith.constant 1 : index
      %c0_30 = arith.constant 0 : index
      %c0_31 = arith.constant 0 : index
      %517 = vector.load %arg13[%c1_29, %c0_30, %c0_31] : memref<20x20x48xf32, #tpu.memory_space<vmem>>, vector<18x1x48xf32>
      tpu.vector_store %arg13[%c1_29, %c0_30, %c0_31], %516 {strides = array<i32>} : memref<20x20x48xf32, #tpu.memory_space<vmem>>, vector<18x1x48xf32>,
      %c1_32 = arith.constant 1 : index
      %c19_33 = arith.constant 19 : index
      %c0_34 = arith.constant 0 : index
      %518 = vector.load %arg13[%c1_32, %c19_33, %c0_34] : memref<20x20x48xf32, #tpu.memory_space<vmem>>, vector<18x1x48xf32>
      tpu.vector_store %arg13[%c1_32, %c19_33, %c0_34], %516 {strides = array<i32>} : memref<20x20x48xf32, #tpu.memory_space<vmem>>, vector<18x1x48xf32>,
      %c0_35 = arith.constant 0 : index
      %c0_36 = arith.constant 0 : index
      %519 = vector.load %arg5[%c0_35, %c0_36] : memref<1x48xf32, #tpu.memory_space<vmem>>, vector<1x48xf32>
      %cst_37 = arith.constant 0.000000e+00 : f32
      %cst_38 = arith.constant 6.000000e+00 : f32
      %520 = vector.broadcast %cst_37 : f32 to vector<1x48xf32>
      %521 = arith.maximumf %520, %519 : vector<1x48xf32>
      %522 = vector.broadcast %cst_38 : f32 to vector<1x48xf32>
      %523 = arith.minimumf %522, %521 : vector<1x48xf32>
      %524 = vector.shape_cast %523 : vector<1x48xf32> to vector<1x1x48xf32>
      %525 = vector.shape_cast %524 : vector<1x1x48xf32> to vector<1x1x48xf32>
      %526 = vector.broadcast %525 : vector<1x1x48xf32> to vector<1x18x48xf32>
      %527 = vector.shape_cast %524 : vector<1x1x48xf32> to vector<1x1x48xf32>
      %528 = vector.broadcast %527 : vector<1x1x48xf32> to vector<16x1x48xf32>
      %c1_39 = arith.constant 1 : index
      %c1_40 = arith.constant 1 : index
      %c0_41 = arith.constant 0 : index
      %529 = vector.load %arg13[%c1_39, %c1_40, %c0_41] : memref<20x20x48xf32, #tpu.memory_space<vmem>>, vector<1x18x48xf32>
      tpu.vector_store %arg13[%c1_39, %c1_40, %c0_41], %526 {strides = array<i32>} : memref<20x20x48xf32, #tpu.memory_space<vmem>>, vector<1x18x48xf32>,
      %c18 = arith.constant 18 : index
      %c1_42 = arith.constant 1 : index
      %c0_43 = arith.constant 0 : index
      %530 = vector.load %arg13[%c18, %c1_42, %c0_43] : memref<20x20x48xf32, #tpu.memory_space<vmem>>, vector<1x18x48xf32>
      tpu.vector_store %arg13[%c18, %c1_42, %c0_43], %526 {strides = array<i32>} : memref<20x20x48xf32, #tpu.memory_space<vmem>>, vector<1x18x48xf32>,
      %c2_44 = arith.constant 2 : index
      %c1_45 = arith.constant 1 : index
      %c0_46 = arith.constant 0 : index
      %531 = vector.load %arg13[%c2_44, %c1_45, %c0_46] : memref<20x20x48xf32, #tpu.memory_space<vmem>>, vector<16x1x48xf32>
      tpu.vector_store %arg13[%c2_44, %c1_45, %c0_46], %528 {strides = array<i32>} : memref<20x20x48xf32, #tpu.memory_space<vmem>>, vector<16x1x48xf32>,
      %c2_47 = arith.constant 2 : index
      %c18_48 = arith.constant 18 : index
      %c0_49 = arith.constant 0 : index
      %532 = vector.load %arg13[%c2_47, %c18_48, %c0_49] : memref<20x20x48xf32, #tpu.memory_space<vmem>>, vector<16x1x48xf32>
      tpu.vector_store %arg13[%c2_47, %c18_48, %c0_49], %528 {strides = array<i32>} : memref<20x20x48xf32, #tpu.memory_space<vmem>>, vector<16x1x48xf32>,
      %c0_50 = arith.constant 0 : index
      %c0_51 = arith.constant 0 : index
      %c0_52 = arith.constant 0 : index
      %c0_53 = arith.constant 0 : index
      %533 = vector.load %arg2[%c0_50, %c0_51, %c0_52, %c0_53] : memref<1x16x16x8xf32, #tpu.memory_space<vmem>>, vector<1x16x16x8xf32>
      %534 = vector.shape_cast %533 : vector<1x16x16x8xf32> to vector<16x16x8xf32>
      %535 = vector.shape_cast %534 : vector<16x16x8xf32> to vector<256x8xf32>
      %536 = arith.truncf %535 : vector<256x8xf32> to vector<256x8xbf16>
      %c0_54 = arith.constant 0 : index
      %c0_55 = arith.constant 0 : index
      %537 = vector.load %arg3[%c0_54, %c0_55] : memref<8x48xbf16, #tpu.memory_space<vmem>>, vector<8x48xbf16>
      %cst_56 = arith.constant dense<0.000000e+00> : vector<256x48xf32>
      %538 = tpu.matmul %536, %537, %cst_56 {dimension_numbers = #tpu.dot_dimension_numbers<[1], [0], [0], [1], [0, 0, 1, 1], [], []>} : vector<256x8xbf16>, vector<8x48xbf16>, vector<256x48xf32> -> vector<256x48xf32>
      %c0_57 = arith.constant 0 : index
      %c0_58 = arith.constant 0 : index
      %539 = vector.load %arg4[%c0_57, %c0_58] : memref<1x48xf32, #tpu.memory_space<vmem>>, vector<1x48xf32>
      %540 = vector.broadcast %539 : vector<1x48xf32> to vector<256x48xf32>
      %541 = arith.mulf %538, %540 : vector<256x48xf32>
      %c0_59 = arith.constant 0 : index
      %c0_60 = arith.constant 0 : index
      %542 = vector.load %arg5[%c0_59, %c0_60] : memref<1x48xf32, #tpu.memory_space<vmem>>, vector<1x48xf32>
      %543 = vector.broadcast %542 : vector<1x48xf32> to vector<256x48xf32>
      %544 = arith.addf %541, %543 : vector<256x48xf32>
      %cst_61 = arith.constant 0.000000e+00 : f32
      %cst_62 = arith.constant 6.000000e+00 : f32
      %545 = vector.broadcast %cst_61 : f32 to vector<256x48xf32>
      %546 = arith.maximumf %545, %544 : vector<256x48xf32>
      %547 = vector.broadcast %cst_62 : f32 to vector<256x48xf32>
      %548 = arith.minimumf %547, %546 : vector<256x48xf32>
      %549 = vector.shape_cast %548 : vector<256x48xf32> to vector<16x16x48xf32>
      %c2_63 = arith.constant 2 : index
      %c2_64 = arith.constant 2 : index
      %c0_65 = arith.constant 0 : index
      %550 = vector.load %arg13[%c2_63, %c2_64, %c0_65] : memref<20x20x48xf32, #tpu.memory_space<vmem>>, vector<16x16x48xf32>
      tpu.vector_store %arg13[%c2_63, %c2_64, %c0_65], %549 {strides = array<i32>} : memref<20x20x48xf32, #tpu.memory_space<vmem>>, vector<16x16x48xf32>,
    } else {
    }
    %c9_i32 = arith.constant 9 : i32
    %3 = arith.muli %arg1, %c9_i32 : i32
    %c2_i32 = arith.constant 2 : i32
    %4 = arith.muli %c2_i32, %3 : i32
    %c0 = arith.constant 0 : index
    %c0_1 = arith.constant 0 : index
    %5 = vector.load %arg6[%c0, %c0_1] : memref<9x48xf32, #tpu.memory_space<vmem>>, vector<9x48xf32>
    %6 = arith.index_cast %4 : i32 to index
    %c0_2 = arith.constant 0 : index
    %c0_3 = arith.constant 0 : index
    %7 = tpu.strided_load %arg13[%6, %c0_2, %c0_3] {strides = array<i32: 1, 2, 1>} : memref<20x20x48xf32, #tpu.memory_space<vmem>>, vector<19x9x48xf32>
    %8 = arith.index_cast %4 : i32 to index
    %c1 = arith.constant 1 : index
    %c0_4 = arith.constant 0 : index
    %9 = tpu.strided_load %arg13[%8, %c1, %c0_4] {strides = array<i32: 1, 2, 1>} : memref<20x20x48xf32, #tpu.memory_space<vmem>>, vector<19x9x48xf32>
    %10 = arith.index_cast %4 : i32 to index
    %c2 = arith.constant 2 : index
    %c0_5 = arith.constant 0 : index
    %11 = tpu.strided_load %arg13[%10, %c2, %c0_5] {strides = array<i32: 1, 2, 1>} : memref<20x20x48xf32, #tpu.memory_space<vmem>>, vector<19x9x48xf32>
    %12 = vector.extract_strided_slice %7 {offsets = [0, 0, 0], sizes = [1, 9, 48], strides = [1, 1, 1]} : vector<19x9x48xf32> to vector<1x9x48xf32>
    %13 = vector.shape_cast %12 : vector<1x9x48xf32> to vector<9x48xf32>
    %14 = vector.extract_strided_slice %5 {offsets = [0, 0], sizes = [1, 48], strides = [1, 1]} : vector<9x48xf32> to vector<1x48xf32>
    %15 = vector.broadcast %14 : vector<1x48xf32> to vector<9x48xf32>
    %16 = arith.mulf %13, %15 : vector<9x48xf32>
    %17 = vector.extract_strided_slice %9 {offsets = [0, 0, 0], sizes = [1, 9, 48], strides = [1, 1, 1]} : vector<19x9x48xf32> to vector<1x9x48xf32>
    %18 = vector.shape_cast %17 : vector<1x9x48xf32> to vector<9x48xf32>
    %19 = vector.extract_strided_slice %5 {offsets = [1, 0], sizes = [1, 48], strides = [1, 1]} : vector<9x48xf32> to vector<1x48xf32>
    %20 = vector.broadcast %19 : vector<1x48xf32> to vector<9x48xf32>
    %21 = arith.mulf %18, %20 : vector<9x48xf32>
    %22 = arith.addf %16, %21 : vector<9x48xf32>
    %23 = vector.extract_strided_slice %11 {offsets = [0, 0, 0], sizes = [1, 9, 48], strides = [1, 1, 1]} : vector<19x9x48xf32> to vector<1x9x48xf32>
    %24 = vector.shape_cast %23 : vector<1x9x48xf32> to vector<9x48xf32>
    %25 = vector.extract_strided_slice %5 {offsets = [2, 0], sizes = [1, 48], strides = [1, 1]} : vector<9x48xf32> to vector<1x48xf32>
    %26 = vector.broadcast %25 : vector<1x48xf32> to vector<9x48xf32>
    %27 = arith.mulf %24, %26 : vector<9x48xf32>
    %28 = arith.addf %22, %27 : vector<9x48xf32>
    %29 = vector.extract_strided_slice %7 {offsets = [1, 0, 0], sizes = [1, 9, 48], strides = [1, 1, 1]} : vector<19x9x48xf32> to vector<1x9x48xf32>
    %30 = vector.shape_cast %29 : vector<1x9x48xf32> to vector<9x48xf32>
    %31 = vector.extract_strided_slice %5 {offsets = [3, 0], sizes = [1, 48], strides = [1, 1]} : vector<9x48xf32> to vector<1x48xf32>
    %32 = vector.broadcast %31 : vector<1x48xf32> to vector<9x48xf32>
    %33 = arith.mulf %30, %32 : vector<9x48xf32>
    %34 = arith.addf %28, %33 : vector<9x48xf32>
    %35 = vector.extract_strided_slice %9 {offsets = [1, 0, 0], sizes = [1, 9, 48], strides = [1, 1, 1]} : vector<19x9x48xf32> to vector<1x9x48xf32>
    %36 = vector.shape_cast %35 : vector<1x9x48xf32> to vector<9x48xf32>
    %37 = vector.extract_strided_slice %5 {offsets = [4, 0], sizes = [1, 48], strides = [1, 1]} : vector<9x48xf32> to vector<1x48xf32>
    %38 = vector.broadcast %37 : vector<1x48xf32> to vector<9x48xf32>
    %39 = arith.mulf %36, %38 : vector<9x48xf32>
    %40 = arith.addf %34, %39 : vector<9x48xf32>
    %41 = vector.extract_strided_slice %11 {offsets = [1, 0, 0], sizes = [1, 9, 48], strides = [1, 1, 1]} : vector<19x9x48xf32> to vector<1x9x48xf32>
    %42 = vector.shape_cast %41 : vector<1x9x48xf32> to vector<9x48xf32>
    %43 = vector.extract_strided_slice %5 {offsets = [5, 0], sizes = [1, 48], strides = [1, 1]} : vector<9x48xf32> to vector<1x48xf32>
    %44 = vector.broadcast %43 : vector<1x48xf32> to vector<9x48xf32>
    %45 = arith.mulf %42, %44 : vector<9x48xf32>
    %46 = arith.addf %40, %45 : vector<9x48xf32>
    %47 = vector.extract_strided_slice %7 {offsets = [2, 0, 0], sizes = [1, 9, 48], strides = [1, 1, 1]} : vector<19x9x48xf32> to vector<1x9x48xf32>
    %48 = vector.shape_cast %47 : vector<1x9x48xf32> to vector<9x48xf32>
    %49 = vector.extract_strided_slice %5 {offsets = [6, 0], sizes = [1, 48], strides = [1, 1]} : vector<9x48xf32> to vector<1x48xf32>
    %50 = vector.broadcast %49 : vector<1x48xf32> to vector<9x48xf32>
    %51 = arith.mulf %48, %50 : vector<9x48xf32>
    %52 = arith.addf %46, %51 : vector<9x48xf32>
    %53 = vector.extract_strided_slice %9 {offsets = [2, 0, 0], sizes = [1, 9, 48], strides = [1, 1, 1]} : vector<19x9x48xf32> to vector<1x9x48xf32>
    %54 = vector.shape_cast %53 : vector<1x9x48xf32> to vector<9x48xf32>
    %55 = vector.extract_strided_slice %5 {offsets = [7, 0], sizes = [1, 48], strides = [1, 1]} : vector<9x48xf32> to vector<1x48xf32>
    %56 = vector.broadcast %55 : vector<1x48xf32> to vector<9x48xf32>
    %57 = arith.mulf %54, %56 : vector<9x48xf32>
    %58 = arith.addf %52, %57 : vector<9x48xf32>
    %59 = vector.extract_strided_slice %11 {offsets = [2, 0, 0], sizes = [1, 9, 48], strides = [1, 1, 1]} : vector<19x9x48xf32> to vector<1x9x48xf32>
    %60 = vector.shape_cast %59 : vector<1x9x48xf32> to vector<9x48xf32>
    %61 = vector.extract_strided_slice %5 {offsets = [8, 0], sizes = [1, 48], strides = [1, 1]} : vector<9x48xf32> to vector<1x48xf32>
    %62 = vector.broadcast %61 : vector<1x48xf32> to vector<9x48xf32>
    %63 = arith.mulf %60, %62 : vector<9x48xf32>
    %64 = arith.addf %58, %63 : vector<9x48xf32>
    %65 = vector.extract_strided_slice %7 {offsets = [2, 0, 0], sizes = [1, 9, 48], strides = [1, 1, 1]} : vector<19x9x48xf32> to vector<1x9x48xf32>
    %66 = vector.shape_cast %65 : vector<1x9x48xf32> to vector<9x48xf32>
    %67 = vector.extract_strided_slice %5 {offsets = [0, 0], sizes = [1, 48], strides = [1, 1]} : vector<9x48xf32> to vector<1x48xf32>
    %68 = vector.broadcast %67 : vector<1x48xf32> to vector<9x48xf32>
    %69 = arith.mulf %66, %68 : vector<9x48xf32>
    %70 = vector.extract_strided_slice %9 {offsets = [2, 0, 0], sizes = [1, 9, 48], strides = [1, 1, 1]} : vector<19x9x48xf32> to vector<1x9x48xf32>
    %71 = vector.shape_cast %70 : vector<1x9x48xf32> to vector<9x48xf32>
    %72 = vector.extract_strided_slice %5 {offsets = [1, 0], sizes = [1, 48], strides = [1, 1]} : vector<9x48xf32> to vector<1x48xf32>
    %73 = vector.broadcast %72 : vector<1x48xf32> to vector<9x48xf32>
    %74 = arith.mulf %71, %73 : vector<9x48xf32>
    %75 = arith.addf %69, %74 : vector<9x48xf32>
    %76 = vector.extract_strided_slice %11 {offsets = [2, 0, 0], sizes = [1, 9, 48], strides = [1, 1, 1]} : vector<19x9x48xf32> to vector<1x9x48xf32>
    %77 = vector.shape_cast %76 : vector<1x9x48xf32> to vector<9x48xf32>
    %78 = vector.extract_strided_slice %5 {offsets = [2, 0], sizes = [1, 48], strides = [1, 1]} : vector<9x48xf32> to vector<1x48xf32>
    %79 = vector.broadcast %78 : vector<1x48xf32> to vector<9x48xf32>
    %80 = arith.mulf %77, %79 : vector<9x48xf32>
    %81 = arith.addf %75, %80 : vector<9x48xf32>
    %82 = vector.extract_strided_slice %7 {offsets = [3, 0, 0], sizes = [1, 9, 48], strides = [1, 1, 1]} : vector<19x9x48xf32> to vector<1x9x48xf32>
    %83 = vector.shape_cast %82 : vector<1x9x48xf32> to vector<9x48xf32>
    %84 = vector.extract_strided_slice %5 {offsets = [3, 0], sizes = [1, 48], strides = [1, 1]} : vector<9x48xf32> to vector<1x48xf32>
    %85 = vector.broadcast %84 : vector<1x48xf32> to vector<9x48xf32>
    %86 = arith.mulf %83, %85 : vector<9x48xf32>
    %87 = arith.addf %81, %86 : vector<9x48xf32>
    %88 = vector.extract_strided_slice %9 {offsets = [3, 0, 0], sizes = [1, 9, 48], strides = [1, 1, 1]} : vector<19x9x48xf32> to vector<1x9x48xf32>
    %89 = vector.shape_cast %88 : vector<1x9x48xf32> to vector<9x48xf32>
    %90 = vector.extract_strided_slice %5 {offsets = [4, 0], sizes = [1, 48], strides = [1, 1]} : vector<9x48xf32> to vector<1x48xf32>
    %91 = vector.broadcast %90 : vector<1x48xf32> to vector<9x48xf32>
    %92 = arith.mulf %89, %91 : vector<9x48xf32>
    %93 = arith.addf %87, %92 : vector<9x48xf32>
    %94 = vector.extract_strided_slice %11 {offsets = [3, 0, 0], sizes = [1, 9, 48], strides = [1, 1, 1]} : vector<19x9x48xf32> to vector<1x9x48xf32>
    %95 = vector.shape_cast %94 : vector<1x9x48xf32> to vector<9x48xf32>
    %96 = vector.extract_strided_slice %5 {offsets = [5, 0], sizes = [1, 48], strides = [1, 1]} : vector<9x48xf32> to vector<1x48xf32>
    %97 = vector.broadcast %96 : vector<1x48xf32> to vector<9x48xf32>
    %98 = arith.mulf %95, %97 : vector<9x48xf32>
    %99 = arith.addf %93, %98 : vector<9x48xf32>
    %100 = vector.extract_strided_slice %7 {offsets = [4, 0, 0], sizes = [1, 9, 48], strides = [1, 1, 1]} : vector<19x9x48xf32> to vector<1x9x48xf32>
    %101 = vector.shape_cast %100 : vector<1x9x48xf32> to vector<9x48xf32>
    %102 = vector.extract_strided_slice %5 {offsets = [6, 0], sizes = [1, 48], strides = [1, 1]} : vector<9x48xf32> to vector<1x48xf32>
    %103 = vector.broadcast %102 : vector<1x48xf32> to vector<9x48xf32>
    %104 = arith.mulf %101, %103 : vector<9x48xf32>
    %105 = arith.addf %99, %104 : vector<9x48xf32>
    %106 = vector.extract_strided_slice %9 {offsets = [4, 0, 0], sizes = [1, 9, 48], strides = [1, 1, 1]} : vector<19x9x48xf32> to vector<1x9x48xf32>
    %107 = vector.shape_cast %106 : vector<1x9x48xf32> to vector<9x48xf32>
    %108 = vector.extract_strided_slice %5 {offsets = [7, 0], sizes = [1, 48], strides = [1, 1]} : vector<9x48xf32> to vector<1x48xf32>
    %109 = vector.broadcast %108 : vector<1x48xf32> to vector<9x48xf32>
    %110 = arith.mulf %107, %109 : vector<9x48xf32>
    %111 = arith.addf %105, %110 : vector<9x48xf32>
    %112 = vector.extract_strided_slice %11 {offsets = [4, 0, 0], sizes = [1, 9, 48], strides = [1, 1, 1]} : vector<19x9x48xf32> to vector<1x9x48xf32>
    %113 = vector.shape_cast %112 : vector<1x9x48xf32> to vector<9x48xf32>
    %114 = vector.extract_strided_slice %5 {offsets = [8, 0], sizes = [1, 48], strides = [1, 1]} : vector<9x48xf32> to vector<1x48xf32>
    %115 = vector.broadcast %114 : vector<1x48xf32> to vector<9x48xf32>
    %116 = arith.mulf %113, %115 : vector<9x48xf32>
    %117 = arith.addf %111, %116 : vector<9x48xf32>
    %118 = vector.extract_strided_slice %7 {offsets = [4, 0, 0], sizes = [1, 9, 48], strides = [1, 1, 1]} : vector<19x9x48xf32> to vector<1x9x48xf32>
    %119 = vector.shape_cast %118 : vector<1x9x48xf32> to vector<9x48xf32>
    %120 = vector.extract_strided_slice %5 {offsets = [0, 0], sizes = [1, 48], strides = [1, 1]} : vector<9x48xf32> to vector<1x48xf32>
    %121 = vector.broadcast %120 : vector<1x48xf32> to vector<9x48xf32>
    %122 = arith.mulf %119, %121 : vector<9x48xf32>
    %123 = vector.extract_strided_slice %9 {offsets = [4, 0, 0], sizes = [1, 9, 48], strides = [1, 1, 1]} : vector<19x9x48xf32> to vector<1x9x48xf32>
    %124 = vector.shape_cast %123 : vector<1x9x48xf32> to vector<9x48xf32>
    %125 = vector.extract_strided_slice %5 {offsets = [1, 0], sizes = [1, 48], strides = [1, 1]} : vector<9x48xf32> to vector<1x48xf32>
    %126 = vector.broadcast %125 : vector<1x48xf32> to vector<9x48xf32>
    %127 = arith.mulf %124, %126 : vector<9x48xf32>
    %128 = arith.addf %122, %127 : vector<9x48xf32>
    %129 = vector.extract_strided_slice %11 {offsets = [4, 0, 0], sizes = [1, 9, 48], strides = [1, 1, 1]} : vector<19x9x48xf32> to vector<1x9x48xf32>
    %130 = vector.shape_cast %129 : vector<1x9x48xf32> to vector<9x48xf32>
    %131 = vector.extract_strided_slice %5 {offsets = [2, 0], sizes = [1, 48], strides = [1, 1]} : vector<9x48xf32> to vector<1x48xf32>
    %132 = vector.broadcast %131 : vector<1x48xf32> to vector<9x48xf32>
    %133 = arith.mulf %130, %132 : vector<9x48xf32>
    %134 = arith.addf %128, %133 : vector<9x48xf32>
    %135 = vector.extract_strided_slice %7 {offsets = [5, 0, 0], sizes = [1, 9, 48], strides = [1, 1, 1]} : vector<19x9x48xf32> to vector<1x9x48xf32>
    %136 = vector.shape_cast %135 : vector<1x9x48xf32> to vector<9x48xf32>
    %137 = vector.extract_strided_slice %5 {offsets = [3, 0], sizes = [1, 48], strides = [1, 1]} : vector<9x48xf32> to vector<1x48xf32>
    %138 = vector.broadcast %137 : vector<1x48xf32> to vector<9x48xf32>
    %139 = arith.mulf %136, %138 : vector<9x48xf32>
    %140 = arith.addf %134, %139 : vector<9x48xf32>
    %141 = vector.extract_strided_slice %9 {offsets = [5, 0, 0], sizes = [1, 9, 48], strides = [1, 1, 1]} : vector<19x9x48xf32> to vector<1x9x48xf32>
    %142 = vector.shape_cast %141 : vector<1x9x48xf32> to vector<9x48xf32>
    %143 = vector.extract_strided_slice %5 {offsets = [4, 0], sizes = [1, 48], strides = [1, 1]} : vector<9x48xf32> to vector<1x48xf32>
    %144 = vector.broadcast %143 : vector<1x48xf32> to vector<9x48xf32>
    %145 = arith.mulf %142, %144 : vector<9x48xf32>
    %146 = arith.addf %140, %145 : vector<9x48xf32>
    %147 = vector.extract_strided_slice %11 {offsets = [5, 0, 0], sizes = [1, 9, 48], strides = [1, 1, 1]} : vector<19x9x48xf32> to vector<1x9x48xf32>
    %148 = vector.shape_cast %147 : vector<1x9x48xf32> to vector<9x48xf32>
    %149 = vector.extract_strided_slice %5 {offsets = [5, 0], sizes = [1, 48], strides = [1, 1]} : vector<9x48xf32> to vector<1x48xf32>
    %150 = vector.broadcast %149 : vector<1x48xf32> to vector<9x48xf32>
    %151 = arith.mulf %148, %150 : vector<9x48xf32>
    %152 = arith.addf %146, %151 : vector<9x48xf32>
    %153 = vector.extract_strided_slice %7 {offsets = [6, 0, 0], sizes = [1, 9, 48], strides = [1, 1, 1]} : vector<19x9x48xf32> to vector<1x9x48xf32>
    %154 = vector.shape_cast %153 : vector<1x9x48xf32> to vector<9x48xf32>
    %155 = vector.extract_strided_slice %5 {offsets = [6, 0], sizes = [1, 48], strides = [1, 1]} : vector<9x48xf32> to vector<1x48xf32>
    %156 = vector.broadcast %155 : vector<1x48xf32> to vector<9x48xf32>
    %157 = arith.mulf %154, %156 : vector<9x48xf32>
    %158 = arith.addf %152, %157 : vector<9x48xf32>
    %159 = vector.extract_strided_slice %9 {offsets = [6, 0, 0], sizes = [1, 9, 48], strides = [1, 1, 1]} : vector<19x9x48xf32> to vector<1x9x48xf32>
    %160 = vector.shape_cast %159 : vector<1x9x48xf32> to vector<9x48xf32>
    %161 = vector.extract_strided_slice %5 {offsets = [7, 0], sizes = [1, 48], strides = [1, 1]} : vector<9x48xf32> to vector<1x48xf32>
    %162 = vector.broadcast %161 : vector<1x48xf32> to vector<9x48xf32>
    %163 = arith.mulf %160, %162 : vector<9x48xf32>
    %164 = arith.addf %158, %163 : vector<9x48xf32>
    %165 = vector.extract_strided_slice %11 {offsets = [6, 0, 0], sizes = [1, 9, 48], strides = [1, 1, 1]} : vector<19x9x48xf32> to vector<1x9x48xf32>
    %166 = vector.shape_cast %165 : vector<1x9x48xf32> to vector<9x48xf32>
    %167 = vector.extract_strided_slice %5 {offsets = [8, 0], sizes = [1, 48], strides = [1, 1]} : vector<9x48xf32> to vector<1x48xf32>
    %168 = vector.broadcast %167 : vector<1x48xf32> to vector<9x48xf32>
    %169 = arith.mulf %166, %168 : vector<9x48xf32>
    %170 = arith.addf %164, %169 : vector<9x48xf32>
    %171 = vector.extract_strided_slice %7 {offsets = [6, 0, 0], sizes = [1, 9, 48], strides = [1, 1, 1]} : vector<19x9x48xf32> to vector<1x9x48xf32>
    %172 = vector.shape_cast %171 : vector<1x9x48xf32> to vector<9x48xf32>
    %173 = vector.extract_strided_slice %5 {offsets = [0, 0], sizes = [1, 48], strides = [1, 1]} : vector<9x48xf32> to vector<1x48xf32>
    %174 = vector.broadcast %173 : vector<1x48xf32> to vector<9x48xf32>
    %175 = arith.mulf %172, %174 : vector<9x48xf32>
    %176 = vector.extract_strided_slice %9 {offsets = [6, 0, 0], sizes = [1, 9, 48], strides = [1, 1, 1]} : vector<19x9x48xf32> to vector<1x9x48xf32>
    %177 = vector.shape_cast %176 : vector<1x9x48xf32> to vector<9x48xf32>
    %178 = vector.extract_strided_slice %5 {offsets = [1, 0], sizes = [1, 48], strides = [1, 1]} : vector<9x48xf32> to vector<1x48xf32>
    %179 = vector.broadcast %178 : vector<1x48xf32> to vector<9x48xf32>
    %180 = arith.mulf %177, %179 : vector<9x48xf32>
    %181 = arith.addf %175, %180 : vector<9x48xf32>
    %182 = vector.extract_strided_slice %11 {offsets = [6, 0, 0], sizes = [1, 9, 48], strides = [1, 1, 1]} : vector<19x9x48xf32> to vector<1x9x48xf32>
    %183 = vector.shape_cast %182 : vector<1x9x48xf32> to vector<9x48xf32>
    %184 = vector.extract_strided_slice %5 {offsets = [2, 0], sizes = [1, 48], strides = [1, 1]} : vector<9x48xf32> to vector<1x48xf32>
    %185 = vector.broadcast %184 : vector<1x48xf32> to vector<9x48xf32>
    %186 = arith.mulf %183, %185 : vector<9x48xf32>
    %187 = arith.addf %181, %186 : vector<9x48xf32>
    %188 = vector.extract_strided_slice %7 {offsets = [7, 0, 0], sizes = [1, 9, 48], strides = [1, 1, 1]} : vector<19x9x48xf32> to vector<1x9x48xf32>
    %189 = vector.shape_cast %188 : vector<1x9x48xf32> to vector<9x48xf32>
    %190 = vector.extract_strided_slice %5 {offsets = [3, 0], sizes = [1, 48], strides = [1, 1]} : vector<9x48xf32> to vector<1x48xf32>
    %191 = vector.broadcast %190 : vector<1x48xf32> to vector<9x48xf32>
    %192 = arith.mulf %189, %191 : vector<9x48xf32>
    %193 = arith.addf %187, %192 : vector<9x48xf32>
    %194 = vector.extract_strided_slice %9 {offsets = [7, 0, 0], sizes = [1, 9, 48], strides = [1, 1, 1]} : vector<19x9x48xf32> to vector<1x9x48xf32>
    %195 = vector.shape_cast %194 : vector<1x9x48xf32> to vector<9x48xf32>
    %196 = vector.extract_strided_slice %5 {offsets = [4, 0], sizes = [1, 48], strides = [1, 1]} : vector<9x48xf32> to vector<1x48xf32>
    %197 = vector.broadcast %196 : vector<1x48xf32> to vector<9x48xf32>
    %198 = arith.mulf %195, %197 : vector<9x48xf32>
    %199 = arith.addf %193, %198 : vector<9x48xf32>
    %200 = vector.extract_strided_slice %11 {offsets = [7, 0, 0], sizes = [1, 9, 48], strides = [1, 1, 1]} : vector<19x9x48xf32> to vector<1x9x48xf32>
    %201 = vector.shape_cast %200 : vector<1x9x48xf32> to vector<9x48xf32>
    %202 = vector.extract_strided_slice %5 {offsets = [5, 0], sizes = [1, 48], strides = [1, 1]} : vector<9x48xf32> to vector<1x48xf32>
    %203 = vector.broadcast %202 : vector<1x48xf32> to vector<9x48xf32>
    %204 = arith.mulf %201, %203 : vector<9x48xf32>
    %205 = arith.addf %199, %204 : vector<9x48xf32>
    %206 = vector.extract_strided_slice %7 {offsets = [8, 0, 0], sizes = [1, 9, 48], strides = [1, 1, 1]} : vector<19x9x48xf32> to vector<1x9x48xf32>
    %207 = vector.shape_cast %206 : vector<1x9x48xf32> to vector<9x48xf32>
    %208 = vector.extract_strided_slice %5 {offsets = [6, 0], sizes = [1, 48], strides = [1, 1]} : vector<9x48xf32> to vector<1x48xf32>
    %209 = vector.broadcast %208 : vector<1x48xf32> to vector<9x48xf32>
    %210 = arith.mulf %207, %209 : vector<9x48xf32>
    %211 = arith.addf %205, %210 : vector<9x48xf32>
    %212 = vector.extract_strided_slice %9 {offsets = [8, 0, 0], sizes = [1, 9, 48], strides = [1, 1, 1]} : vector<19x9x48xf32> to vector<1x9x48xf32>
    %213 = vector.shape_cast %212 : vector<1x9x48xf32> to vector<9x48xf32>
    %214 = vector.extract_strided_slice %5 {offsets = [7, 0], sizes = [1, 48], strides = [1, 1]} : vector<9x48xf32> to vector<1x48xf32>
    %215 = vector.broadcast %214 : vector<1x48xf32> to vector<9x48xf32>
    %216 = arith.mulf %213, %215 : vector<9x48xf32>
    %217 = arith.addf %211, %216 : vector<9x48xf32>
    %218 = vector.extract_strided_slice %11 {offsets = [8, 0, 0], sizes = [1, 9, 48], strides = [1, 1, 1]} : vector<19x9x48xf32> to vector<1x9x48xf32>
    %219 = vector.shape_cast %218 : vector<1x9x48xf32> to vector<9x48xf32>
    %220 = vector.extract_strided_slice %5 {offsets = [8, 0], sizes = [1, 48], strides = [1, 1]} : vector<9x48xf32> to vector<1x48xf32>
    %221 = vector.broadcast %220 : vector<1x48xf32> to vector<9x48xf32>
    %222 = arith.mulf %219, %221 : vector<9x48xf32>
    %223 = arith.addf %217, %222 : vector<9x48xf32>
    %224 = vector.extract_strided_slice %7 {offsets = [8, 0, 0], sizes = [1, 9, 48], strides = [1, 1, 1]} : vector<19x9x48xf32> to vector<1x9x48xf32>
    %225 = vector.shape_cast %224 : vector<1x9x48xf32> to vector<9x48xf32>
    %226 = vector.extract_strided_slice %5 {offsets = [0, 0], sizes = [1, 48], strides = [1, 1]} : vector<9x48xf32> to vector<1x48xf32>
    %227 = vector.broadcast %226 : vector<1x48xf32> to vector<9x48xf32>
    %228 = arith.mulf %225, %227 : vector<9x48xf32>
    %229 = vector.extract_strided_slice %9 {offsets = [8, 0, 0], sizes = [1, 9, 48], strides = [1, 1, 1]} : vector<19x9x48xf32> to vector<1x9x48xf32>
    %230 = vector.shape_cast %229 : vector<1x9x48xf32> to vector<9x48xf32>
    %231 = vector.extract_strided_slice %5 {offsets = [1, 0], sizes = [1, 48], strides = [1, 1]} : vector<9x48xf32> to vector<1x48xf32>
    %232 = vector.broadcast %231 : vector<1x48xf32> to vector<9x48xf32>
    %233 = arith.mulf %230, %232 : vector<9x48xf32>
    %234 = arith.addf %228, %233 : vector<9x48xf32>
    %235 = vector.extract_strided_slice %11 {offsets = [8, 0, 0], sizes = [1, 9, 48], strides = [1, 1, 1]} : vector<19x9x48xf32> to vector<1x9x48xf32>
    %236 = vector.shape_cast %235 : vector<1x9x48xf32> to vector<9x48xf32>
    %237 = vector.extract_strided_slice %5 {offsets = [2, 0], sizes = [1, 48], strides = [1, 1]} : vector<9x48xf32> to vector<1x48xf32>
    %238 = vector.broadcast %237 : vector<1x48xf32> to vector<9x48xf32>
    %239 = arith.mulf %236, %238 : vector<9x48xf32>
    %240 = arith.addf %234, %239 : vector<9x48xf32>
    %241 = vector.extract_strided_slice %7 {offsets = [9, 0, 0], sizes = [1, 9, 48], strides = [1, 1, 1]} : vector<19x9x48xf32> to vector<1x9x48xf32>
    %242 = vector.shape_cast %241 : vector<1x9x48xf32> to vector<9x48xf32>
    %243 = vector.extract_strided_slice %5 {offsets = [3, 0], sizes = [1, 48], strides = [1, 1]} : vector<9x48xf32> to vector<1x48xf32>
    %244 = vector.broadcast %243 : vector<1x48xf32> to vector<9x48xf32>
    %245 = arith.mulf %242, %244 : vector<9x48xf32>
    %246 = arith.addf %240, %245 : vector<9x48xf32>
    %247 = vector.extract_strided_slice %9 {offsets = [9, 0, 0], sizes = [1, 9, 48], strides = [1, 1, 1]} : vector<19x9x48xf32> to vector<1x9x48xf32>
    %248 = vector.shape_cast %247 : vector<1x9x48xf32> to vector<9x48xf32>
    %249 = vector.extract_strided_slice %5 {offsets = [4, 0], sizes = [1, 48], strides = [1, 1]} : vector<9x48xf32> to vector<1x48xf32>
    %250 = vector.broadcast %249 : vector<1x48xf32> to vector<9x48xf32>
    %251 = arith.mulf %248, %250 : vector<9x48xf32>
    %252 = arith.addf %246, %251 : vector<9x48xf32>
    %253 = vector.extract_strided_slice %11 {offsets = [9, 0, 0], sizes = [1, 9, 48], strides = [1, 1, 1]} : vector<19x9x48xf32> to vector<1x9x48xf32>
    %254 = vector.shape_cast %253 : vector<1x9x48xf32> to vector<9x48xf32>
    %255 = vector.extract_strided_slice %5 {offsets = [5, 0], sizes = [1, 48], strides = [1, 1]} : vector<9x48xf32> to vector<1x48xf32>
    %256 = vector.broadcast %255 : vector<1x48xf32> to vector<9x48xf32>
    %257 = arith.mulf %254, %256 : vector<9x48xf32>
    %258 = arith.addf %252, %257 : vector<9x48xf32>
    %259 = vector.extract_strided_slice %7 {offsets = [10, 0, 0], sizes = [1, 9, 48], strides = [1, 1, 1]} : vector<19x9x48xf32> to vector<1x9x48xf32>
    %260 = vector.shape_cast %259 : vector<1x9x48xf32> to vector<9x48xf32>
    %261 = vector.extract_strided_slice %5 {offsets = [6, 0], sizes = [1, 48], strides = [1, 1]} : vector<9x48xf32> to vector<1x48xf32>
    %262 = vector.broadcast %261 : vector<1x48xf32> to vector<9x48xf32>
    %263 = arith.mulf %260, %262 : vector<9x48xf32>
    %264 = arith.addf %258, %263 : vector<9x48xf32>
    %265 = vector.extract_strided_slice %9 {offsets = [10, 0, 0], sizes = [1, 9, 48], strides = [1, 1, 1]} : vector<19x9x48xf32> to vector<1x9x48xf32>
    %266 = vector.shape_cast %265 : vector<1x9x48xf32> to vector<9x48xf32>
    %267 = vector.extract_strided_slice %5 {offsets = [7, 0], sizes = [1, 48], strides = [1, 1]} : vector<9x48xf32> to vector<1x48xf32>
    %268 = vector.broadcast %267 : vector<1x48xf32> to vector<9x48xf32>
    %269 = arith.mulf %266, %268 : vector<9x48xf32>
    %270 = arith.addf %264, %269 : vector<9x48xf32>
    %271 = vector.extract_strided_slice %11 {offsets = [10, 0, 0], sizes = [1, 9, 48], strides = [1, 1, 1]} : vector<19x9x48xf32> to vector<1x9x48xf32>
    %272 = vector.shape_cast %271 : vector<1x9x48xf32> to vector<9x48xf32>
    %273 = vector.extract_strided_slice %5 {offsets = [8, 0], sizes = [1, 48], strides = [1, 1]} : vector<9x48xf32> to vector<1x48xf32>
    %274 = vector.broadcast %273 : vector<1x48xf32> to vector<9x48xf32>
    %275 = arith.mulf %272, %274 : vector<9x48xf32>
    %276 = arith.addf %270, %275 : vector<9x48xf32>
    %277 = vector.extract_strided_slice %7 {offsets = [10, 0, 0], sizes = [1, 9, 48], strides = [1, 1, 1]} : vector<19x9x48xf32> to vector<1x9x48xf32>
    %278 = vector.shape_cast %277 : vector<1x9x48xf32> to vector<9x48xf32>
    %279 = vector.extract_strided_slice %5 {offsets = [0, 0], sizes = [1, 48], strides = [1, 1]} : vector<9x48xf32> to vector<1x48xf32>
    %280 = vector.broadcast %279 : vector<1x48xf32> to vector<9x48xf32>
    %281 = arith.mulf %278, %280 : vector<9x48xf32>
    %282 = vector.extract_strided_slice %9 {offsets = [10, 0, 0], sizes = [1, 9, 48], strides = [1, 1, 1]} : vector<19x9x48xf32> to vector<1x9x48xf32>
    %283 = vector.shape_cast %282 : vector<1x9x48xf32> to vector<9x48xf32>
    %284 = vector.extract_strided_slice %5 {offsets = [1, 0], sizes = [1, 48], strides = [1, 1]} : vector<9x48xf32> to vector<1x48xf32>
    %285 = vector.broadcast %284 : vector<1x48xf32> to vector<9x48xf32>
    %286 = arith.mulf %283, %285 : vector<9x48xf32>
    %287 = arith.addf %281, %286 : vector<9x48xf32>
    %288 = vector.extract_strided_slice %11 {offsets = [10, 0, 0], sizes = [1, 9, 48], strides = [1, 1, 1]} : vector<19x9x48xf32> to vector<1x9x48xf32>
    %289 = vector.shape_cast %288 : vector<1x9x48xf32> to vector<9x48xf32>
    %290 = vector.extract_strided_slice %5 {offsets = [2, 0], sizes = [1, 48], strides = [1, 1]} : vector<9x48xf32> to vector<1x48xf32>
    %291 = vector.broadcast %290 : vector<1x48xf32> to vector<9x48xf32>
    %292 = arith.mulf %289, %291 : vector<9x48xf32>
    %293 = arith.addf %287, %292 : vector<9x48xf32>
    %294 = vector.extract_strided_slice %7 {offsets = [11, 0, 0], sizes = [1, 9, 48], strides = [1, 1, 1]} : vector<19x9x48xf32> to vector<1x9x48xf32>
    %295 = vector.shape_cast %294 : vector<1x9x48xf32> to vector<9x48xf32>
    %296 = vector.extract_strided_slice %5 {offsets = [3, 0], sizes = [1, 48], strides = [1, 1]} : vector<9x48xf32> to vector<1x48xf32>
    %297 = vector.broadcast %296 : vector<1x48xf32> to vector<9x48xf32>
    %298 = arith.mulf %295, %297 : vector<9x48xf32>
    %299 = arith.addf %293, %298 : vector<9x48xf32>
    %300 = vector.extract_strided_slice %9 {offsets = [11, 0, 0], sizes = [1, 9, 48], strides = [1, 1, 1]} : vector<19x9x48xf32> to vector<1x9x48xf32>
    %301 = vector.shape_cast %300 : vector<1x9x48xf32> to vector<9x48xf32>
    %302 = vector.extract_strided_slice %5 {offsets = [4, 0], sizes = [1, 48], strides = [1, 1]} : vector<9x48xf32> to vector<1x48xf32>
    %303 = vector.broadcast %302 : vector<1x48xf32> to vector<9x48xf32>
    %304 = arith.mulf %301, %303 : vector<9x48xf32>
    %305 = arith.addf %299, %304 : vector<9x48xf32>
    %306 = vector.extract_strided_slice %11 {offsets = [11, 0, 0], sizes = [1, 9, 48], strides = [1, 1, 1]} : vector<19x9x48xf32> to vector<1x9x48xf32>
    %307 = vector.shape_cast %306 : vector<1x9x48xf32> to vector<9x48xf32>
    %308 = vector.extract_strided_slice %5 {offsets = [5, 0], sizes = [1, 48], strides = [1, 1]} : vector<9x48xf32> to vector<1x48xf32>
    %309 = vector.broadcast %308 : vector<1x48xf32> to vector<9x48xf32>
    %310 = arith.mulf %307, %309 : vector<9x48xf32>
    %311 = arith.addf %305, %310 : vector<9x48xf32>
    %312 = vector.extract_strided_slice %7 {offsets = [12, 0, 0], sizes = [1, 9, 48], strides = [1, 1, 1]} : vector<19x9x48xf32> to vector<1x9x48xf32>
    %313 = vector.shape_cast %312 : vector<1x9x48xf32> to vector<9x48xf32>
    %314 = vector.extract_strided_slice %5 {offsets = [6, 0], sizes = [1, 48], strides = [1, 1]} : vector<9x48xf32> to vector<1x48xf32>
    %315 = vector.broadcast %314 : vector<1x48xf32> to vector<9x48xf32>
    %316 = arith.mulf %313, %315 : vector<9x48xf32>
    %317 = arith.addf %311, %316 : vector<9x48xf32>
    %318 = vector.extract_strided_slice %9 {offsets = [12, 0, 0], sizes = [1, 9, 48], strides = [1, 1, 1]} : vector<19x9x48xf32> to vector<1x9x48xf32>
    %319 = vector.shape_cast %318 : vector<1x9x48xf32> to vector<9x48xf32>
    %320 = vector.extract_strided_slice %5 {offsets = [7, 0], sizes = [1, 48], strides = [1, 1]} : vector<9x48xf32> to vector<1x48xf32>
    %321 = vector.broadcast %320 : vector<1x48xf32> to vector<9x48xf32>
    %322 = arith.mulf %319, %321 : vector<9x48xf32>
    %323 = arith.addf %317, %322 : vector<9x48xf32>
    %324 = vector.extract_strided_slice %11 {offsets = [12, 0, 0], sizes = [1, 9, 48], strides = [1, 1, 1]} : vector<19x9x48xf32> to vector<1x9x48xf32>
    %325 = vector.shape_cast %324 : vector<1x9x48xf32> to vector<9x48xf32>
    %326 = vector.extract_strided_slice %5 {offsets = [8, 0], sizes = [1, 48], strides = [1, 1]} : vector<9x48xf32> to vector<1x48xf32>
    %327 = vector.broadcast %326 : vector<1x48xf32> to vector<9x48xf32>
    %328 = arith.mulf %325, %327 : vector<9x48xf32>
    %329 = arith.addf %323, %328 : vector<9x48xf32>
    %330 = vector.extract_strided_slice %7 {offsets = [12, 0, 0], sizes = [1, 9, 48], strides = [1, 1, 1]} : vector<19x9x48xf32> to vector<1x9x48xf32>
    %331 = vector.shape_cast %330 : vector<1x9x48xf32> to vector<9x48xf32>
    %332 = vector.extract_strided_slice %5 {offsets = [0, 0], sizes = [1, 48], strides = [1, 1]} : vector<9x48xf32> to vector<1x48xf32>
    %333 = vector.broadcast %332 : vector<1x48xf32> to vector<9x48xf32>
    %334 = arith.mulf %331, %333 : vector<9x48xf32>
    %335 = vector.extract_strided_slice %9 {offsets = [12, 0, 0], sizes = [1, 9, 48], strides = [1, 1, 1]} : vector<19x9x48xf32> to vector<1x9x48xf32>
    %336 = vector.shape_cast %335 : vector<1x9x48xf32> to vector<9x48xf32>
    %337 = vector.extract_strided_slice %5 {offsets = [1, 0], sizes = [1, 48], strides = [1, 1]} : vector<9x48xf32> to vector<1x48xf32>
    %338 = vector.broadcast %337 : vector<1x48xf32> to vector<9x48xf32>
    %339 = arith.mulf %336, %338 : vector<9x48xf32>
    %340 = arith.addf %334, %339 : vector<9x48xf32>
    %341 = vector.extract_strided_slice %11 {offsets = [12, 0, 0], sizes = [1, 9, 48], strides = [1, 1, 1]} : vector<19x9x48xf32> to vector<1x9x48xf32>
    %342 = vector.shape_cast %341 : vector<1x9x48xf32> to vector<9x48xf32>
    %343 = vector.extract_strided_slice %5 {offsets = [2, 0], sizes = [1, 48], strides = [1, 1]} : vector<9x48xf32> to vector<1x48xf32>
    %344 = vector.broadcast %343 : vector<1x48xf32> to vector<9x48xf32>
    %345 = arith.mulf %342, %344 : vector<9x48xf32>
    %346 = arith.addf %340, %345 : vector<9x48xf32>
    %347 = vector.extract_strided_slice %7 {offsets = [13, 0, 0], sizes = [1, 9, 48], strides = [1, 1, 1]} : vector<19x9x48xf32> to vector<1x9x48xf32>
    %348 = vector.shape_cast %347 : vector<1x9x48xf32> to vector<9x48xf32>
    %349 = vector.extract_strided_slice %5 {offsets = [3, 0], sizes = [1, 48], strides = [1, 1]} : vector<9x48xf32> to vector<1x48xf32>
    %350 = vector.broadcast %349 : vector<1x48xf32> to vector<9x48xf32>
    %351 = arith.mulf %348, %350 : vector<9x48xf32>
    %352 = arith.addf %346, %351 : vector<9x48xf32>
    %353 = vector.extract_strided_slice %9 {offsets = [13, 0, 0], sizes = [1, 9, 48], strides = [1, 1, 1]} : vector<19x9x48xf32> to vector<1x9x48xf32>
    %354 = vector.shape_cast %353 : vector<1x9x48xf32> to vector<9x48xf32>
    %355 = vector.extract_strided_slice %5 {offsets = [4, 0], sizes = [1, 48], strides = [1, 1]} : vector<9x48xf32> to vector<1x48xf32>
    %356 = vector.broadcast %355 : vector<1x48xf32> to vector<9x48xf32>
    %357 = arith.mulf %354, %356 : vector<9x48xf32>
    %358 = arith.addf %352, %357 : vector<9x48xf32>
    %359 = vector.extract_strided_slice %11 {offsets = [13, 0, 0], sizes = [1, 9, 48], strides = [1, 1, 1]} : vector<19x9x48xf32> to vector<1x9x48xf32>
    %360 = vector.shape_cast %359 : vector<1x9x48xf32> to vector<9x48xf32>
    %361 = vector.extract_strided_slice %5 {offsets = [5, 0], sizes = [1, 48], strides = [1, 1]} : vector<9x48xf32> to vector<1x48xf32>
    %362 = vector.broadcast %361 : vector<1x48xf32> to vector<9x48xf32>
    %363 = arith.mulf %360, %362 : vector<9x48xf32>
    %364 = arith.addf %358, %363 : vector<9x48xf32>
    %365 = vector.extract_strided_slice %7 {offsets = [14, 0, 0], sizes = [1, 9, 48], strides = [1, 1, 1]} : vector<19x9x48xf32> to vector<1x9x48xf32>
    %366 = vector.shape_cast %365 : vector<1x9x48xf32> to vector<9x48xf32>
    %367 = vector.extract_strided_slice %5 {offsets = [6, 0], sizes = [1, 48], strides = [1, 1]} : vector<9x48xf32> to vector<1x48xf32>
    %368 = vector.broadcast %367 : vector<1x48xf32> to vector<9x48xf32>
    %369 = arith.mulf %366, %368 : vector<9x48xf32>
    %370 = arith.addf %364, %369 : vector<9x48xf32>
    %371 = vector.extract_strided_slice %9 {offsets = [14, 0, 0], sizes = [1, 9, 48], strides = [1, 1, 1]} : vector<19x9x48xf32> to vector<1x9x48xf32>
    %372 = vector.shape_cast %371 : vector<1x9x48xf32> to vector<9x48xf32>
    %373 = vector.extract_strided_slice %5 {offsets = [7, 0], sizes = [1, 48], strides = [1, 1]} : vector<9x48xf32> to vector<1x48xf32>
    %374 = vector.broadcast %373 : vector<1x48xf32> to vector<9x48xf32>
    %375 = arith.mulf %372, %374 : vector<9x48xf32>
    %376 = arith.addf %370, %375 : vector<9x48xf32>
    %377 = vector.extract_strided_slice %11 {offsets = [14, 0, 0], sizes = [1, 9, 48], strides = [1, 1, 1]} : vector<19x9x48xf32> to vector<1x9x48xf32>
    %378 = vector.shape_cast %377 : vector<1x9x48xf32> to vector<9x48xf32>
    %379 = vector.extract_strided_slice %5 {offsets = [8, 0], sizes = [1, 48], strides = [1, 1]} : vector<9x48xf32> to vector<1x48xf32>
    %380 = vector.broadcast %379 : vector<1x48xf32> to vector<9x48xf32>
    %381 = arith.mulf %378, %380 : vector<9x48xf32>
    %382 = arith.addf %376, %381 : vector<9x48xf32>
    %383 = vector.extract_strided_slice %7 {offsets = [14, 0, 0], sizes = [1, 9, 48], strides = [1, 1, 1]} : vector<19x9x48xf32> to vector<1x9x48xf32>
    %384 = vector.shape_cast %383 : vector<1x9x48xf32> to vector<9x48xf32>
    %385 = vector.extract_strided_slice %5 {offsets = [0, 0], sizes = [1, 48], strides = [1, 1]} : vector<9x48xf32> to vector<1x48xf32>
    %386 = vector.broadcast %385 : vector<1x48xf32> to vector<9x48xf32>
    %387 = arith.mulf %384, %386 : vector<9x48xf32>
    %388 = vector.extract_strided_slice %9 {offsets = [14, 0, 0], sizes = [1, 9, 48], strides = [1, 1, 1]} : vector<19x9x48xf32> to vector<1x9x48xf32>
    %389 = vector.shape_cast %388 : vector<1x9x48xf32> to vector<9x48xf32>
    %390 = vector.extract_strided_slice %5 {offsets = [1, 0], sizes = [1, 48], strides = [1, 1]} : vector<9x48xf32> to vector<1x48xf32>
    %391 = vector.broadcast %390 : vector<1x48xf32> to vector<9x48xf32>
    %392 = arith.mulf %389, %391 : vector<9x48xf32>
    %393 = arith.addf %387, %392 : vector<9x48xf32>
    %394 = vector.extract_strided_slice %11 {offsets = [14, 0, 0], sizes = [1, 9, 48], strides = [1, 1, 1]} : vector<19x9x48xf32> to vector<1x9x48xf32>
    %395 = vector.shape_cast %394 : vector<1x9x48xf32> to vector<9x48xf32>
    %396 = vector.extract_strided_slice %5 {offsets = [2, 0], sizes = [1, 48], strides = [1, 1]} : vector<9x48xf32> to vector<1x48xf32>
    %397 = vector.broadcast %396 : vector<1x48xf32> to vector<9x48xf32>
    %398 = arith.mulf %395, %397 : vector<9x48xf32>
    %399 = arith.addf %393, %398 : vector<9x48xf32>
    %400 = vector.extract_strided_slice %7 {offsets = [15, 0, 0], sizes = [1, 9, 48], strides = [1, 1, 1]} : vector<19x9x48xf32> to vector<1x9x48xf32>
    %401 = vector.shape_cast %400 : vector<1x9x48xf32> to vector<9x48xf32>
    %402 = vector.extract_strided_slice %5 {offsets = [3, 0], sizes = [1, 48], strides = [1, 1]} : vector<9x48xf32> to vector<1x48xf32>
    %403 = vector.broadcast %402 : vector<1x48xf32> to vector<9x48xf32>
    %404 = arith.mulf %401, %403 : vector<9x48xf32>
    %405 = arith.addf %399, %404 : vector<9x48xf32>
    %406 = vector.extract_strided_slice %9 {offsets = [15, 0, 0], sizes = [1, 9, 48], strides = [1, 1, 1]} : vector<19x9x48xf32> to vector<1x9x48xf32>
    %407 = vector.shape_cast %406 : vector<1x9x48xf32> to vector<9x48xf32>
    %408 = vector.extract_strided_slice %5 {offsets = [4, 0], sizes = [1, 48], strides = [1, 1]} : vector<9x48xf32> to vector<1x48xf32>
    %409 = vector.broadcast %408 : vector<1x48xf32> to vector<9x48xf32>
    %410 = arith.mulf %407, %409 : vector<9x48xf32>
    %411 = arith.addf %405, %410 : vector<9x48xf32>
    %412 = vector.extract_strided_slice %11 {offsets = [15, 0, 0], sizes = [1, 9, 48], strides = [1, 1, 1]} : vector<19x9x48xf32> to vector<1x9x48xf32>
    %413 = vector.shape_cast %412 : vector<1x9x48xf32> to vector<9x48xf32>
    %414 = vector.extract_strided_slice %5 {offsets = [5, 0], sizes = [1, 48], strides = [1, 1]} : vector<9x48xf32> to vector<1x48xf32>
    %415 = vector.broadcast %414 : vector<1x48xf32> to vector<9x48xf32>
    %416 = arith.mulf %413, %415 : vector<9x48xf32>
    %417 = arith.addf %411, %416 : vector<9x48xf32>
    %418 = vector.extract_strided_slice %7 {offsets = [16, 0, 0], sizes = [1, 9, 48], strides = [1, 1, 1]} : vector<19x9x48xf32> to vector<1x9x48xf32>
    %419 = vector.shape_cast %418 : vector<1x9x48xf32> to vector<9x48xf32>
    %420 = vector.extract_strided_slice %5 {offsets = [6, 0], sizes = [1, 48], strides = [1, 1]} : vector<9x48xf32> to vector<1x48xf32>
    %421 = vector.broadcast %420 : vector<1x48xf32> to vector<9x48xf32>
    %422 = arith.mulf %419, %421 : vector<9x48xf32>
    %423 = arith.addf %417, %422 : vector<9x48xf32>
    %424 = vector.extract_strided_slice %9 {offsets = [16, 0, 0], sizes = [1, 9, 48], strides = [1, 1, 1]} : vector<19x9x48xf32> to vector<1x9x48xf32>
    %425 = vector.shape_cast %424 : vector<1x9x48xf32> to vector<9x48xf32>
    %426 = vector.extract_strided_slice %5 {offsets = [7, 0], sizes = [1, 48], strides = [1, 1]} : vector<9x48xf32> to vector<1x48xf32>
    %427 = vector.broadcast %426 : vector<1x48xf32> to vector<9x48xf32>
    %428 = arith.mulf %425, %427 : vector<9x48xf32>
    %429 = arith.addf %423, %428 : vector<9x48xf32>
    %430 = vector.extract_strided_slice %11 {offsets = [16, 0, 0], sizes = [1, 9, 48], strides = [1, 1, 1]} : vector<19x9x48xf32> to vector<1x9x48xf32>
    %431 = vector.shape_cast %430 : vector<1x9x48xf32> to vector<9x48xf32>
    %432 = vector.extract_strided_slice %5 {offsets = [8, 0], sizes = [1, 48], strides = [1, 1]} : vector<9x48xf32> to vector<1x48xf32>
    %433 = vector.broadcast %432 : vector<1x48xf32> to vector<9x48xf32>
    %434 = arith.mulf %431, %433 : vector<9x48xf32>
    %435 = arith.addf %429, %434 : vector<9x48xf32>
    %436 = vector.extract_strided_slice %7 {offsets = [16, 0, 0], sizes = [1, 9, 48], strides = [1, 1, 1]} : vector<19x9x48xf32> to vector<1x9x48xf32>
    %437 = vector.shape_cast %436 : vector<1x9x48xf32> to vector<9x48xf32>
    %438 = vector.extract_strided_slice %5 {offsets = [0, 0], sizes = [1, 48], strides = [1, 1]} : vector<9x48xf32> to vector<1x48xf32>
    %439 = vector.broadcast %438 : vector<1x48xf32> to vector<9x48xf32>
    %440 = arith.mulf %437, %439 : vector<9x48xf32>
    %441 = vector.extract_strided_slice %9 {offsets = [16, 0, 0], sizes = [1, 9, 48], strides = [1, 1, 1]} : vector<19x9x48xf32> to vector<1x9x48xf32>
    %442 = vector.shape_cast %441 : vector<1x9x48xf32> to vector<9x48xf32>
    %443 = vector.extract_strided_slice %5 {offsets = [1, 0], sizes = [1, 48], strides = [1, 1]} : vector<9x48xf32> to vector<1x48xf32>
    %444 = vector.broadcast %443 : vector<1x48xf32> to vector<9x48xf32>
    %445 = arith.mulf %442, %444 : vector<9x48xf32>
    %446 = arith.addf %440, %445 : vector<9x48xf32>
    %447 = vector.extract_strided_slice %11 {offsets = [16, 0, 0], sizes = [1, 9, 48], strides = [1, 1, 1]} : vector<19x9x48xf32> to vector<1x9x48xf32>
    %448 = vector.shape_cast %447 : vector<1x9x48xf32> to vector<9x48xf32>
    %449 = vector.extract_strided_slice %5 {offsets = [2, 0], sizes = [1, 48], strides = [1, 1]} : vector<9x48xf32> to vector<1x48xf32>
    %450 = vector.broadcast %449 : vector<1x48xf32> to vector<9x48xf32>
    %451 = arith.mulf %448, %450 : vector<9x48xf32>
    %452 = arith.addf %446, %451 : vector<9x48xf32>
    %453 = vector.extract_strided_slice %7 {offsets = [17, 0, 0], sizes = [1, 9, 48], strides = [1, 1, 1]} : vector<19x9x48xf32> to vector<1x9x48xf32>
    %454 = vector.shape_cast %453 : vector<1x9x48xf32> to vector<9x48xf32>
    %455 = vector.extract_strided_slice %5 {offsets = [3, 0], sizes = [1, 48], strides = [1, 1]} : vector<9x48xf32> to vector<1x48xf32>
    %456 = vector.broadcast %455 : vector<1x48xf32> to vector<9x48xf32>
    %457 = arith.mulf %454, %456 : vector<9x48xf32>
    %458 = arith.addf %452, %457 : vector<9x48xf32>
    %459 = vector.extract_strided_slice %9 {offsets = [17, 0, 0], sizes = [1, 9, 48], strides = [1, 1, 1]} : vector<19x9x48xf32> to vector<1x9x48xf32>
    %460 = vector.shape_cast %459 : vector<1x9x48xf32> to vector<9x48xf32>
    %461 = vector.extract_strided_slice %5 {offsets = [4, 0], sizes = [1, 48], strides = [1, 1]} : vector<9x48xf32> to vector<1x48xf32>
    %462 = vector.broadcast %461 : vector<1x48xf32> to vector<9x48xf32>
    %463 = arith.mulf %460, %462 : vector<9x48xf32>
    %464 = arith.addf %458, %463 : vector<9x48xf32>
    %465 = vector.extract_strided_slice %11 {offsets = [17, 0, 0], sizes = [1, 9, 48], strides = [1, 1, 1]} : vector<19x9x48xf32> to vector<1x9x48xf32>
    %466 = vector.shape_cast %465 : vector<1x9x48xf32> to vector<9x48xf32>
    %467 = vector.extract_strided_slice %5 {offsets = [5, 0], sizes = [1, 48], strides = [1, 1]} : vector<9x48xf32> to vector<1x48xf32>
    %468 = vector.broadcast %467 : vector<1x48xf32> to vector<9x48xf32>
    %469 = arith.mulf %466, %468 : vector<9x48xf32>
    %470 = arith.addf %464, %469 : vector<9x48xf32>
    %471 = vector.extract_strided_slice %7 {offsets = [18, 0, 0], sizes = [1, 9, 48], strides = [1, 1, 1]} : vector<19x9x48xf32> to vector<1x9x48xf32>
    %472 = vector.shape_cast %471 : vector<1x9x48xf32> to vector<9x48xf32>
    %473 = vector.extract_strided_slice %5 {offsets = [6, 0], sizes = [1, 48], strides = [1, 1]} : vector<9x48xf32> to vector<1x48xf32>
    %474 = vector.broadcast %473 : vector<1x48xf32> to vector<9x48xf32>
    %475 = arith.mulf %472, %474 : vector<9x48xf32>
    %476 = arith.addf %470, %475 : vector<9x48xf32>
    %477 = vector.extract_strided_slice %9 {offsets = [18, 0, 0], sizes = [1, 9, 48], strides = [1, 1, 1]} : vector<19x9x48xf32> to vector<1x9x48xf32>
    %478 = vector.shape_cast %477 : vector<1x9x48xf32> to vector<9x48xf32>
    %479 = vector.extract_strided_slice %5 {offsets = [7, 0], sizes = [1, 48], strides = [1, 1]} : vector<9x48xf32> to vector<1x48xf32>
    %480 = vector.broadcast %479 : vector<1x48xf32> to vector<9x48xf32>
    %481 = arith.mulf %478, %480 : vector<9x48xf32>
    %482 = arith.addf %476, %481 : vector<9x48xf32>
    %483 = vector.extract_strided_slice %11 {offsets = [18, 0, 0], sizes = [1, 9, 48], strides = [1, 1, 1]} : vector<19x9x48xf32> to vector<1x9x48xf32>
    %484 = vector.shape_cast %483 : vector<1x9x48xf32> to vector<9x48xf32>
    %485 = vector.extract_strided_slice %5 {offsets = [8, 0], sizes = [1, 48], strides = [1, 1]} : vector<9x48xf32> to vector<1x48xf32>
    %486 = vector.broadcast %485 : vector<1x48xf32> to vector<9x48xf32>
    %487 = arith.mulf %484, %486 : vector<9x48xf32>
    %488 = arith.addf %482, %487 : vector<9x48xf32>
    %489 = tpu.concatenate %64, %117, %170, %223, %276, %329, %382, %435, %488 in 0 : vector<9x48xf32>, vector<9x48xf32>, vector<9x48xf32>, vector<9x48xf32>, vector<9x48xf32>, vector<9x48xf32>, vector<9x48xf32>, vector<9x48xf32>, vector<9x48xf32> -> vector<81x48xf32>
    %c0_6 = arith.constant 0 : index
    %c0_7 = arith.constant 0 : index
    %490 = vector.load %arg7[%c0_6, %c0_7] : memref<1x48xf32, #tpu.memory_space<vmem>>, vector<1x48xf32>
    %491 = vector.broadcast %490 : vector<1x48xf32> to vector<81x48xf32>
    %492 = arith.mulf %489, %491 : vector<81x48xf32>
    %c0_8 = arith.constant 0 : index
    %c0_9 = arith.constant 0 : index
    %493 = vector.load %arg8[%c0_8, %c0_9] : memref<1x48xf32, #tpu.memory_space<vmem>>, vector<1x48xf32>
    %494 = vector.broadcast %493 : vector<1x48xf32> to vector<81x48xf32>
    %495 = arith.addf %492, %494 : vector<81x48xf32>
    %cst = arith.constant 0.000000e+00 : f32
    %cst_10 = arith.constant 6.000000e+00 : f32
    %496 = vector.broadcast %cst : f32 to vector<81x48xf32>
    %497 = arith.maximumf %496, %495 : vector<81x48xf32>
    %498 = vector.broadcast %cst_10 : f32 to vector<81x48xf32>
    %499 = arith.minimumf %498, %497 : vector<81x48xf32>
    %500 = arith.truncf %499 : vector<81x48xf32> to vector<81x48xbf16>
    %c0_11 = arith.constant 0 : index
    %c0_12 = arith.constant 0 : index
    %501 = vector.load %arg9[%c0_11, %c0_12] : memref<48x16xbf16, #tpu.memory_space<vmem>>, vector<48x16xbf16>
    %cst_13 = arith.constant dense<0.000000e+00> : vector<81x16xf32>
    %502 = tpu.matmul %500, %501, %cst_13 {dimension_numbers = #tpu.dot_dimension_numbers<[1], [0], [0], [1], [0, 0, 1, 1], [], []>} : vector<81x48xbf16>, vector<48x16xbf16>, vector<81x16xf32> -> vector<81x16xf32>
    %c0_14 = arith.constant 0 : index
    %c0_15 = arith.constant 0 : index
    %503 = vector.load %arg10[%c0_14, %c0_15] : memref<1x16xf32, #tpu.memory_space<vmem>>, vector<1x16xf32>
    %504 = vector.broadcast %503 : vector<1x16xf32> to vector<81x16xf32>
    %505 = arith.mulf %502, %504 : vector<81x16xf32>
    %c0_16 = arith.constant 0 : index
    %c0_17 = arith.constant 0 : index
    %506 = vector.load %arg11[%c0_16, %c0_17] : memref<1x16xf32, #tpu.memory_space<vmem>>, vector<1x16xf32>
    %507 = vector.broadcast %506 : vector<1x16xf32> to vector<81x16xf32>
    %508 = arith.addf %505, %507 : vector<81x16xf32>
    %509 = vector.shape_cast %508 : vector<81x16xf32> to vector<9x9x16xf32>
    %c0_18 = arith.constant 0 : index
    %c0_19 = arith.constant 0 : index
    %c0_20 = arith.constant 0 : index
    %c0_21 = arith.constant 0 : index
    %510 = vector.load %arg12[%c0_18, %c0_19, %c0_20, %c0_21] : memref<1x9x9x16xf32, #tpu.memory_space<vmem>>, vector<1x9x9x16xf32>
    %511 = vector.shape_cast %510 : vector<1x9x9x16xf32> to vector<9x9x16xf32>
    %512 = vector.shape_cast %509 : vector<9x9x16xf32> to vector<1x9x9x16xf32>
    tpu.vector_store %arg12[%c0_18, %c0_19, %c0_20, %c0_21], %512 {strides = array<i32>} : memref<1x9x9x16xf32, #tpu.memory_space<vmem>>, vector<1x9x9x16xf32>,
    return
  }
  func.func @transform_0(%arg0: i32, %arg1: i32) -> (i32, i32, i32, i32) {
    %c0_i32 = arith.constant 0 : i32
    %c0_i32_0 = arith.constant 0 : i32
    %c0_i32_1 = arith.constant 0 : i32
    %c0_i32_2 = arith.constant 0 : i32
    return %arg0, %c0_i32, %c0_i32_0, %c0_i32_1 : i32, i32, i32, i32
  }
  func.func @transform_1(%arg0: i32, %arg1: i32) -> (i32, i32) {
    %c0_i32 = arith.constant 0 : i32
    %c0_i32_0 = arith.constant 0 : i32
    %c0_i32_1 = arith.constant 0 : i32
    return %c0_i32, %c0_i32_0 : i32, i32
  }
  func.func @transform_2(%arg0: i32, %arg1: i32) -> (i32, i32) {
    %c0_i32 = arith.constant 0 : i32
    %c0_i32_0 = arith.constant 0 : i32
    %c0_i32_1 = arith.constant 0 : i32
    return %c0_i32, %c0_i32_0 : i32, i32
  }
  func.func @transform_3(%arg0: i32, %arg1: i32) -> (i32, i32) {
    %c0_i32 = arith.constant 0 : i32
    %c0_i32_0 = arith.constant 0 : i32
    %c0_i32_1 = arith.constant 0 : i32
    return %c0_i32, %c0_i32_0 : i32, i32
  }
  func.func @transform_4(%arg0: i32, %arg1: i32) -> (i32, i32) {
    %c0_i32 = arith.constant 0 : i32
    %c0_i32_0 = arith.constant 0 : i32
    %c0_i32_1 = arith.constant 0 : i32
    return %c0_i32, %c0_i32_0 : i32, i32
  }
  func.func @transform_5(%arg0: i32, %arg1: i32) -> (i32, i32) {
    %c0_i32 = arith.constant 0 : i32
    %c0_i32_0 = arith.constant 0 : i32
    %c0_i32_1 = arith.constant 0 : i32
    return %c0_i32, %c0_i32_0 : i32, i32
  }
  func.func @transform_6(%arg0: i32, %arg1: i32) -> (i32, i32) {
    %c0_i32 = arith.constant 0 : i32
    %c0_i32_0 = arith.constant 0 : i32
    %c0_i32_1 = arith.constant 0 : i32
    return %c0_i32, %c0_i32_0 : i32, i32
  }
  func.func @transform_7(%arg0: i32, %arg1: i32) -> (i32, i32) {
    %c0_i32 = arith.constant 0 : i32
    %c0_i32_0 = arith.constant 0 : i32
    %c0_i32_1 = arith.constant 0 : i32
    return %c0_i32, %c0_i32_0 : i32, i32
  }
  func.func @transform_8(%arg0: i32, %arg1: i32) -> (i32, i32) {
    %c0_i32 = arith.constant 0 : i32
    %c0_i32_0 = arith.constant 0 : i32
    %c0_i32_1 = arith.constant 0 : i32
    return %c0_i32, %c0_i32_0 : i32, i32
  }
  func.func @transform_9(%arg0: i32, %arg1: i32) -> (i32, i32) {
    %c0_i32 = arith.constant 0 : i32
    %c0_i32_0 = arith.constant 0 : i32
    %c0_i32_1 = arith.constant 0 : i32
    return %c0_i32, %c0_i32_0 : i32, i32
  }
  func.func @transform_10(%arg0: i32, %arg1: i32) -> (i32, i32, i32, i32) {
    %c0_i32 = arith.constant 0 : i32
    %c0_i32_0 = arith.constant 0 : i32
    %c0_i32_1 = arith.constant 0 : i32
    return %arg0, %arg1, %c0_i32, %c0_i32_0 : i32, i32, i32, i32
  }
}

</mosaic_0001>

<bundles_post_ra>
// kernel: tpu_custom_call.1
= control target key start
LH: loop header
LB: loop body
LE: loop exit
PB: predicated region body
PF: predicated region fallthrough
CT: control target
= control target key end

     0   :  { %s3353_s13 = smov 0   ;;  %s3355_s14 = smov 0   ;;  %s4201_s0 = inlined_call_operand.vmem [shape: f32[2,16,16,8], index: 0, kind: input, shape index: {}]   ;;  %s4202_s1 = inlined_call_operand.vmem [shape: bf16[8,48], index: 1, kind: input, shape index: {}]   ;;  %s4203_s2 = inlined_call_operand.vmem [shape: f32[1,48], index: 2, kind: input, shape index: {}]   ;;  %s4204_s3 = inlined_call_operand.vmem [shape: f32[1,48], index: 3, kind: input, shape index: {}]   ;;  %s4205_s4 = inlined_call_operand.vmem [shape: f32[9,48], index: 4, kind: input, shape index: {}]   ;;  %s4206_s5 = inlined_call_operand.vmem [shape: f32[1,48], index: 5, kind: input, shape index: {}]   ;;  %s4207_s6 = inlined_call_operand.vmem [shape: f32[1,48], index: 6, kind: input, shape index: {}]   ;;  %s4208_s7 = inlined_call_operand.vmem [shape: bf16[48,16], index: 7, kind: input, shape index: {}]   ;;  %s4209_s8 = inlined_call_operand.vmem [shape: f32[1,16], index: 8, kind: input, shape index: {}]   ;;  %s4210_s9 = inlined_call_operand.vmem [shape: f32[1,16], index: 9, kind: input, shape index: {}]   ;;  %s4211_s10 = inlined_call_operand.vmem [shape: f32[2,9,9,16], index: 10, kind: output, shape index: {}]  }
   0x1   :  { %s3357_s15 = smov 0  }
   0x2 LB: > { %s32_s16 = sadd.s32 1, %s3290_s14  ;;  %p2997_p0 = scmp.ge.s32.totalorder %s3294_s15, 1  ;;  %s3294_s15 = sphi %s3357_s15, %s20_s15   ;;  %s3290_s14 = sphi %s3355_s14, %s4213_s14   ;;  %s3286_s13 = sphi %s3353_s13, %s4212_s13  }
   0x3   : > { %p34_p1 = scmp.ge.s32.totalorder %s32_s16, 2  ;;  %p326_p2 = scmp.lt.s32.totalorder %s3294_s15, 3 }
   0x5   : > { %s4215_s16 = smov (%p34_p1, %s32_s16), 0  ;;  %p327_p3 = pnand %p2997_p0, %p326_p2 }
   0x6   : > { %p369_p4 = scmp.lt.s32.totalorder (!%p327_p3), %s3286_s13, 1 }
   0x7   : > { %330 = sbr.rel (%p327_p3) target bundleno = 585 (0x249), region = 60 }
   0xc   : > { %v535_v0 = vld [vmem:[%s4202_s1] sm:$0xf]  ;;  %vm585_vm0 = vcmask 1043456   ;;  %s4217_s13 = smov (!%p369_p4, %s3286_s13), 1  ;;  %vm536_vm1 = vcmask 64512   ;;  %v441_v50 = vlaneseq  ;;  %vm390_vm2 = vcmask 392192  }
   0xd   : > { %3239 = vmatprep.subr.msk.bf16.mxu0 %vm585_vm0, %v535_v0  ;;  %v587_v1 = vsel %vm585_vm0, %v535_v0, 0  ;;  %3240 = vmatprep.subr.msk.bf16.mxu1 %vm585_vm0, %v535_v0  ;;  %s3158_s19 = sshll.u32 %s4217_s13, 8  ;;  %v437_v51 = vld [vmem:[%s4204_s3] sm:$0x1]  ;;  %vm393_vm3 = vcmask 388096   ;;  %v3296_v55 = vmov 0.0  }
   0xe   : > { %3186 = vmatpush3.bf16.msra.mxu0 %v587_v1  ;;  %3238 = vmatpush3.bf16.msra.mxu1 %v587_v1  ;;  %s3383_s22 = scalar_lea.vmem %s4201_s0, %s3158_s19  ;;  %v438_v52 = vmax.f32 %v437_v51, 0.0  ;;  %v3436_v53 = vshrl.u32 %v441_v50, 7  ;;  %391 = vst.msk [vmem:[#allocation2] sm:$0xff] %vm390_vm2, %v3296_v55  ;;  %392 = vst.msk [vmem:[#allocation2 + $0x8] sm:$0xff] %vm390_vm2, %v3296_v55  ;;  %vm400_vm4 = vcmask 385024   ;;  %vm448_vm5 = vcmask 386048  }
   0xf   : > { %v487_v2 = vld [vmem:[%s3383_s22] sm:$0xff]  ;;  %v488_v3 = vld [vmem:[%s3383_s22 + $0x8] sm:$0xff]  ;;  %v489_v4 = vld [vmem:[%s3383_s22 + $0x10] sm:$0xff]  ;;  %394 = vst.msk [vmem:[#allocation2 + $0x10] sm:$0xf] %vm393_vm3, %v3296_v55  ;;  %vm1500_vm6 = vcmask 1040384  }
  0x10   : > { %v519_v5 = vpack.c.bf16 %v488_v3, %v487_v2  ;;  %v490_v6 = vld [vmem:[%s3383_s22 + $0x18] sm:$0xff]  ;;  %v491_v7 = vld [vmem:[%s3383_s22 + $0x20] sm:$0xff]  ;;  %v492_v8 = vld [vmem:[%s3383_s22 + $0x28] sm:$0xff]  ;;  %v439_v54 = vmin.f32 %v438_v52, 6.0  ;;  %v443_v56 = vsub.s32 0, %v3436_v53  ;;  %v1164_v61 = vsub.s32 1, %v3436_v53 }
  0x11   : > { %v520_v9 = vpack.c.bf16 %v490_v6, %v489_v4  ;;  %v521_v10 = vpack.c.bf16 %v492_v8, %v491_v7  ;;  %v511_v11 = vld [vmem:[%s3383_s22 + $0xc0] sm:$0xff]  ;;  %v512_v12 = vld [vmem:[%s3383_s22 + $0xc8] sm:$0xff]  ;;  %v513_v13 = vld [vmem:[%s3383_s22 + $0xd0] sm:$0xff]  ;;  %401 = vst.msk [vmem:[#allocation2 + $0x18] sm:$0x1] %vm400_vm4, %v3296_v55  ;;  %v1172_v3 = vsub.s32 2, %v3436_v53 }
  0x12   : > { %3187 = vmatprep.mubr.msk.bf16.mxu0 %vm536_vm1, %v519_v5  ;;  %v493_v14 = vld [vmem:[%s3383_s22 + $0x30] sm:$0xff]  ;;  %v494_v15 = vld [vmem:[%s3383_s22 + $0x38] sm:$0xff]  ;;  %v531_v16 = vpack.c.bf16 %v512_v12, %v511_v11  ;;  %v495_v18 = vld [vmem:[%s3383_s22 + $0x40] sm:$0xff]  ;;  %v444_v57 = vrot.slane %v439_v54, %v443_v56  ;;  %460 = vst.msk [vmem:[#allocation2 + $0xa9] sm:$0x1] %vm400_vm4, %v439_v54  ;;  %v1180_v11 = vsub.s32 3, %v3436_v53 }
  0x13   : > { %3188 = vmatmul.mubr.msk.bf16.vlgmr.msra.gmra.mxu0 %vm536_vm1, %v520_v9  ;;  %v514_v17 = vld [vmem:[%s3383_s22 + $0xd8] sm:$0xff]  ;;  %v496_v19 = vld [vmem:[%s3383_s22 + $0x48] sm:$0xff]  ;;  %v515_v21 = vld [vmem:[%s3383_s22 + $0xe0] sm:$0xff]  ;;  %v522_v23 = vpack.c.bf16 %v494_v15, %v493_v14  ;;  %455 = vst.msk [vmem:[#allocation2 + $0x31] sm:$0x1] %vm400_vm4, %v439_v54  ;;  %v1188_v15 = vsub.s32 4, %v3436_v53 }
  0x14   : > { %3191 = vmatprep.mubr.msk.bf16.mxu0 %vm536_vm1, %v521_v10  ;;  %v532_v20 = vpack.c.bf16 %v514_v17, %v513_v13  ;;  %3211 = vmatprep.mubr.msk.bf16.mxu1 %vm536_vm1, %v531_v16  ;;  %v516_v22 = vld [vmem:[%s3383_s22 + $0xe8] sm:$0xff]  ;;  %v523_v25 = vpack.c.bf16 %v496_v19, %v495_v18  ;;  %v517_v26 = vld [vmem:[%s3383_s22 + $0xf0] sm:$0xff]  ;;  %v518_v27 = vld [vmem:[%s3383_s22 + $0xf8] sm:$0xff]  ;;  %456 = vst.msk [vmem:[#allocation2 + $0x49] sm:$0x1] %vm400_vm4, %v439_v54  ;;  %vm1508_vm7 = vcmask 1041408  }
  0x15   : > { %v533_v24 = vpack.c.bf16 %v516_v22, %v515_v21  ;;  %v534_v28 = vpack.c.bf16 %v518_v27, %v517_v26  ;;  %v497_v29 = vld [vmem:[%s3383_s22 + $0x50] sm:$0xff]  ;;  %v498_v30 = vld [vmem:[%s3383_s22 + $0x58] sm:$0xff]  ;;  %v499_v31 = vld [vmem:[%s3383_s22 + $0x60] sm:$0xff]  ;;  %457 = vst.msk [vmem:[#allocation2 + $0x61] sm:$0x1] %vm400_vm4, %v439_v54  ;;  %vm1516_vm8 = vcmask 1042432  }
  0x16   : > { %3212 = vmatmul.mubr.msk.bf16.vlgmr.msra.gmra.mxu1 %vm536_vm1, %v532_v20  ;;  %v500_v32 = vld [vmem:[%s3383_s22 + $0x68] sm:$0xff]  ;;  %v524_v33 = vpack.c.bf16 %v498_v30, %v497_v29  ;;  %v501_v35 = vld [vmem:[%s3383_s22 + $0x70] sm:$0xff]  ;;  %v502_v36 = vld [vmem:[%s3383_s22 + $0x78] sm:$0xff]  ;;  %458 = vst.msk [vmem:[#allocation2 + $0x79] sm:$0x1] %vm400_vm4, %v439_v54  ;;  %vm1532_vm9 = vcmask 1044480  }
  0x17   : > { %3215 = vmatprep.mubr.msk.bf16.mxu1 %vm536_vm1, %v533_v24  ;;  %v525_v34 = vpack.c.bf16 %v500_v32, %v499_v31  ;;  %v503_v37 = vld [vmem:[%s3383_s22 + $0x80] sm:$0xff]  ;;  %v504_v38 = vld [vmem:[%s3383_s22 + $0x88] sm:$0xff]  ;;  %v526_v39 = vpack.c.bf16 %v502_v36, %v501_v35  ;;  %v505_v41 = vld [vmem:[%s3383_s22 + $0x90] sm:$0xff]  ;;  %459 = vst.msk [vmem:[#allocation2 + $0x91] sm:$0x1] %vm400_vm4, %v439_v54  ;;  %vm1540_vm10 = vcmask 1045504  }
  0x18   : > { %v527_v40 = vpack.c.bf16 %v504_v38, %v503_v37  ;;  %v506_v42 = vld [vmem:[%s3383_s22 + $0x98] sm:$0xff]  ;;  %v507_v43 = vld [vmem:[%s3383_s22 + $0xa0] sm:$0xff]  ;;  %v508_v44 = vld [vmem:[%s3383_s22 + $0xa8] sm:$0xff]  ;;  %461 = vst.msk [vmem:[#allocation2 + $0xc1] sm:$0x1] %vm400_vm4, %v439_v54  ;;  %v1204_v37 = vsub.s32 6, %v3436_v53 }
  0x19   : > { %v528_v45 = vpack.c.bf16 %v506_v42, %v505_v41  ;;  %v529_v46 = vpack.c.bf16 %v508_v44, %v507_v43  ;;  %v509_v47 = vld [vmem:[%s3383_s22 + $0xb0] sm:$0xff]  ;;  %v510_v48 = vld [vmem:[%s3383_s22 + $0xb8] sm:$0xff]  ;;  %462 = vst.msk [vmem:[#allocation2 + $0xd9] sm:$0x1] %vm400_vm4, %v439_v54  ;;  %463 = vst.msk [vmem:[#allocation2 + $0xf1] sm:$0x1] %vm400_vm4, %v439_v54 }
  0x1a   : > { %v530_v49 = vpack.c.bf16 %v510_v48, %v509_v47  ;;  %464 = vst.msk [vmem:[#allocation2 + $0x109] sm:$0x1] %vm400_vm4, %v439_v54  ;;  %465 = vst.msk [vmem:[#allocation2 + $0x121] sm:$0x1] %vm400_vm4, %v439_v54  ;;  %v3268_v58 = vld [vmem:[%s4208_s7 + $0x10] sm:$0xff]   ;;  %v3269_v59 = vld [vmem:[%s4208_s7 + $0x8] sm:$0xff]  }
  0x1b   : > { %3192 = vmatmul.mubr.msk.bf16.gmra.mxu0 %vm536_vm1, %v522_v23  ;;  %466 = vst.msk [vmem:[#allocation2 + $0x139] sm:$0x1] %vm400_vm4, %v439_v54  ;;  %467 = vst.msk [vmem:[#allocation2 + $0x151] sm:$0x1] %vm400_vm4, %v439_v54  ;;  %3219 = vmatprep.subr.bf16.mxu1 %v3268_v58  ;;  %v3270_v60 = vld [vmem:[%s4208_s7] sm:$0xff]   ;;  %v1196_v23 = vsub.s32 5, %v3436_v53 }
  0x1c   : > { %3195 = vmatprep.mubr.msk.bf16.mxu0 %vm536_vm1, %v523_v25  ;;  %468 = vst.msk [vmem:[#allocation2 + $0x169] sm:$0x1] %vm400_vm4, %v439_v54  ;;  %469 = vst.msk [vmem:[#allocation2 + $0x181] sm:$0x1] %vm400_vm4, %v439_v54  ;;  %3220 = vmatpush3.bf16.msra.mxu1 %v3268_v58  ;;  %v925_v62 = vld [vmem:[%s4205_s4] sm:$0xff]  ;;  %v1212_v38 = vsub.s32 7, %v3436_v53 }
  0x1d   : > { %470 = vst.msk [vmem:[#allocation2 + $0x199] sm:$0x1] %vm400_vm4, %v439_v54  ;;  %471 = vst.msk [vmem:[#allocation2 + $0x42] sm:$0x1] %vm400_vm4, %v439_v54  ;;  %3221 = vmatprep.subr.bf16.mxu1 %v3269_v59  ;;  %v3512_v63 = vrot.slane %v925_v62, %v443_v56  ;;  %v3514_v0 = vrot.slane %v925_v62, %v1164_v61  ;;  %v929_v1 = vld [vmem:[#allocation2] ss:$2 sm:$0xff]  ;;  %v3521_v10 = vrot.slane %v925_v62, %v1172_v3 }
  0x1e   : > { %3216 = vmatmul.mubr.msk.bf16.gmra.mxu1 %vm536_vm1, %v534_v28  ;;  %472 = vst.msk [vmem:[#allocation2 + $0x5a] sm:$0x1] %vm400_vm4, %v439_v54  ;;  %473 = vst.msk [vmem:[#allocation2 + $0x72] sm:$0x1] %vm400_vm4, %v439_v54  ;;  %v3056_v2 = vld [vmem:[#allocation2 + $0x1] ss:$2 sm:$0xff]  ;;  %v3527_v19 = vrot.slane %v925_v62, %v1180_v11  ;;  %v3529_v22 = vrot.slane %v925_v62, %v1188_v15  ;;  %v3563_v56 = vrot.slane %v925_v62, %v1212_v38 }
  0x1f   : > { %474 = vst.msk [vmem:[#allocation2 + $0x8a] sm:$0x1] %vm400_vm4, %v439_v54  ;;  %475 = vst.msk [vmem:[#allocation2 + $0xa2] sm:$0x1] %vm400_vm4, %v439_v54  ;;  %v1160_v6 = vmul.f32 %v3512_v63, %v929_v1  ;;  %v1166_v7 = vmul.f32 %v3056_v2, %v3514_v0  ;;  %v3094_v12 = vld [vmem:[#allocation2 + $0x2] ss:$2 sm:$0xff] }
  0x20   : > { %476 = vst.msk [vmem:[#allocation2 + $0xba] sm:$0x1] %vm400_vm4, %v439_v54  ;;  %477 = vst.msk [vmem:[#allocation2 + $0xd2] sm:$0x1] %vm400_vm4, %v439_v54  ;;  %3222 = vmatpush3.bf16.msra.mxu1 %v3269_v59  ;;  %v1174_v17 = vmul.f32 %v3094_v12, %v3521_v10  ;;  %v3545_v43 = vld [vmem:[%s4203_s2] ss:$0 sm:$0xff] }
  0x21   : > { %478 = vst.msk [vmem:[#allocation2 + $0xea] sm:$0x1] %vm400_vm4, %v439_v54  ;;  %479 = vst.msk [vmem:[#allocation2 + $0x102] sm:$0x1] %vm400_vm4, %v439_v54  ;;  %3223 = vmatprep.subr.bf16.mxu1 %v3270_v60  ;;  %v1168_v14 = vadd.f32 %v1166_v7, %v1160_v6  ;;  %vm1548_vm11 = vcmask 1046528   ;;  %s3241_s17 = smul.u32 144, %s4217_s13 }
  0x22   : > { %480 = vst.msk [vmem:[#allocation2 + $0x11a] sm:$0x1] %vm400_vm4, %v439_v54  ;;  %481 = vst.msk [vmem:[#allocation2 + $0x132] sm:$0x1] %vm400_vm4, %v439_v54  ;;  %vm2886_vm12 = vcmask 122880   ;;  %vm2884_vm13 = vcmask 130048  }
  0x23   : > { %3196 = vmatmul.mubr.msk.bf16.gmra.mxu0 %vm536_vm1, %v524_v33  ;;  %482 = vst.msk [vmem:[#allocation2 + $0x14a] sm:$0x1] %vm400_vm4, %v439_v54  ;;  %483 = vst.msk [vmem:[#allocation2 + $0x162] sm:$0x1] %vm400_vm4, %v439_v54  ;;  %v1176_v25 = vadd.f32 %v1174_v17, %v1168_v14  ;;  %s3990_s19 = scalar_lea.vmem %s4211_s10, %s3241_s17 }
  0x24   : > { %3199 = vmatprep.mubr.msk.bf16.mxu0 %vm536_vm1, %v525_v34  ;;  %484 = vst.msk [vmem:[#allocation2 + $0x17a] sm:$0x1] %vm400_vm4, %v439_v54  ;;  %485 = vst.msk [vmem:[#allocation2 + $0x192] sm:$0x1] %vm400_vm4, %v439_v54  ;;  %3224 = vmatpush3.bf16.msra.mxu1 %v3270_v60  ;;  %v3536_v34 = vrot.slane %v925_v62, %v1196_v23 }
  0x25   : > { %486 = vst.msk [vmem:[#allocation2 + $0x1aa] sm:$0x1] %vm400_vm4, %v439_v54  ;;  %402 = vst.msk [vmem:[#allocation2 + $0x30] sm:$0x1] %vm400_vm4, %v3296_v55 }
  0x26   : > { %403 = vst.msk [vmem:[#allocation2 + $0x48] sm:$0x1] %vm400_vm4, %v3296_v55  ;;  %404 = vst.msk [vmem:[#allocation2 + $0x60] sm:$0x1] %vm400_vm4, %v3296_v55 }
  0x27   : > { %405 = vst.msk [vmem:[#allocation2 + $0x78] sm:$0x1] %vm400_vm4, %v3296_v55  ;;  %406 = vst.msk [vmem:[#allocation2 + $0x90] sm:$0x1] %vm400_vm4, %v3296_v55 }
  0x28   : > { %407 = vst.msk [vmem:[#allocation2 + $0xa8] sm:$0x1] %vm400_vm4, %v3296_v55  ;;  %408 = vst.msk [vmem:[#allocation2 + $0xc0] sm:$0x1] %vm400_vm4, %v3296_v55 }
  0x29   : > { %446 = vst.msk [vmem:[#allocation2 + $0x19] sm:$0xff] %vm390_vm2, %v444_v57  ;;  %447 = vst.msk [vmem:[#allocation2 + $0x21] sm:$0xff] %vm390_vm2, %v444_v57  ;;  %v3019_v4 = vld [vmem:[#allocation2 + $0x10] ss:$2 sm:$0x1] }
  0x2a   : > { %409 = vst.msk [vmem:[#allocation2 + $0xd8] sm:$0x1] %vm400_vm4, %v3296_v55  ;;  %410 = vst.msk [vmem:[#allocation2 + $0xf0] sm:$0x1] %vm400_vm4, %v3296_v55  ;;  %v1161_v8 = vmul.f32 %v3019_v4, %v3512_v63 }
  0x2b   : > { %3200 = vmatmul.mubr.msk.bf16.gmra.mxu0 %vm536_vm1, %v526_v39  ;;  %411 = vst.msk [vmem:[#allocation2 + $0x108] sm:$0x1] %vm400_vm4, %v3296_v55  ;;  %412 = vst.msk [vmem:[#allocation2 + $0x120] sm:$0x1] %vm400_vm4, %v3296_v55 }
  0x2c   : > { %3203 = vmatprep.mubr.msk.bf16.mxu0 %vm536_vm1, %v527_v40  ;;  %413 = vst.msk [vmem:[#allocation2 + $0x138] sm:$0x1] %vm400_vm4, %v3296_v55  ;;  %414 = vst.msk [vmem:[#allocation2 + $0x150] sm:$0x1] %vm400_vm4, %v3296_v55 }
  0x2d   : > { %415 = vst.msk [vmem:[#allocation2 + $0x168] sm:$0x1] %vm400_vm4, %v3296_v55  ;;  %416 = vst.msk [vmem:[#allocation2 + $0x180] sm:$0x1] %vm400_vm4, %v3296_v55 }
  0x2e   : > { %417 = vst.msk [vmem:[#allocation2 + $0x198] sm:$0x1] %vm400_vm4, %v3296_v55  ;;  %418 = vst.msk [vmem:[#allocation2 + $0x1b0] sm:$0x1] %vm400_vm4, %v3296_v55  ;;  %v3561_v55 = vrot.slane %v925_v62, %v1204_v37 }
  0x2f   : > { %451 = vst.msk [vmem:[#allocation2 + $0x1b1] sm:$0xff] %vm390_vm2, %v444_v57  ;;  %452 = vst.msk [vmem:[#allocation2 + $0x1b9] sm:$0xff] %vm390_vm2, %v444_v57  ;;  %v3057_v5 = vld [vmem:[#allocation2 + $0x11] ss:$2 sm:$0x1] }
  0x30   : > { %449 = vst.msk [vmem:[#allocation2 + $0x29] sm:$0x3] %vm448_vm5, %v444_v57  ;;  %453 = vst.msk [vmem:[#allocation2 + $0x1c1] sm:$0x3] %vm448_vm5, %v444_v57  ;;  %v1167_v9 = vmul.f32 %v3057_v5, %v3514_v0  ;;  %v3020_v20 = vld [vmem:[#allocation2 + $0x18] ss:$2 sm:$0xff] }
  0x31   : > { %v3095_v13 = vld [vmem:[#allocation2 + $0x12] ss:$2 sm:$0x1]  ;;  %v3021_v21 = vld [vmem:[#allocation2 + $0x28] ss:$2 sm:$0x1]  ;;  %v1182_v27 = vmul.f32 %v3020_v20, %v3527_v19 }
  0x32   : > { %v1169_v16 = vadd.f32 %v1167_v9, %v1161_v8  ;;  %v1175_v18 = vmul.f32 %v3095_v13, %v3521_v10  ;;  %v3058_v24 = vld [vmem:[#allocation2 + $0x19] ss:$2 sm:$0xff]  ;;  %v1183_v28 = vmul.f32 %v3021_v21, %v3527_v19  ;;  %v3096_v35 = vld [vmem:[#allocation2 + $0x1a] ss:$2 sm:$0xff] }
  0x33   : > { %3204 = vmatmul.mubr.msk.bf16.gmra.mxu0 %vm536_vm1, %v528_v45  ;;  %v1190_v30 = vmul.f32 %v3058_v24, %v3529_v22  ;;  %v1184_v31 = vadd.f32 %v1182_v27, %v1176_v25  ;;  %v1198_v41 = vmul.f32 %v3096_v35, %v3536_v34  ;;  %v3099_v44 = vld [vmem:[#allocation2 + $0x42] ss:$2 sm:$0x1]  ;;  %v3550_v45 = vld [vmem:[%s4204_s3] ss:$0 sm:$0xff] }
  0x34   : > { %3207 = vmatprep.mubr.msk.bf16.mxu0 %vm536_vm1, %v529_v46  ;;  %v1177_v26 = vadd.f32 %v1175_v18, %v1169_v16  ;;  %v3555_v46 = vld [vmem:[%s4205_s4 + $0x8] ss:$0 sm:$0xff]  ;;  %v3101_v47 = vld [vmem:[#allocation2 + $0x5a] ss:$2 sm:$0x1]  ;;  %v3570_v61 = vmul.f32 %v3099_v44, %v3521_v10 }
  0x35   : > { %v1192_v39 = vadd.f32 %v1190_v30, %v1184_v31  ;;  %v3103_v48 = vld [vmem:[#allocation2 + $0x72] ss:$2 sm:$0x1]  ;;  %v3107_v50 = vld [vmem:[#allocation2 + $0xa2] ss:$2 sm:$0x1]  ;;  %v3567_v60 = vmul.f32 %v3555_v46, %v3099_v44  ;;  %v3573_v1 = vmul.f32 %v3101_v47, %v3536_v34 }
  0x36   : > { %v1185_v32 = vadd.f32 %v1183_v28, %v1177_v26  ;;  %v3109_v57 = vld [vmem:[#allocation2 + $0xba] ss:$2 sm:$0x1]  ;;  %v3111_v58 = vld [vmem:[#allocation2 + $0xd2] ss:$2 sm:$0x1]  ;;  %v3576_v5 = vmul.f32 %v3555_v46, %v3103_v48  ;;  %v3579_v62 = vmul.f32 %v3103_v48, %v3521_v10  ;;  %v3585_v7 = vmul.f32 %v3555_v46, %v3107_v50 }
  0x37   : > { %v3059_v29 = vld [vmem:[#allocation2 + $0x29] ss:$2 sm:$0x1]  ;;  %v3097_v36 = vld [vmem:[#allocation2 + $0x2a] ss:$2 sm:$0x1]  ;;  %v3557_v52 = vadd.f32 %v1198_v41, %v1192_v39  ;;  %v3590_v12 = vmul.f32 %v3107_v50, %v3521_v10  ;;  %v3593_v13 = vmul.f32 %v3109_v57, %v3536_v34  ;;  %v3596_v18 = vmul.f32 %v3555_v46, %v3111_v58 }
  0x38   : > { %v1191_v33 = vmul.f32 %v3059_v29, %v3529_v22  ;;  %v1199_v42 = vmul.f32 %v3097_v36, %v3536_v34  ;;  %v3113_v2 = vld [vmem:[#allocation2 + $0xea] ss:$2 sm:$0x1]  ;;  %v3115_v3 = vld [vmem:[#allocation2 + $0x102] ss:$2 sm:$0x1]  ;;  %v3599_v20 = vmul.f32 %v3111_v58, %v3521_v10 }
  0x39   : > { %v3123_v8 = vld [vmem:[#allocation2 + $0x162] ss:$2 sm:$0x1]  ;;  %v3117_v14 = vld [vmem:[#allocation2 + $0x11a] ss:$2 sm:$0x1]  ;;  %v3602_v21 = vmul.f32 %v3113_v2, %v3536_v34  ;;  %v3605_v23 = vmul.f32 %v3115_v3, %v3521_v10  ;;  %v3611_v31 = vmul.f32 %v3555_v46, %v3115_v3 }
  0x3a   : > { %v1193_v40 = vadd.f32 %v1191_v33, %v1185_v32  ;;  %v3119_v15 = vld [vmem:[#allocation2 + $0x132] ss:$2 sm:$0x1]  ;;  %v3121_v28 = vld [vmem:[#allocation2 + $0x14a] ss:$2 sm:$0x1]  ;;  %v3614_v32 = vmul.f32 %v3117_v14, %v3536_v34  ;;  %v3620_v35 = vmul.f32 %v3123_v8, %v3521_v10 }
  0x3b   : > { %3208 = vmatmul.mubr.msk.bf16.gmra.mxu0 %vm536_vm1, %v530_v49  ;;  %v3105_v49 = vld [vmem:[#allocation2 + $0x8a] ss:$2 sm:$0x1]  ;;  %v3617_v33 = vmul.f32 %v3119_v15, %v3521_v10  ;;  %v3627_v47 = vmul.f32 %v3555_v46, %v3119_v15  ;;  %v3630_v48 = vmul.f32 %v3121_v28, %v3536_v34 }
  0x3c   : > { %v3559_v54 = vadd.f32 %v1199_v42, %v1193_v40  ;;  %v3582_v6 = vmul.f32 %v3105_v49, %v3536_v34 }
  0xd3   : > { %v3189_v51 = vpop.f32.mrf.mxu0 }
  0xd4   : > { %v759_v59 = vmul.f32 %v3189_v51, %v3545_v43 }
  0xd5   : > { %v623_v4 = vpop.f32.mrf.mxu0 }
  0xd6   : > { %v798_v9 = vadd.f32 %v3550_v45, %v759_v59  ;;  %v757_v11 = vmul.f32 %v3545_v43, %v623_v4  ;;  %v3213_v17 = vpop.f32.mrf.mxu1 }
  0xd7   : > { %v3190_v16 = vpop.f32.mrf.mxu0  ;;  %v783_v27 = vmul.f32 %v3213_v17, %v3545_v43 }
  0xd8   : > { %v830_v24 = vmax.f32 %v798_v9, 0.0  ;;  %v796_v25 = vadd.f32 %v3550_v45, %v757_v11  ;;  %v760_v26 = vmul.f32 %v3190_v16, %v3545_v43  ;;  %v719_v30 = vpop.f32.mrf.mxu1  ;;  %v3638_v9 = vmul.f32 %v3555_v46, %v3123_v8 }
  0xd9   : > { %v626_v29 = vpop.f32.mrf.mxu0  ;;  %v822_v41 = vadd.f32 %v3550_v45, %v783_v27  ;;  %v781_v42 = vmul.f32 %v3545_v43, %v719_v30 }
  0xda   : > { %v862_v36 = vmin.f32 %v830_v24, 6.0  ;;  %v828_v37 = vmax.f32 %v796_v25, 0.0  ;;  %v799_v38 = vadd.f32 %v3550_v45, %v760_v26  ;;  %v758_v39 = vmul.f32 %v3545_v43, %v626_v29  ;;  %v3214_v44 = vpop.f32.mrf.mxu1 }
  0xdb   : > { %v3193_v40 = vpop.f32.mrf.mxu0  ;;  %v854_v59 = vmax.f32 %v822_v41, 0.0  ;;  %v820_v2 = vadd.f32 %v3550_v45, %v781_v42  ;;  %v784_v3 = vmul.f32 %v3214_v44, %v3545_v43 }
  0xdc   : > { %894 = vst.msk [vmem:[#allocation2 + $0x4a] sm:$0xff] %vm390_vm2, %v862_v36  ;;  %v860_v49 = vmin.f32 %v828_v37, 6.0  ;;  %v831_v50 = vmax.f32 %v799_v38, 0.0  ;;  %v797_v51 = vadd.f32 %v3550_v45, %v758_v39  ;;  %v763_v57 = vmul.f32 %v3193_v40, %v3545_v43  ;;  %v722_v4 = vpop.f32.mrf.mxu1 }
  0xdd   : > { %v639_v58 = vpop.f32.mrf.mxu0  ;;  %v886_v24 = vmin.f32 %v854_v59, 6.0  ;;  %v852_v25 = vmax.f32 %v820_v2, 0.0  ;;  %v823_v26 = vadd.f32 %v3550_v45, %v784_v3  ;;  %v782_v27 = vmul.f32 %v3545_v43, %v722_v4 }
  0xde   : > { %892 = vst.msk [vmem:[#allocation2 + $0x32] sm:$0xff] %vm390_vm2, %v860_v49  ;;  %v863_v11 = vmin.f32 %v831_v50, 6.0  ;;  %v829_v14 = vmax.f32 %v797_v51, 0.0  ;;  %v802_v15 = vadd.f32 %v3550_v45, %v763_v57  ;;  %v761_v16 = vmul.f32 %v3545_v43, %v639_v58  ;;  %v3217_v28 = vpop.f32.mrf.mxu1 }
  0xdf   : > { %v3194_v17 = vpop.f32.mrf.mxu0  ;;  %918 = vst.msk [vmem:[#allocation2 + $0x16a] sm:$0xff] %vm390_vm2, %v886_v24  ;;  %v884_v38 = vmin.f32 %v852_v25, 6.0  ;;  %v855_v39 = vmax.f32 %v823_v26, 0.0  ;;  %v821_v40 = vadd.f32 %v3550_v45, %v782_v27  ;;  %v787_v41 = vmul.f32 %v3217_v28, %v3545_v43 }
  0xe0   : > { %895 = vst.msk [vmem:[#allocation2 + $0x52] sm:$0xff] %vm390_vm2, %v863_v11  ;;  %v861_v8 = vmin.f32 %v829_v14, 6.0  ;;  %v834_v29 = vmax.f32 %v802_v15, 0.0  ;;  %v800_v30 = vadd.f32 %v3550_v45, %v761_v16  ;;  %v764_v36 = vmul.f32 %v3194_v17, %v3545_v43  ;;  %v735_v42 = vpop.f32.mrf.mxu1 }
  0xe1   : > { %v642_v37 = vpop.f32.mrf.mxu0  ;;  %916 = vst.msk [vmem:[#allocation2 + $0x152] sm:$0xff] %vm390_vm2, %v884_v38  ;;  %v887_v58 = vmin.f32 %v855_v39, 6.0  ;;  %v853_v59 = vmax.f32 %v821_v40, 0.0  ;;  %v826_v2 = vadd.f32 %v3550_v45, %v787_v41  ;;  %v785_v3 = vmul.f32 %v3545_v43, %v735_v42 }
  0xe2   : > { %893 = vst.msk [vmem:[#allocation2 + $0x3a] sm:$0xff] %vm390_vm2, %v861_v8  ;;  %v866_v44 = vmin.f32 %v834_v29, 6.0  ;;  %v832_v49 = vmax.f32 %v800_v30, 0.0  ;;  %v803_v50 = vadd.f32 %v3550_v45, %v764_v36  ;;  %v762_v51 = vmul.f32 %v3545_v43, %v642_v37  ;;  %v3218_v4 = vpop.f32.mrf.mxu1  ;;  %v3125_v37 = vld [vmem:[#allocation2 + $0x17a] ss:$2 sm:$0x1] }
  0xe3   : > { %v3197_v57 = vpop.f32.mrf.mxu0  ;;  %919 = vst.msk [vmem:[#allocation2 + $0x172] sm:$0xff] %vm390_vm2, %v887_v58  ;;  %v885_v24 = vmin.f32 %v853_v59, 6.0  ;;  %v858_v25 = vmax.f32 %v826_v2, 0.0  ;;  %v824_v26 = vadd.f32 %v3550_v45, %v785_v3  ;;  %v788_v27 = vmul.f32 %v3218_v4, %v3545_v43 }
  0xe4   : > { %898 = vst.msk [vmem:[#allocation2 + $0x7a] sm:$0xff] %vm390_vm2, %v866_v44  ;;  %v864_v11 = vmin.f32 %v832_v49, 6.0  ;;  %v835_v14 = vmax.f32 %v803_v50, 0.0  ;;  %v801_v15 = vadd.f32 %v3550_v45, %v762_v51  ;;  %v767_v16 = vmul.f32 %v3197_v57, %v3545_v43  ;;  %v738_v28 = vpop.f32.mrf.mxu1  ;;  %v3054_v57 = vld [vmem:[#allocation2 + $0x1b0] ss:$2 sm:$0xff] }
  0xe5   : > { %v655_v17 = vpop.f32.mrf.mxu0  ;;  %917 = vst.msk [vmem:[#allocation2 + $0x15a] sm:$0xff] %vm390_vm2, %v885_v24  ;;  %v890_v39 = vmin.f32 %v858_v25, 6.0  ;;  %v856_v40 = vmax.f32 %v824_v26, 0.0  ;;  %v827_v41 = vadd.f32 %v3550_v45, %v788_v27  ;;  %v786_v42 = vmul.f32 %v3545_v43, %v738_v28 }
  0xe6   : > { %896 = vst.msk [vmem:[#allocation2 + $0x62] sm:$0xff] %vm390_vm2, %v864_v11  ;;  %v867_v8 = vmin.f32 %v835_v14, 6.0  ;;  %v833_v29 = vmax.f32 %v801_v15, 0.0  ;;  %v806_v30 = vadd.f32 %v3550_v45, %v767_v16  ;;  %v765_v36 = vmul.f32 %v3545_v43, %v655_v17 }
  0xe7   : > { %v3198_v38 = vpop.f32.mrf.mxu0  ;;  %922 = vst.msk [vmem:[#allocation2 + $0x19a] sm:$0xff] %vm390_vm2, %v890_v39  ;;  %v888_v59 = vmin.f32 %v856_v40, 6.0  ;;  %v859_v2 = vmax.f32 %v827_v41, 0.0  ;;  %v825_v3 = vadd.f32 %v3550_v45, %v786_v42  ;;  %v3024_v11 = vld [vmem:[#allocation2 + $0x48] ss:$2 sm:$0xff]  ;;  %v3675_v14 = vmul.f32 %v3125_v37, %v3536_v34 }
  0xe8   : > { %899 = vst.msk [vmem:[#allocation2 + $0x82] sm:$0xff] %vm390_vm2, %v867_v8  ;;  %v865_v44 = vmin.f32 %v833_v29, 6.0  ;;  %v838_v49 = vmax.f32 %v806_v30, 0.0  ;;  %v804_v50 = vadd.f32 %v3550_v45, %v765_v36  ;;  %v768_v51 = vmul.f32 %v3198_v38, %v3545_v43 }
  0xe9   : > { %v658_v58 = vpop.f32.mrf.mxu0  ;;  %v3022_v4 = vld [vmem:[#allocation2 + $0x30] ss:$2 sm:$0xff]  ;;  %v3023_v25 = vld [vmem:[#allocation2 + $0x40] ss:$2 sm:$0x1]  ;;  %920 = vst.msk [vmem:[#allocation2 + $0x182] sm:$0xff] %vm390_vm2, %v888_v59 }
  0xea   : > { %897 = vst.msk [vmem:[#allocation2 + $0x6a] sm:$0xff] %vm390_vm2, %v865_v44  ;;  %v870_v15 = vmin.f32 %v838_v49, 6.0  ;;  %v836_v16 = vmax.f32 %v804_v50, 0.0  ;;  %v807_v17 = vadd.f32 %v3550_v45, %v768_v51  ;;  %v766_v24 = vmul.f32 %v3545_v43, %v658_v58  ;;  %v3060_v8 = vld [vmem:[#allocation2 + $0x31] ss:$2 sm:$0xff] }
  0xeb   : > { %v3201_v26 = vpop.f32.mrf.mxu0  ;;  %v891_v27 = vmin.f32 %v859_v2, 6.0  ;;  %v857_v28 = vmax.f32 %v825_v3, 0.0  ;;  %v1206_v29 = vmul.f32 %v3022_v4, %v3561_v55  ;;  %v1207_v30 = vmul.f32 %v3023_v25, %v3561_v55  ;;  %v3061_v40 = vld [vmem:[#allocation2 + $0x41] ss:$2 sm:$0x1] }
  0xec   : > { %902 = vst.msk [vmem:[#allocation2 + $0xaa] sm:$0xff] %vm390_vm2, %v870_v15  ;;  %v868_v36 = vmin.f32 %v836_v16, 6.0  ;;  %v839_v37 = vmax.f32 %v807_v17, 0.0  ;;  %v805_v38 = vadd.f32 %v3550_v45, %v766_v24  ;;  %v771_v39 = vmul.f32 %v3201_v26, %v3545_v43  ;;  %v3098_v3 = vld [vmem:[#allocation2 + $0x32] ss:$2 sm:$0xff] }
  0xed   : > { %v671_v41 = vpop.f32.mrf.mxu0  ;;  %923 = vst.msk [vmem:[#allocation2 + $0x1a2] sm:$0xff] %vm390_vm2, %v891_v27  ;;  %v889_v42 = vmin.f32 %v857_v28, 6.0  ;;  %v1208_v44 = vadd.f32 %v1206_v29, %v3557_v52  ;;  %v1236_v49 = vmul.f32 %v3024_v11, %v3527_v19  ;;  %v3690_v50 = vmul.f32 %v3054_v57, %v3561_v55 }
  0xee   : > { %900 = vst.msk [vmem:[#allocation2 + $0x92] sm:$0xff] %vm390_vm2, %v868_v36  ;;  %v871_v51 = vmin.f32 %v839_v37, 6.0  ;;  %v837_v58 = vmax.f32 %v805_v38, 0.0  ;;  %v810_v59 = vadd.f32 %v3550_v45, %v771_v39  ;;  %v769_v2 = vmul.f32 %v3545_v43, %v671_v41  ;;  %v3025_v41 = vld [vmem:[#allocation2 + $0x58] ss:$2 sm:$0x1] }
  0xef   : > { %v3202_v15 = vpop.f32.mrf.mxu0  ;;  %921 = vst.msk [vmem:[#allocation2 + $0x18a] sm:$0xff] %vm390_vm2, %v889_v42  ;;  %v1209_v16 = vadd.f32 %v1207_v30, %v3559_v54  ;;  %v1214_v52 = vmul.f32 %v3060_v8, %v3563_v56  ;;  %v1215_v11 = vmul.f32 %v3061_v40, %v3563_v56  ;;  %v1226_v57 = vmul.f32 %v3022_v4, %v3512_v63 }
  0xf0   : > { %903 = vst.msk [vmem:[#allocation2 + $0xb2] sm:$0xff] %vm390_vm2, %v871_v51  ;;  %v869_v17 = vmin.f32 %v837_v58, 6.0  ;;  %v842_v24 = vmax.f32 %v810_v59, 0.0  ;;  %v808_v26 = vadd.f32 %v3550_v45, %v769_v2  ;;  %v772_v27 = vmul.f32 %v3202_v15, %v3545_v43  ;;  %v3062_v51 = vld [vmem:[#allocation2 + $0x49] ss:$2 sm:$0xff] }
  0xf1   : > { %v674_v28 = vpop.f32.mrf.mxu0  ;;  %v1216_v29 = vadd.f32 %v1214_v52, %v1208_v44  ;;  %v1222_v36 = vmul.f32 %v3555_v46, %v3098_v3  ;;  %v1227_v54 = vmul.f32 %v3023_v25, %v3512_v63  ;;  %v1228_v30 = vmul.f32 %v3060_v8, %v3514_v0 }
  0xf2   : > { %901 = vst.msk [vmem:[#allocation2 + $0x9a] sm:$0xff] %vm390_vm2, %v869_v17  ;;  %v874_v37 = vmin.f32 %v842_v24, 6.0  ;;  %v840_v4 = vmax.f32 %v808_v26, 0.0  ;;  %v811_v38 = vadd.f32 %v3550_v45, %v772_v27  ;;  %v770_v39 = vmul.f32 %v3545_v43, %v674_v28  ;;  %v3063_v17 = vld [vmem:[#allocation2 + $0x59] ss:$2 sm:$0x1] }
  0xf3   : > { %v3205_v42 = vpop.f32.mrf.mxu0  ;;  %v3709_v58 = vadd.f32 %v1215_v11, %v1209_v16  ;;  %v1229_v44 = vmul.f32 %v3061_v40, %v3514_v0  ;;  %v1230_v59 = vadd.f32 %v1228_v30, %v1226_v57  ;;  %v1232_v25 = vmul.f32 %v3098_v3, %v3521_v10  ;;  %v3026_v30 = vld [vmem:[#allocation2 + $0x60] ss:$2 sm:$0xff] }
  0xf4   : > { %906 = vst.msk [vmem:[#allocation2 + $0xda] sm:$0xff] %vm390_vm2, %v874_v37  ;;  %v872_v8 = vmin.f32 %v840_v4, 6.0  ;;  %v843_v2 = vmax.f32 %v811_v38, 0.0  ;;  %v809_v15 = vadd.f32 %v3550_v45, %v770_v39  ;;  %v775_v52 = vmul.f32 %v3205_v42, %v3545_v43  ;;  %v3100_v37 = vld [vmem:[#allocation2 + $0x4a] ss:$2 sm:$0xff] }
  0xf5   : > { %v687_v24 = vpop.f32.mrf.mxu0  ;;  %v3716_v26 = vadd.f32 %v1222_v36, %v1216_v29  ;;  %v1231_v27 = vadd.f32 %v1229_v44, %v1227_v54  ;;  %v1234_v16 = vadd.f32 %v1232_v25, %v1230_v59  ;;  %v1237_v11 = vmul.f32 %v3025_v41, %v3527_v19  ;;  %v3027_v38 = vld [vmem:[#allocation2 + $0x70] ss:$2 sm:$0x1]  ;;  %v3064_v25 = vld [vmem:[#allocation2 + $0x61] ss:$2 sm:$0xff] }
  0xf6   : > { %904 = vst.msk [vmem:[#allocation2 + $0xc2] sm:$0xff] %vm390_vm2, %v872_v8  ;;  %v875_v40 = vmin.f32 %v843_v2, 6.0  ;;  %v841_v3 = vmax.f32 %v809_v15, 0.0  ;;  %v814_v57 = vadd.f32 %v3550_v45, %v775_v52  ;;  %v773_v28 = vmul.f32 %v3545_v43, %v687_v24 }
  0xf7   : > { %v3206_v4 = vpop.f32.mrf.mxu0  ;;  %v1235_v39 = vadd.f32 %v3570_v61, %v1231_v27  ;;  %v1238_v29 = vadd.f32 %v1236_v49, %v1234_v16  ;;  %v1240_v36 = vmul.f32 %v3062_v51, %v3529_v22  ;;  %v1241_v54 = vmul.f32 %v3063_v17, %v3529_v22  ;;  %v3065_v27 = vld [vmem:[#allocation2 + $0x71] ss:$2 sm:$0x1] }
  0xf8   : > { %907 = vst.msk [vmem:[#allocation2 + $0xe2] sm:$0xff] %vm390_vm2, %v875_v40  ;;  %v873_v41 = vmin.f32 %v841_v3, 6.0  ;;  %v846_v42 = vmax.f32 %v814_v57, 0.0  ;;  %v812_v44 = vadd.f32 %v3550_v45, %v773_v28  ;;  %v776_v59 = vmul.f32 %v3206_v4, %v3545_v43 }
  0xf9   : > { %v690_v8 = vpop.f32.mrf.mxu0  ;;  %v1239_v2 = vadd.f32 %v1237_v11, %v1235_v39  ;;  %v1242_v15 = vadd.f32 %v1240_v36, %v1238_v29  ;;  %v1244_v52 = vmul.f32 %v3100_v37, %v3536_v34  ;;  %v1248_v61 = vmul.f32 %v3026_v30, %v3561_v55 }
  0xfa   : > { %905 = vst.msk [vmem:[#allocation2 + $0xca] sm:$0xff] %vm390_vm2, %v873_v41  ;;  %v878_v49 = vmin.f32 %v846_v42, 6.0  ;;  %v844_v51 = vmax.f32 %v812_v44, 0.0  ;;  %v815_v17 = vadd.f32 %v3550_v45, %v776_v59  ;;  %v774_v24 = vmul.f32 %v3545_v43, %v690_v8 }
  0xfb   : > { %v3209_v16 = vpop.f32.mrf.mxu0  ;;  %v1243_v40 = vadd.f32 %v1241_v54, %v1239_v2  ;;  %v1246_v3 = vadd.f32 %v1244_v52, %v1242_v15  ;;  %v1249_v57 = vmul.f32 %v3027_v38, %v3561_v55  ;;  %v1252_v11 = vmul.f32 %v3064_v25, %v3563_v56  ;;  %v3102_v15 = vld [vmem:[#allocation2 + $0x62] ss:$2 sm:$0xff] }
  0xfc   : > { %910 = vst.msk [vmem:[#allocation2 + $0x10a] sm:$0xff] %vm390_vm2, %v878_v49  ;;  %v876_v28 = vmin.f32 %v844_v51, 6.0  ;;  %v847_v37 = vmax.f32 %v815_v17, 0.0  ;;  %v813_v4 = vadd.f32 %v3550_v45, %v774_v24  ;;  %v779_v39 = vmul.f32 %v3209_v16, %v3545_v43 }
  0xfd   : > { %v703_v29 = vpop.f32.mrf.mxu0  ;;  %v1247_v36 = vadd.f32 %v3573_v1, %v1243_v40  ;;  %v1250_v41 = vadd.f32 %v1248_v61, %v1246_v3  ;;  %v1253_v42 = vmul.f32 %v3065_v27, %v3563_v56  ;;  %v1260_v54 = vmul.f32 %v3026_v30, %v3512_v63  ;;  %v3028_v3 = vld [vmem:[#allocation2 + $0x78] ss:$2 sm:$0xff] }
  0xfe   : > { %908 = vst.msk [vmem:[#allocation2 + $0xf2] sm:$0xff] %vm390_vm2, %v876_v28  ;;  %v879_v44 = vmin.f32 %v847_v37, 6.0  ;;  %v845_v59 = vmax.f32 %v813_v4, 0.0  ;;  %v818_v8 = vadd.f32 %v3550_v45, %v779_v39  ;;  %v777_v2 = vmul.f32 %v3545_v43, %v703_v29  ;;  %v3029_v29 = vld [vmem:[#allocation2 + $0x88] ss:$2 sm:$0x1] }
  0xff   : > { %v3210_v52 = vpop.f32.mrf.mxu0  ;;  %v1251_v49 = vadd.f32 %v1249_v57, %v1247_v36  ;;  %v1254_v51 = vadd.f32 %v1252_v11, %v1250_v41  ;;  %v1261_v17 = vmul.f32 %v3027_v38, %v3512_v63  ;;  %v1262_v1 = vmul.f32 %v3064_v25, %v3514_v0  ;;  %v3066_v36 = vld [vmem:[#allocation2 + $0x79] ss:$2 sm:$0xff]  ;;  %v3067_v41 = vld [vmem:[#allocation2 + $0x89] ss:$2 sm:$0x1] }
 0x100   : > { %911 = vst.msk [vmem:[#allocation2 + $0x112] sm:$0xff] %vm390_vm2, %v879_v44  ;;  %v877_v61 = vmin.f32 %v845_v59, 6.0  ;;  %v850_v30 = vmax.f32 %v818_v8, 0.0  ;;  %v816_v24 = vadd.f32 %v3550_v45, %v777_v2  ;;  %v780_v16 = vmul.f32 %v3210_v52, %v3545_v43  ;;  %v3030_v52 = vld [vmem:[#allocation2 + $0x90] ss:$2 sm:$0xff] }
 0x101   : > { %v706_v40 = vpop.f32.mrf.mxu0  ;;  %v1255_v28 = vadd.f32 %v1253_v42, %v1251_v49  ;;  %v1256_v37 = vmul.f32 %v3555_v46, %v3102_v15  ;;  %v1263_v57 = vmul.f32 %v3065_v27, %v3514_v0  ;;  %v1264_v11 = vadd.f32 %v1262_v1, %v1260_v54  ;;  %v3104_v49 = vld [vmem:[#allocation2 + $0x7a] ss:$2 sm:$0xff] }
 0x102   : > { %909 = vst.msk [vmem:[#allocation2 + $0xfa] sm:$0xff] %vm390_vm2, %v877_v61  ;;  %v882_v38 = vmin.f32 %v850_v30, 6.0  ;;  %v848_v25 = vmax.f32 %v816_v24, 0.0  ;;  %v819_v4 = vadd.f32 %v3550_v45, %v780_v16  ;;  %v778_v39 = vmul.f32 %v3545_v43, %v706_v40  ;;  %v3031_v1 = vld [vmem:[#allocation2 + $0xa0] ss:$2 sm:$0x1] }
 0x103   : > { %v1225_v42 = vadd.f32 %v3567_v60, %v3709_v58  ;;  %v3756_v44 = vadd.f32 %v1256_v37, %v1254_v51  ;;  %v1265_v59 = vadd.f32 %v1263_v57, %v1261_v17  ;;  %v1266_v27 = vmul.f32 %v3102_v15, %v3521_v10  ;;  %v3068_v61 = vld [vmem:[#allocation2 + $0x91] ss:$2 sm:$0xff]  ;;  %v3069_v24 = vld [vmem:[#allocation2 + $0xa1] ss:$2 sm:$0x1] }
 0x104   : > { %914 = vst.msk [vmem:[#allocation2 + $0x13a] sm:$0xff] %vm390_vm2, %v882_v38  ;;  %v880_v54 = vmin.f32 %v848_v25, 6.0  ;;  %v851_v8 = vmax.f32 %v819_v4, 0.0  ;;  %v817_v2 = vadd.f32 %v3550_v45, %v778_v39  ;;  %v1259_v43 = vadd.f32 %v3576_v5, %v1255_v28  ;;  %v3106_v40 = vld [vmem:[#allocation2 + $0x92] ss:$2 sm:$0xff] }
 0x105   : > { %v1268_v30 = vadd.f32 %v1266_v27, %v1264_v11  ;;  %v1269_v60 = vadd.f32 %v3579_v62, %v1265_v59  ;;  %v1270_v58 = vmul.f32 %v3028_v3, %v3527_v19  ;;  %v1271_v51 = vmul.f32 %v3029_v29, %v3527_v19  ;;  %v3070_v25 = vld [vmem:[#allocation2 + $0xa9] ss:$2 sm:$0xff]  ;;  %v3032_v4 = vld [vmem:[#allocation2 + $0xa8] ss:$2 sm:$0xff]  ;;  %v3779_v59 = vld [vmem:[%s4206_s5] ss:$0 sm:$0xff] }
 0x106   : > { %912 = vst.msk [vmem:[#allocation2 + $0x122] sm:$0xff] %vm390_vm2, %v880_v54  ;;  %v883_v15 = vmin.f32 %v851_v8, 6.0  ;;  %v849_v17 = vmax.f32 %v817_v2, 0.0  ;;  %v1274_v45 = vmul.f32 %v3066_v36, %v3529_v22  ;;  %v1275_v16 = vmul.f32 %v3067_v41, %v3529_v22 }
 0x107   : > { %v1272_v5 = vadd.f32 %v1270_v58, %v1268_v30  ;;  %v1273_v28 = vadd.f32 %v1271_v51, %v1269_v60  ;;  %v1278_v37 = vmul.f32 %v3104_v49, %v3536_v34  ;;  %v1282_v62 = vmul.f32 %v3030_v52, %v3561_v55  ;;  %v3790_v58 = vld [vmem:[%s4207_s6] ss:$0 sm:$0xff] }
 0x108   : > { %915 = vst.msk [vmem:[#allocation2 + $0x142] sm:$0xff] %vm390_vm2, %v883_v15  ;;  %v881_v3 = vmin.f32 %v849_v17, 6.0  ;;  %v1283_v57 = vmul.f32 %v3031_v1, %v3561_v55  ;;  %v1286_v11 = vmul.f32 %v3068_v61, %v3563_v56  ;;  %v1294_v38 = vmul.f32 %v3030_v52, %v3512_v63  ;;  %v3108_v52 = vld [vmem:[#allocation2 + $0xaa] ss:$2 sm:$0xff] }
 0x109   : > { %v1276_v39 = vadd.f32 %v1274_v45, %v1272_v5  ;;  %v1277_v29 = vadd.f32 %v1275_v16, %v1273_v28  ;;  %v1287_v36 = vmul.f32 %v3069_v24, %v3563_v56  ;;  %v1296_v41 = vmul.f32 %v3068_v61, %v3514_v0  ;;  %v3034_v51 = vld [vmem:[#allocation2 + $0xc0] ss:$2 sm:$0xff] }
 0x10a   : > { %913 = vst.msk [vmem:[#allocation2 + $0x12a] sm:$0xff] %vm390_vm2, %v881_v3  ;;  %v1290_v27 = vmul.f32 %v3555_v46, %v3106_v40  ;;  %v1297_v54 = vmul.f32 %v3069_v24, %v3514_v0  ;;  %v1300_v8 = vmul.f32 %v3106_v40, %v3521_v10  ;;  %v1501_v2 = vrot.slane %v3756_v44, 7  ;;  %v3072_v40 = vld [vmem:[#allocation2 + $0xc1] ss:$2 sm:$0xff] }
 0x10b   : > { %v1280_v49 = vadd.f32 %v1278_v37, %v1276_v39  ;;  %v1281_v61 = vadd.f32 %v3582_v6, %v1277_v29  ;;  %v1298_v30 = vadd.f32 %v1296_v41, %v1294_v38  ;;  %v1502_v60 = vrot.slane %v1259_v43, 7  ;;  %v3110_v43 = vld [vmem:[#allocation2 + $0xc2] ss:$2 sm:$0xff]  ;;  %v3033_v39 = vld [vmem:[#allocation2 + $0xb8] ss:$2 sm:$0x1] }
 0x10c   : > { %v1304_v15 = vmul.f32 %v3032_v4, %v3527_v19  ;;  %v1308_v17 = vmul.f32 %v3070_v25, %v3529_v22  ;;  %v1554_v24 = vsel %vm1500_vm6, %v1225_v42, %v1501_v2  ;;  %v1568_v44 = vmul.f32 %v3779_v59, %v3716_v26  ;;  %v3071_v26 = vld [vmem:[#allocation2 + $0xb9] ss:$2 sm:$0x1] }
 0x10d   : > { %v1284_v45 = vadd.f32 %v1282_v62, %v1280_v49  ;;  %v1285_v16 = vadd.f32 %v1283_v57, %v1281_v61  ;;  %v1302_v6 = vadd.f32 %v1300_v8, %v1298_v30  ;;  %v1312_v5 = vmul.f32 %v3108_v52, %v3536_v34  ;;  %v3035_v61 = vld [vmem:[#allocation2 + $0xd0] ss:$2 sm:$0x1] }
 0x10e   : > { %v1503_v28 = vsel %vm1500_vm6, %v1501_v2, %v1502_v60  ;;  %v1569_v37 = vmul.f32 %v3779_v59, %v1554_v24  ;;  %v1586_v3 = vadd.f32 %v3790_v58, %v1568_v44  ;;  %v1316_v38 = vmul.f32 %v3034_v51, %v3561_v55 }
 0x10f   : > { %v1288_v25 = vadd.f32 %v1286_v11, %v1284_v45  ;;  %v1289_v42 = vadd.f32 %v1287_v36, %v1285_v16  ;;  %v1306_v4 = vadd.f32 %v1304_v15, %v1302_v6  ;;  %v1295_v62 = vmul.f32 %v3031_v1, %v3512_v63  ;;  %v3073_v45 = vld [vmem:[#allocation2 + $0xd1] ss:$2 sm:$0x1] }
 0x110   : > { %v1587_v57 = vadd.f32 %v3790_v58, %v1569_v37  ;;  %v1597_v29 = vmax.f32 %v1586_v3, 0.0  ;;  %v1320_v41 = vmul.f32 %v3072_v40, %v3563_v56  ;;  %v1324_v8 = vmul.f32 %v3555_v46, %v3110_v43  ;;  %v3036_v3 = vld [vmem:[#allocation2 + $0xd8] ss:$2 sm:$0xff] }
 0x111   : > { %v1292_v2 = vadd.f32 %v1290_v27, %v1288_v25  ;;  %v1293_v52 = vadd.f32 %v3585_v7, %v1289_v42  ;;  %v1310_v49 = vadd.f32 %v1308_v17, %v1306_v4  ;;  %v1299_v30 = vadd.f32 %v1297_v54, %v1295_v62 }
 0x112   : > { %v1598_v11 = vmax.f32 %v1587_v57, 0.0  ;;  %v1608_v36 = vmin.f32 %v1597_v29, 6.0  ;;  %v1305_v60 = vmul.f32 %v3033_v39, %v3527_v19  ;;  %v1309_v1 = vmul.f32 %v3071_v26, %v3529_v22  ;;  %v3037_v39 = vld [vmem:[#allocation2 + $0xe8] ss:$2 sm:$0x1] }
 0x113   : > { %v1509_v15 = vrot.slane %v1292_v2, 6  ;;  %v1510_v24 = vrot.slane %v1293_v52, 6  ;;  %v1314_v44 = vadd.f32 %v1312_v5, %v1310_v49  ;;  %v1303_v16 = vadd.f32 %v3590_v12, %v1299_v30  ;;  %v3075_v57 = vld [vmem:[#allocation2 + $0xe9] ss:$2 sm:$0x1] }
 0x114   : > { %v1609_v6 = vmin.f32 %v1598_v11, 6.0  ;;  %v1328_v27 = vmul.f32 %v3034_v51, %v3512_v63  ;;  %v1329_v7 = vmul.f32 %v3035_v61, %v3512_v63  ;;  %v1330_v54 = vmul.f32 %v3072_v40, %v3514_v0  ;;  %v3074_v51 = vld [vmem:[#allocation2 + $0xd9] ss:$2 sm:$0xff]  ;;  %v3112_v52 = vld [vmem:[#allocation2 + $0xda] ss:$2 sm:$0xff] }
 0x115   : > { %v1555_v17 = vsel %vm1508_vm7, %v1503_v28, %v1509_v15  ;;  %v1318_v37 = vadd.f32 %v1316_v38, %v1314_v44  ;;  %v1307_v25 = vadd.f32 %v1305_v60, %v1303_v16  ;;  %v1317_v42 = vmul.f32 %v3035_v61, %v3561_v55  ;;  %v3039_v11 = vld [vmem:[#allocation2 + $0x100] ss:$2 sm:$0x1]  ;;  %v3076_v44 = vld [vmem:[#allocation2 + $0xf1] ss:$2 sm:$0xff] }
 0x116   : > { %v1570_v4 = vmul.f32 %v3779_v59, %v1555_v17  ;;  %v1619_v5 = vpack.c.bf16 %v1609_v6, %v1608_v36  ;;  %v1331_v12 = vmul.f32 %v3073_v45, %v3514_v0  ;;  %v1332_v26 = vadd.f32 %v1330_v54, %v1328_v27  ;;  %v3077_v54 = vld [vmem:[#allocation2 + $0x101] ss:$2 sm:$0x1] }
 0x117   : > { %v1322_v62 = vadd.f32 %v1320_v41, %v1318_v37  ;;  %v1311_v29 = vadd.f32 %v1309_v1, %v1307_v25  ;;  %v1321_v40 = vmul.f32 %v3073_v45, %v3563_v56  ;;  %v1334_v28 = vmul.f32 %v3110_v43, %v3521_v10  ;;  %v3038_v41 = vld [vmem:[#allocation2 + $0xf0] ss:$2 sm:$0xff] }
 0x118   : > { %v1511_v38 = vsel %vm1508_vm7, %v1509_v15, %v1510_v24  ;;  %3225 = vmatprep.mubr.msk.bf16.mxu1 %vm390_vm2, %v1619_v5  ;;  %v1588_v2 = vadd.f32 %v3790_v58, %v1570_v4  ;;  %v1333_v49 = vadd.f32 %v1331_v12, %v1329_v7  ;;  %v1338_v61 = vmul.f32 %v3036_v3, %v3527_v19  ;;  %v3114_v3 = vld [vmem:[#allocation2 + $0xf2] ss:$2 sm:$0xff] }
 0x119   : > { %v3823_v30 = vadd.f32 %v1324_v8, %v1322_v62  ;;  %v1315_v36 = vadd.f32 %v3593_v13, %v1311_v29  ;;  %v1336_v60 = vadd.f32 %v1334_v28, %v1332_v26  ;;  %v1339_v1 = vmul.f32 %v3037_v39, %v3527_v19  ;;  %v3040_v62 = vld [vmem:[#allocation2 + $0x108] ss:$2 sm:$0xff] }
 0x11a   : > { %v1599_v43 = vmax.f32 %v1588_v2, 0.0  ;;  %v1337_v15 = vadd.f32 %v3599_v20, %v1333_v49  ;;  %v1342_v24 = vmul.f32 %v3074_v51, %v3529_v22  ;;  %v1343_v45 = vmul.f32 %v3075_v57, %v3529_v22  ;;  %v3041_v51 = vld [vmem:[#allocation2 + $0x118] ss:$2 sm:$0x1]  ;;  %v3078_v2 = vld [vmem:[#allocation2 + $0x109] ss:$2 sm:$0xff] }
 0x11b   : > { %v1517_v16 = vrot.slane %v3823_v30, 5  ;;  %v1319_v6 = vadd.f32 %v1317_v42, %v1315_v36  ;;  %v1340_v8 = vadd.f32 %v1338_v61, %v1336_v60  ;;  %v1346_v27 = vmul.f32 %v3112_v52, %v3536_v34 }
 0x11c   : > { %v1610_v7 = vmin.f32 %v1599_v43, 6.0  ;;  %v1341_v13 = vadd.f32 %v1339_v1, %v1337_v15  ;;  %v1350_v17 = vmul.f32 %v3038_v41, %v3561_v55  ;;  %v1351_v37 = vmul.f32 %v3039_v11, %v3561_v55 }
 0x11d   : > { %v1556_v20 = vsel %vm1516_vm8, %v1511_v38, %v1517_v16  ;;  %v1323_v25 = vadd.f32 %v1321_v40, %v1319_v6  ;;  %v1344_v4 = vadd.f32 %v1342_v24, %v1340_v8  ;;  %v1354_v5 = vmul.f32 %v3076_v44, %v3563_v56 }
 0x11e   : > { %v1571_v42 = vmul.f32 %v3779_v59, %v1556_v20  ;;  %v1345_v39 = vadd.f32 %v1343_v45, %v1341_v13  ;;  %v1362_v12 = vmul.f32 %v3038_v41, %v3512_v63  ;;  %v1363_v26 = vmul.f32 %v3039_v11, %v3512_v63  ;;  %v3042_v41 = vld [vmem:[#allocation2 + $0x120] ss:$2 sm:$0xff] }
 0x11f   : > { %v1348_v57 = vadd.f32 %v1346_v27, %v1344_v4  ;;  %v1355_v29 = vmul.f32 %v3077_v54, %v3563_v56  ;;  %v1364_v28 = vmul.f32 %v3076_v44, %v3514_v0  ;;  %v1365_v38 = vmul.f32 %v3077_v54, %v3514_v0  ;;  %v3116_v11 = vld [vmem:[#allocation2 + $0x10a] ss:$2 sm:$0xff]  ;;  %v3080_v44 = vld [vmem:[#allocation2 + $0x121] ss:$2 sm:$0xff] }
 0x120   : > { %v1589_v40 = vadd.f32 %v3790_v58, %v1571_v42  ;;  %v1327_v52 = vadd.f32 %v3596_v18, %v1323_v25  ;;  %v1349_v49 = vadd.f32 %v3602_v21, %v1345_v39  ;;  %v1358_v61 = vmul.f32 %v3555_v46, %v3114_v3  ;;  %v3118_v13 = vld [vmem:[#allocation2 + $0x122] ss:$2 sm:$0xff]  ;;  %v3079_v39 = vld [vmem:[#allocation2 + $0x119] ss:$2 sm:$0x1] }
 0x121   : > { %v1352_v36 = vadd.f32 %v1350_v17, %v1348_v57  ;;  %v1366_v60 = vadd.f32 %v1364_v28, %v1362_v12  ;;  %v1367_v1 = vadd.f32 %v1365_v38, %v1363_v26  ;;  %v1368_v43 = vmul.f32 %v3114_v3, %v3521_v10  ;;  %v3044_v12 = vld [vmem:[#allocation2 + $0x138] ss:$2 sm:$0xff] }
 0x122   : > { %v1600_v15 = vmax.f32 %v1589_v40, 0.0  ;;  %v1353_v24 = vadd.f32 %v1351_v37, %v1349_v49  ;;  %v1372_v45 = vmul.f32 %v3040_v62, %v3527_v19  ;;  %v1373_v6 = vmul.f32 %v3041_v51, %v3527_v19  ;;  %v3043_v51 = vld [vmem:[#allocation2 + $0x130] ss:$2 sm:$0x1] }
 0x123   : > { %v1356_v8 = vadd.f32 %v1354_v5, %v1352_v36  ;;  %v1370_v18 = vadd.f32 %v1368_v43, %v1366_v60  ;;  %v1371_v21 = vadd.f32 %v3605_v23, %v1367_v1  ;;  %v1376_v27 = vmul.f32 %v3078_v2, %v3529_v22  ;;  %v3045_v1 = vld [vmem:[#allocation2 + $0x148] ss:$2 sm:$0x1] }
 0x124   : > { %v1611_v54 = vmin.f32 %v1600_v15, 6.0  ;;  %v1357_v17 = vadd.f32 %v1355_v29, %v1353_v24  ;;  %v1380_v20 = vmul.f32 %v3116_v11, %v3536_v34  ;;  %v1384_v3 = vmul.f32 %v3042_v41, %v3561_v55 }
 0x125   : > { %v1360_v25 = vadd.f32 %v1358_v61, %v1356_v8  ;;  %v1374_v4 = vadd.f32 %v1372_v45, %v1370_v18  ;;  %v1388_v37 = vmul.f32 %v3080_v44, %v3563_v56  ;;  %v1396_v42 = vmul.f32 %v3042_v41, %v3512_v63  ;;  %v3083_v45 = vld [vmem:[#allocation2 + $0x149] ss:$2 sm:$0x1] }
 0x126   : > { %v1620_v5 = vpack.c.bf16 %v1611_v54, %v1610_v7  ;;  %v1361_v23 = vadd.f32 %v3611_v31, %v1357_v17  ;;  %v1375_v26 = vadd.f32 %v1373_v6, %v1371_v21  ;;  %v1398_v62 = vmul.f32 %v3080_v44, %v3514_v0  ;;  %v3081_v7 = vld [vmem:[#allocation2 + $0x131] ss:$2 sm:$0x1]  ;;  %v3120_v6 = vld [vmem:[#allocation2 + $0x13a] ss:$2 sm:$0xff] }
 0x127   : > { %v1378_v57 = vadd.f32 %v1376_v27, %v1374_v4  ;;  %v1392_v29 = vmul.f32 %v3555_v46, %v3118_v13  ;;  %v1518_v28 = vrot.slane %v1327_v52, 5  ;;  %v1525_v38 = vrot.slane %v1360_v25, 4  ;;  %v3082_v46 = vld [vmem:[#allocation2 + $0x139] ss:$2 sm:$0xff] }
 0x128   : > { %3226 = vmatmul.mubr.msk.bf16.vlgmr.msra.gmra.mxu1 %vm390_vm2, %v1620_v5  ;;  %v1400_v40 = vadd.f32 %v1398_v62, %v1396_v42  ;;  %v1402_v2 = vmul.f32 %v3118_v13, %v3521_v10  ;;  %v1526_v49 = vrot.slane %v1361_v23, 4  ;;  %v1377_v61 = vmul.f32 %v3079_v39, %v3529_v22  ;;  %v3047_v25 = vld [vmem:[#allocation2 + $0x160] ss:$2 sm:$0x1]  ;;  %v3084_v23 = vld [vmem:[#allocation2 + $0x151] ss:$2 sm:$0xff] }
 0x129   : > { %v1382_v31 = vadd.f32 %v1380_v20, %v1378_v57  ;;  %v1406_v41 = vmul.f32 %v3044_v12, %v3527_v19  ;;  %v1519_v11 = vsel %vm1516_vm8, %v1517_v16, %v1518_v28  ;;  %v1397_v52 = vmul.f32 %v3043_v51, %v3512_v63  ;;  %v3122_v57 = vld [vmem:[#allocation2 + $0x152] ss:$2 sm:$0xff] }
 0x12a   : > { %v1404_v36 = vadd.f32 %v1402_v2, %v1400_v40  ;;  %v1557_v60 = vsel %vm585_vm0, %v1519_v11, %v1525_v38  ;;  %v1379_v43 = vadd.f32 %v1377_v61, %v1375_v26  ;;  %v1385_v15 = vmul.f32 %v3043_v51, %v3561_v55  ;;  %v3085_v51 = vld [vmem:[#allocation2 + $0x161] ss:$2 sm:$0x1] }
 0x12b   : > { %v1386_v44 = vadd.f32 %v1384_v3, %v1382_v31  ;;  %v1572_v24 = vmul.f32 %v3779_v59, %v1557_v60  ;;  %v1389_v8 = vmul.f32 %v3081_v7, %v3563_v56  ;;  %v1399_v30 = vmul.f32 %v3081_v7, %v3514_v0  ;;  %v3046_v3 = vld [vmem:[#allocation2 + $0x150] ss:$2 sm:$0xff]  ;;  %v3892_v31 = vld [vmem:[%s4205_s4 + $0x8] ss:$0 sm:$0xff] }
 0x12c   : > { %v1408_v16 = vadd.f32 %v1406_v41, %v1404_v36  ;;  %v1527_v18 = vsel %vm585_vm0, %v1525_v38, %v1526_v49  ;;  %v1383_v21 = vadd.f32 %v3614_v32, %v1379_v43  ;;  %v1410_v27 = vmul.f32 %v3082_v46, %v3529_v22  ;;  %v3048_v49 = vld [vmem:[#allocation2 + $0x168] ss:$2 sm:$0xff]  ;;  %v3086_v36 = vld [vmem:[#allocation2 + $0x169] ss:$2 sm:$0xff] }
 0x12d   : > { %v1390_v54 = vadd.f32 %v1388_v37, %v1386_v44  ;;  %v1590_v13 = vadd.f32 %v3790_v58, %v1572_v24  ;;  %v1401_v17 = vadd.f32 %v1399_v30, %v1397_v52  ;;  %v1407_v20 = vmul.f32 %v3045_v1, %v3527_v19  ;;  %v3124_v44 = vld [vmem:[#allocation2 + $0x16a] ss:$2 sm:$0xff] }
 0x12e   : > { %v1387_v4 = vadd.f32 %v1385_v15, %v1383_v21  ;;  %v1411_v42 = vmul.f32 %v3083_v45, %v3529_v22  ;;  %v1412_v39 = vadd.f32 %v1410_v27, %v1408_v16  ;;  %v1414_v5 = vmul.f32 %v3120_v6, %v3536_v34  ;;  %v3050_v30 = vld [vmem:[#allocation2 + $0x180] ss:$2 sm:$0xff]  ;;  %v3088_v16 = vld [vmem:[#allocation2 + $0x181] ss:$2 sm:$0xff] }
 0x12f   : > { %v3880_v12 = vadd.f32 %v1392_v29, %v1390_v54  ;;  %v1405_v32 = vadd.f32 %v3617_v33, %v1401_v17  ;;  %v1418_v37 = vmul.f32 %v3046_v3, %v3561_v55  ;;  %v1419_v26 = vmul.f32 %v3047_v25, %v3561_v55 }
 0x130   : > { %v1601_v62 = vmax.f32 %v1590_v13, 0.0  ;;  %v1391_v28 = vadd.f32 %v1389_v8, %v1387_v4  ;;  %v1416_v38 = vadd.f32 %v1414_v5, %v1412_v39  ;;  %v1422_v40 = vmul.f32 %v3084_v23, %v3563_v56  ;;  %v3126_v13 = vld [vmem:[#allocation2 + $0x182] ss:$2 sm:$0xff]  ;;  %v3049_v5 = vld [vmem:[#allocation2 + $0x178] ss:$2 sm:$0x1] }
 0x131   : > { %v1533_v2 = vrot.slane %v3880_v12, 3  ;;  %v1409_v7 = vadd.f32 %v1407_v20, %v1405_v32  ;;  %v1423_v29 = vmul.f32 %v3085_v51, %v3563_v56  ;;  %v1430_v61 = vmul.f32 %v3046_v3, %v3512_v63  ;;  %v3087_v32 = vld [vmem:[#allocation2 + $0x179] ss:$2 sm:$0x1] }
 0x132   : > { %v1420_v33 = vadd.f32 %v1418_v37, %v1416_v38  ;;  %v1426_v41 = vmul.f32 %v3892_v31, %v3122_v57  ;;  %v1431_v11 = vmul.f32 %v3047_v25, %v3512_v63  ;;  %v1432_v46 = vmul.f32 %v3084_v23, %v3514_v0 }
 0x133   : > { %v1558_v52 = vsel %vm1532_vm9, %v1527_v18, %v1533_v2  ;;  %v1413_v60 = vadd.f32 %v1411_v42, %v1409_v7  ;;  %v1433_v1 = vmul.f32 %v3085_v51, %v3514_v0  ;;  %v1436_v43 = vmul.f32 %v3122_v57, %v3521_v10  ;;  %v3127_v57 = vld [vmem:[#allocation2 + $0x192] ss:$2 sm:$0x1] }
 0x134   : > { %v1573_v15 = vmul.f32 %v3779_v59, %v1558_v52  ;;  %v1424_v24 = vadd.f32 %v1422_v40, %v1420_v33  ;;  %v1434_v45 = vadd.f32 %v1432_v46, %v1430_v61  ;;  %v1440_v6 = vmul.f32 %v3048_v49, %v3527_v19  ;;  %v3051_v40 = vld [vmem:[#allocation2 + $0x190] ss:$2 sm:$0x1] }
 0x135   : > { %v1612_v8 = vmin.f32 %v1601_v62, 6.0  ;;  %v1395_v21 = vadd.f32 %v3627_v47, %v1391_v28  ;;  %v1417_v18 = vadd.f32 %v3630_v48, %v1413_v60  ;;  %v1435_v27 = vadd.f32 %v1433_v1, %v1431_v11  ;;  %v3090_v1 = vld [vmem:[#allocation2 + $0x199] ss:$2 sm:$0xff] }
 0x136   : > { %v1591_v54 = vadd.f32 %v3790_v58, %v1573_v15  ;;  %v3905_v17 = vadd.f32 %v1426_v41, %v1424_v24  ;;  %v1438_v20 = vadd.f32 %v1436_v43, %v1434_v45  ;;  %v1444_v3 = vmul.f32 %v3086_v36, %v3529_v22  ;;  %v3052_v41 = vld [vmem:[#allocation2 + $0x198] ss:$2 sm:$0xff] }
 0x137   : > { %v1421_v25 = vadd.f32 %v1419_v26, %v1417_v18  ;;  %v1439_v4 = vadd.f32 %v3620_v35, %v1435_v27  ;;  %v1448_v42 = vmul.f32 %v3124_v44, %v3536_v34  ;;  %v1452_v39 = vmul.f32 %v3050_v30, %v3561_v55  ;;  %v3128_v15 = vld [vmem:[#allocation2 + $0x19a] ss:$2 sm:$0xff] }
 0x138   : > { %v1602_v47 = vmax.f32 %v1591_v54, 0.0  ;;  %v1442_v12 = vadd.f32 %v1440_v6, %v1438_v20  ;;  %v1464_v48 = vmul.f32 %v3050_v30, %v3512_v63  ;;  %v1466_v23 = vmul.f32 %v3088_v16, %v3514_v0  ;;  %v3053_v30 = vld [vmem:[#allocation2 + $0x1a8] ss:$2 sm:$0x1] }
 0x139   : > { %v1425_v37 = vadd.f32 %v1423_v29, %v1421_v25  ;;  %v1470_v62 = vmul.f32 %v3126_v13, %v3521_v10  ;;  %v1534_v51 = vrot.slane %v1395_v21, 3  ;;  %v1541_v26 = vrot.slane %v3905_v17, 2  ;;  %v3089_v29 = vld [vmem:[#allocation2 + $0x191] ss:$2 sm:$0x1] }
 0x13a   : > { %v1613_v35 = vmin.f32 %v1602_v47, 6.0  ;;  %v1446_v28 = vadd.f32 %v1444_v3, %v1442_v12  ;;  %v1468_v38 = vadd.f32 %v1466_v23, %v1464_v48  ;;  %v1441_v49 = vmul.f32 %v3049_v5, %v3527_v19  ;;  %v3091_v54 = vld [vmem:[#allocation2 + $0x1a9] ss:$2 sm:$0x1]  ;;  %v3092_v17 = vld [vmem:[#allocation2 + $0x1b1] ss:$2 sm:$0xff] }
 0x13b   : > { %v1429_v7 = vadd.f32 %v3638_v9, %v1425_v37  ;;  %v1456_v61 = vmul.f32 %v3088_v16, %v3563_v56  ;;  %v1535_v33 = vsel %vm1532_vm9, %v1533_v2, %v1534_v51  ;;  %v1445_v11 = vmul.f32 %v3087_v32, %v3529_v22  ;;  %v3130_v5 = vld [vmem:[#allocation2 + $0x1b2] ss:$2 sm:$0xff] }
 0x13c   : > { %v1621_v46 = vpack.c.bf16 %v1613_v35, %v1612_v8  ;;  %v1450_v52 = vadd.f32 %v1448_v42, %v1446_v28  ;;  %v1472_v36 = vadd.f32 %v1470_v62, %v1468_v38  ;;  %v1559_v60 = vsel %vm1540_vm10, %v1535_v33, %v1541_v26  ;;  %v3055_v62 = vld [vmem:[#allocation2 + $0x1c0] ss:$2 sm:$0x1] }
 0x13d   : > { %v1460_v43 = vmul.f32 %v3892_v31, %v3126_v13  ;;  %v1443_v44 = vadd.f32 %v1441_v49, %v1439_v4  ;;  %v1453_v9 = vmul.f32 %v3051_v40, %v3561_v55  ;;  %v1471_v24 = vmul.f32 %v3127_v57, %v3521_v10  ;;  %v3129_v4 = vld [vmem:[#allocation2 + $0x1aa] ss:$2 sm:$0x1] }
 0x13e   : > { %3229 = vmatprep.mubr.msk.bf16.mxu1 %vm390_vm2, %v1621_v46  ;;  %v1454_v2 = vadd.f32 %v1452_v39, %v1450_v52  ;;  %v1465_v45 = vmul.f32 %v3051_v40, %v3512_v63  ;;  %v1467_v6 = vmul.f32 %v3089_v29, %v3514_v0  ;;  %v1474_v8 = vmul.f32 %v3052_v41, %v3527_v19  ;;  %v3093_v40 = vld [vmem:[#allocation2 + $0x1c1] ss:$2 sm:$0x1] }
 0x13f   : > { %v1542_v16 = vrot.slane %v1429_v7, 2  ;;  %v1574_v21 = vmul.f32 %v3779_v59, %v1559_v60  ;;  %v1447_v18 = vadd.f32 %v1445_v11, %v1443_v44  ;;  %v1478_v27 = vmul.f32 %v3090_v1, %v3529_v22 }
 0x140   : > { %v1458_v13 = vadd.f32 %v1456_v61, %v1454_v2  ;;  %v1469_v10 = vadd.f32 %v1467_v6, %v1465_v45  ;;  %v1476_v20 = vadd.f32 %v1474_v8, %v1472_v36  ;;  %v1482_v3 = vmul.f32 %v3128_v15, %v3536_v34 }
 0x141   : > { %v1451_v63 = vadd.f32 %v3675_v14, %v1447_v18  ;;  %v1457_v0 = vmul.f32 %v3089_v29, %v3563_v56  ;;  %v1461_v25 = vmul.f32 %v3892_v31, %v3127_v57  ;;  %v1475_v42 = vmul.f32 %v3053_v30, %v3527_v19  ;;  %v3131_v29 = vld [vmem:[#allocation2 + $0x1c2] ss:$2 sm:$0x1] }
 0x142   : > { %v1462_v39 = vadd.f32 %v1460_v43, %v1458_v13  ;;  %v1473_v47 = vadd.f32 %v1471_v24, %v1469_v10  ;;  %v1480_v12 = vadd.f32 %v1478_v27, %v1476_v20  ;;  %v1479_v48 = vmul.f32 %v3091_v54, %v3529_v22 }
 0x143   : > { %v1543_v23 = vsel %vm1540_vm10, %v1541_v26, %v1542_v16  ;;  %v1592_v32 = vadd.f32 %v3790_v58, %v1574_v21  ;;  %v1455_v37 = vadd.f32 %v1453_v9, %v1451_v63  ;;  %v1490_v14 = vmul.f32 %v3092_v17, %v3563_v56 }
 0x144   : > { %v1549_v51 = vrot.slane %v1462_v39, 1  ;;  %v1484_v35 = vadd.f32 %v1482_v3, %v1480_v12  ;;  %v1477_v57 = vadd.f32 %v1475_v42, %v1473_v47  ;;  %v1483_v28 = vmul.f32 %v3129_v4, %v3536_v34 }
 0x145   : > { %v1459_v19 = vadd.f32 %v1457_v0, %v1455_v37  ;;  %v1494_v38 = vmul.f32 %v3892_v31, %v3130_v5  ;;  %v1487_v7 = vmul.f32 %v3055_v62, %v3561_v55  ;;  %v1603_v33 = vmax.f32 %v1592_v32, 0.0 }
 0x146   : > { %v1560_v22 = vsel %vm1548_vm11, %v1543_v23, %v1549_v51  ;;  %v1488_v26 = vadd.f32 %v3690_v50, %v1484_v35  ;;  %v1481_v49 = vadd.f32 %v1479_v48, %v1477_v57  ;;  %v1491_v34 = vmul.f32 %v3093_v40, %v3563_v56 }
 0x147   : > { %v1575_v61 = vmul.f32 %v3779_v59, %v1560_v22  ;;  %v1463_v41 = vadd.f32 %v1461_v25, %v1459_v19  ;;  %v1495_v43 = vmul.f32 %v3892_v31, %v3131_v29  ;;  %v1614_v15 = vmin.f32 %v1603_v33, 6.0 }
 0x148   : > { %v1492_v11 = vadd.f32 %v1490_v14, %v1488_v26  ;;  %v1485_v46 = vadd.f32 %v1483_v28, %v1481_v49  ;;  %v3297_v20 = vmov 1966171168  }
 0x149   : > { %v1593_v52 = vadd.f32 %v3790_v58, %v1575_v61  ;;  %v1550_v36 = vrot.slane %v1463_v41, 1  ;;  %v1797_v3 = vunpack.c.l.s4 %v3297_v20 }
 0x14a   : > { %v1496_v60 = vadd.f32 %v1494_v38, %v1492_v11  ;;  %v1489_v1 = vadd.f32 %v1487_v7, %v1485_v46 }
 0x14b   : > { %v1604_v50 = vmax.f32 %v1593_v52, 0.0  ;;  %v1551_v55 = vsel %vm1548_vm11, %v1549_v51, %v1550_v36  ;;  %v1798_v63 = vunpack.c.0.s8 %v1797_v3 }
 0x14c   : > { %v1576_v44 = vmul.f32 %v3779_v59, %v1551_v55  ;;  %v1577_v9 = vmul.f32 %v3779_v59, %v1496_v60  ;;  %v1493_v24 = vadd.f32 %v1491_v34, %v1489_v1 }
 0x14d   : > { %v1615_v2 = vmin.f32 %v1604_v50, 6.0  ;;  %v3969_v25 = vsub.s32 %v1798_v63, %v3436_v53 }
 0x14e   : > { %v1594_v45 = vadd.f32 %v3790_v58, %v1576_v44  ;;  %v1595_v56 = vadd.f32 %v3790_v58, %v1577_v9  ;;  %v1497_v6 = vadd.f32 %v1495_v43, %v1493_v24 }
 0x14f   : > { %v1622_v8 = vpack.c.bf16 %v1615_v2, %v1614_v15 }
 0x150   : > { %v1605_v30 = vmax.f32 %v1594_v45, 0.0  ;;  %v1606_v16 = vmax.f32 %v1595_v56, 0.0  ;;  %v1578_v31 = vmul.f32 %v3779_v59, %v1497_v6  ;;  %v3961_v59 = vld [vmem:[%s4209_s8] ss:$0 sm:$0xff] }
 0x151   : > { %3230 = vmatmul.mubr.msk.bf16.gmra.mxu1 %vm390_vm2, %v1622_v8 }
 0x152   : > { %v1616_v21 = vmin.f32 %v1605_v30, 6.0  ;;  %v1617_v18 = vmin.f32 %v1606_v16, 6.0  ;;  %v1596_v27 = vadd.f32 %v3790_v58, %v1578_v31  ;;  %v3966_v58 = vld [vmem:[%s4210_s9] ss:$0 sm:$0xff] }
 0x154   : > { %v1623_v54 = vpack.c.bf16 %v1617_v18, %v1616_v21  ;;  %v1607_v13 = vmax.f32 %v1596_v27, 0.0 }
 0x156   : > { %3233 = vmatprep.mubr.msk.bf16.mxu1 %vm390_vm2, %v1623_v54  ;;  %v1618_v17 = vmin.f32 %v1607_v13, 6.0 }
 0x158   : > { %v1624_v10 = vpack.c.bf16 %v1618_v17, %v1618_v17 }
 0x15a   : > { %3234 = vmatmul.mubr.msk.bf16.gmra.mxu1 %vm390_vm2, %v1624_v10 }
 0x1e8   : > { %v3227_v0 = vpop.f32.mrf.mxu1 }
 0x1e9   : > { %v1757_v4 = vmul.f32 %v3227_v0, %v3961_v59 }
 0x1ea   : > { %v1702_v42 = vpop.f32.mrf.mxu1 }
 0x1eb   : > { %v1775_v39 = vadd.f32 %v3966_v58, %v1757_v4  ;;  %v1755_v5 = vmul.f32 %v3961_v59, %v1702_v42 }
 0x1ec   : > { %v3228_v47 = vpop.f32.mrf.mxu1 }
 0x1ed   : > { %v1893_v12 = vcombine.high %v1775_v39, %v1775_v39  ;;  %v1900_v48 = vrot.slane %v1775_v39, %v3969_v25  ;;  %v1773_v23 = vadd.f32 %v3966_v58, %v1755_v5  ;;  %v1758_v32 = vmul.f32 %v3228_v47, %v3961_v59 }
 0x1ee   : > { %v1705_v33 = vpop.f32.mrf.mxu1 }
 0x1ef   : > { %v1907_v37 = vrot.slane %v1893_v12, %v3969_v25  ;;  %v1908_v14 = vcombine.high %v1900_v48, %v1900_v48  ;;  %v1795_v53 = vcombine.high %v1773_v23, %v1773_v23  ;;  %v1802_v62 = vrot.slane %v1773_v23, %v3969_v25 }
 0x1f0   : > { %v1776_v51 = vadd.f32 %v3966_v58, %v1758_v32  ;;  %v3995_v41 = vrot.slane %v1900_v48, %v3969_v25  ;;  %v1756_v50 = vmul.f32 %v3961_v59, %v1705_v33 }
 0x1f1   : > { %v1909_v35 = vcombine.high %v1907_v37, %v1907_v37  ;;  %v1930_v57 = vrot.slane %v1908_v14, %v3969_v25  ;;  %v1809_v28 = vrot.slane %v1795_v53, %v3969_v25  ;;  %v1810_v19 = vcombine.high %v1802_v62, %v1802_v62 }
 0x1f2   : > { %v1949_v38 = vrot.slane %v1776_v51, %v3969_v25  ;;  %v1923_v40 = vrot.slane %v1907_v37, %v3969_v25  ;;  %v1818_v7 = vrot.slane %v1802_v62, %v3969_v25  ;;  %v1942_v27 = vcombine.high %v1776_v51, %v1776_v51 }
 0x1f3   : > { %v1937_v22 = vrot.slane %v1909_v35, %v3969_v25  ;;  %v2417_v26 = vrot.slane %v1930_v57, %v3969_v25  ;;  %v1811_v49 = vcombine.high %v1809_v28, %v1809_v28  ;;  %v1832_v61 = vrot.slane %v1810_v19, %v3969_v25 }
 0x1f4   : > { %v1957_v46 = vcombine.high %v1949_v38, %v1949_v38  ;;  %v1825_v34 = vrot.slane %v1809_v28, %v3969_v25  ;;  %v3148_v1 = vcombine.high %v3995_v41, %v1930_v57  ;;  %v1965_v43 = vrot.slane %v1949_v38, %v3969_v25 }
 0x1f5   : > { %v2424_v29 = vrot.slane %v2417_v26, %v3969_v25  ;;  %v2426_v11 = vcombine.low %v1923_v40, %v1937_v22  ;;  %v1839_v52 = vrot.slane %v1811_v49, %v3969_v25  ;;  %v2299_v36 = vcombine.low %v1818_v7, %v1832_v61 }
 0x1f6   : > { %v3146_v60 = vcombine.high %v1818_v7, %v1832_v61  ;;  %v3149_v24 = vcombine.high %v1923_v40, %v1937_v22  ;;  %v1979_v45 = vrot.slane %v1957_v46, %v3969_v25  ;;  %v1987_v56 = vcombine.high %v1965_v43, %v1965_v43 }
 0x1f7   : > { %2889 = vst.msk [vmem:[%s3990_s19 + $0x18] sm:$0x1] %vm2886_vm12, %v2424_v29  ;;  %v2301_v15 = vcombine.low %v1825_v34, %v1839_v52  ;;  %v3147_v55 = vcombine.high %v1825_v34, %v1839_v52  ;;  %v2309_v44 = vrot.slane %v2299_v36, %v3969_v25  ;;  %v2442_v2 = vrot.slane %v2426_v11, %v3969_v25 }
 0x1f8   : > { %v2316_v9 = vrot.slane %v3146_v60, %v3969_v25  ;;  %v2435_v16 = vrot.slane %v3148_v1, %v3969_v25  ;;  %v2428_v31 = vcombine.low %v1965_v43, %v1979_v45  ;;  %v2480_v21 = vrot.slane %v1987_v56, %v3969_v25 }
 0x1f9   : > { %v2323_v6 = vrot.slane %v2301_v15, %v3969_v25  ;;  %v2330_v8 = vrot.slane %v3147_v55, %v3969_v25  ;;  %v1774_v54 = vadd.f32 %v3966_v58, %v1756_v50  ;;  %v2449_v13 = vrot.slane %v3149_v24, %v3969_v25 }
 0x1fa   : > { %v2331_v30 = vcombine.low %v2309_v44, %v2316_v9  ;;  %v2457_v17 = vcombine.low %v2435_v16, %v2442_v2  ;;  %v2456_v10 = vrot.slane %v2428_v31, %v3969_v25  ;;  %v2487_v20 = vrot.slane %v2480_v21, %v3969_v25 }
 0x1fb   : > { %v2332_v18 = vcombine.low %v2323_v6, %v2330_v8  ;;  %v1844_v0 = vcombine.high %v1774_v54, %v1774_v54  ;;  %v1851_v4 = vrot.slane %v1774_v54, %v3969_v25  ;;  %v1956_v23 = vrot.slane %v1942_v27, %v3969_v25 }
 0x1fc   : > { %v2339_v3 = vrot.slane %v2331_v30, %v3969_v25  ;;  %v2458_v42 = vcombine.low %v2449_v13, %v2456_v10  ;;  %2891 = vst.msk [vmem:[%s3990_s19 + $0x28] sm:$0x1] %vm2886_vm12, %v2487_v20  ;;  %v2465_v48 = vrot.slane %v2457_v17, %v3969_v25  ;;  %v1989_v52 = vcombine.high %v1979_v45, %v1979_v45 }
 0x1fd   : > { %v2346_v63 = vrot.slane %v2332_v18, %v3969_v25  ;;  %v1858_v5 = vrot.slane %v1844_v0, %v3969_v25  ;;  %v1859_v47 = vcombine.high %v1851_v4, %v1851_v4  ;;  %v1867_v12 = vrot.slane %v1851_v4, %v3969_v25 }
 0x1fe   : > { %v2472_v32 = vrot.slane %v2458_v42, %v3969_v25  ;;  %v1958_v40 = vcombine.high %v1956_v23, %v1956_v23  ;;  %v1972_v22 = vrot.slane %v1956_v23, %v3969_v25 }
 0x1ff   : > { %v2347_v39 = vcombine.low %v2339_v3, %v2346_v63  ;;  %v1860_v37 = vcombine.high %v1858_v5, %v1858_v5  ;;  %v1874_v14 = vrot.slane %v1858_v5, %v3969_v25  ;;  %v1881_v53 = vrot.slane %v1859_v47, %v3969_v25 }
 0x200   : > { %v1889_v62 = vcombine.high %v1867_v12, %v1867_v12  ;;  %v2473_v51 = vcombine.low %v2465_v48, %v2472_v32  ;;  %v2354_v35 = vrot.slane %v1867_v12, %v3969_v25  ;;  %v1986_v46 = vrot.slane %v1958_v40, %v3969_v25 }
 0x201   : > { %2885 = vst.msk [vmem:[%s3990_s19] sm:$0xff] %vm2884_vm13, %v2347_v39  ;;  %v1888_v57 = vrot.slane %v1860_v37, %v3969_v25  ;;  %v1890_v28 = vcombine.high %v1874_v14, %v1874_v14  ;;  %v1891_v19 = vcombine.high %v1881_v53, %v1881_v53  ;;  %v1988_v34 = vcombine.high %v1972_v22, %v1972_v22 }
 0x202   : > { %v2362_v38 = vcombine.low %v1881_v53, %v1889_v62  ;;  %2890 = vst.msk [vmem:[%s3990_s19 + $0x20] sm:$0xff] %vm2884_vm13, %v2473_v51  ;;  %v2361_v26 = vrot.slane %v2354_v35, %v3969_v25  ;;  %v2488_v50 = vcombine.low %v1989_v52, %v1972_v22  ;;  %v1990_v63 = vcombine.high %v1986_v46, %v1986_v46 }
 0x203   : > { %v1892_v49 = vcombine.high %v1888_v57, %v1888_v57  ;;  %v2363_v7 = vcombine.low %v1891_v19, %v1874_v14  ;;  %v2364_v61 = vcombine.low %v1888_v57, %v1890_v28  ;;  %v2489_v15 = vcombine.low %v1986_v46, %v1988_v34 }
 0x204   : > { %2887 = vst.msk [vmem:[%s3990_s19 + $0x8] sm:$0x1] %vm2886_vm12, %v2361_v26  ;;  %v2372_v29 = vrot.slane %v2362_v38, %v3969_v25  ;;  %v2498_v9 = vrot.slane %v2488_v50, %v3969_v25 }
 0x205   : > { %v2365_v33 = vcombine.low %v1892_v49, %v3995_v41  ;;  %v2379_v11 = vrot.slane %v2363_v7, %v3969_v25  ;;  %v2386_v36 = vrot.slane %v2364_v61, %v3969_v25  ;;  %v2505_v24 = vrot.slane %v2489_v15, %v3969_v25 }
 0x207   : > { %v2393_v60 = vrot.slane %v2365_v33, %v3969_v25  ;;  %v2394_v1 = vcombine.low %v2372_v29, %v2379_v11  ;;  %v4054_v30 = vcombine.low %v2498_v9, %v2505_v24 }
 0x209   : > { %v2395_v43 = vcombine.low %v2386_v36, %v2393_v60  ;;  %v2402_v55 = vrot.slane %v2394_v1, %v3969_v25  ;;  %v2528_v3 = vrot.slane %v4054_v30, %v3969_v25 }
 0x20b   : > { %v2409_v41 = vrot.slane %v2395_v43, %v3969_v25 }
 0x20d   : > { %v2410_v44 = vcombine.low %v2402_v55, %v2409_v41 }
 0x20f   : > { %2888 = vst.msk [vmem:[%s3990_s19 + $0x10] sm:$0xff] %vm2884_vm13, %v2410_v44 }
 0x211   : > { %v3231_v2 = vpop.f32.mrf.mxu1 }
 0x212   : > { %v1761_v45 = vmul.f32 %v3231_v2, %v3961_v59 }
 0x213   : > { %v1718_v56 = vpop.f32.mrf.mxu1 }
 0x214   : > { %v1779_v6 = vadd.f32 %v3966_v58, %v1761_v45  ;;  %v1759_v8 = vmul.f32 %v3961_v59, %v1718_v56 }
 0x215   : > { %v3232_v16 = vpop.f32.mrf.mxu1 }
 0x216   : > { %v2089_v31 = vcombine.high %v1779_v6, %v1779_v6  ;;  %v2096_v21 = vrot.slane %v1779_v6, %v3969_v25  ;;  %v1777_v18 = vadd.f32 %v3966_v58, %v1759_v8  ;;  %v1762_v27 = vmul.f32 %v3232_v16, %v3961_v59 }
 0x217   : > { %v1721_v54 = vpop.f32.mrf.mxu1 }
 0x218   : > { %v2103_v13 = vrot.slane %v2089_v31, %v3969_v25  ;;  %v2104_v17 = vcombine.high %v2096_v21, %v2096_v21  ;;  %v4061_v10 = vrot.slane %v2096_v21, %v3969_v25  ;;  %v1991_v20 = vcombine.high %v1777_v18, %v1777_v18 }
 0x219   : > { %v1998_v0 = vrot.slane %v1777_v18, %v3969_v25  ;;  %v1780_v4 = vadd.f32 %v3966_v58, %v1762_v27  ;;  %v1760_v47 = vmul.f32 %v3961_v59, %v1721_v54 }
 0x21a   : > { %v2105_v42 = vcombine.high %v2103_v13, %v2103_v13  ;;  %v2126_v39 = vrot.slane %v2104_v17, %v3969_v25  ;;  %v2134_v5 = vcombine.high %v4061_v10, %v4061_v10  ;;  %v3235_v12 = vpop.f32.mrf.mxu1  ;;  %v2119_v48 = vrot.slane %v2103_v13, %v3969_v25 }
 0x21b   : > { %v2005_v23 = vrot.slane %v1991_v20, %v3969_v25  ;;  %v2006_v32 = vcombine.high %v1998_v0, %v1998_v0  ;;  %v2014_v37 = vrot.slane %v1998_v0, %v3969_v25  ;;  %v2138_v51 = vcombine.high %v1780_v4, %v1780_v4 }
 0x21c   : > { %v2133_v14 = vrot.slane %v2105_v42, %v3969_v25  ;;  %v2136_v53 = vcombine.high %v2126_v39, %v2126_v39  ;;  %v2616_v62 = vcombine.low %v2126_v39, %v2134_v5  ;;  %v1734_v35 = vpop.f32.mrf.mxu1  ;;  %v2145_v38 = vrot.slane %v1780_v4, %v3969_v25 }
 0x21d   : > { %v2007_v57 = vcombine.high %v2005_v23, %v2005_v23  ;;  %v2028_v28 = vrot.slane %v2006_v32, %v3969_v25  ;;  %v2036_v19 = vcombine.high %v2014_v37, %v2014_v37  ;;  %v2021_v49 = vrot.slane %v2005_v23, %v3969_v25 }
 0x21e   : > { %v2617_v40 = vcombine.low %v2136_v53, %v2119_v48  ;;  %v2669_v22 = vrot.slane %v2133_v14, %v3969_v25  ;;  %v3152_v26 = vcombine.high %v2119_v48, %v2133_v14  ;;  %v3236_v7 = vpop.f32.mrf.mxu1  ;;  %v2490_v29 = vcombine.low %v1990_v63, %v2014_v37 }
 0x21f   : > { %v2035_v61 = vrot.slane %v2007_v57, %v3969_v25  ;;  %v2038_v33 = vcombine.high %v2028_v28, %v2028_v28  ;;  %v2491_v11 = vcombine.low %v2028_v28, %v2036_v19  ;;  %v2638_v46 = vrot.slane %v2616_v62, %v3969_v25 }
 0x220   : > { %v2645_v34 = vrot.slane %v2617_v40, %v3969_v25  ;;  %v2676_v52 = vrot.slane %v2669_v22, %v3969_v25  ;;  %v2152_v36 = vrot.slane %v2138_v51, %v3969_v25  ;;  %v2512_v60 = vrot.slane %v2490_v29, %v3969_v25 }
 0x221   : > { %v2519_v1 = vrot.slane %v2491_v11, %v3969_v25  ;;  %v2543_v43 = vrot.slane %v2038_v33, %v3969_v25  ;;  %v2551_v50 = vcombine.low %v2021_v49, %v2035_v61  ;;  %v2687_v15 = vrot.slane %v3152_v26, %v3969_v25 }
 0x222   : > { %2897 = vst.msk [vmem:[%s3990_s19 + $0x58] sm:$0x1] %vm2886_vm12, %v2676_v52  ;;  %v3150_v55 = vcombine.high %v2021_v49, %v2035_v61  ;;  %v2153_v41 = vcombine.high %v2145_v38, %v2145_v38  ;;  %v2154_v44 = vcombine.high %v2152_v36, %v2152_v36  ;;  %v4090_v9 = vcombine.low %v2638_v46, %v2645_v34  ;;  %v1737_v46 = vpop.f32.mrf.mxu1 }
 0x223   : > { %v2521_v24 = vcombine.low %v2512_v60, %v2519_v1  ;;  %v2550_v2 = vrot.slane %v2543_v43, %v3969_v25  ;;  %v2561_v45 = vrot.slane %v2551_v50, %v3969_v25  ;;  %v2161_v6 = vrot.slane %v2145_v38, %v3969_v25 }
 0x224   : > { %v2568_v56 = vrot.slane %v3150_v55, %v3969_v25  ;;  %v2168_v8 = vrot.slane %v2152_v36, %v3969_v25  ;;  %v2175_v30 = vrot.slane %v2153_v41, %v3969_v25  ;;  %v4102_v31 = vrot.slane %v2154_v44, %v3969_v25 }
 0x225   : > { %v2535_v16 = vrot.slane %v2521_v24, %v3969_v25  ;;  %2893 = vst.msk [vmem:[%s3990_s19 + $0x38] sm:$0x1] %vm2886_vm12, %v2550_v2  ;;  %v1778_v21 = vadd.f32 %v3966_v58, %v1760_v47  ;;  %v1765_v18 = vmul.f32 %v3235_v12, %v3961_v59  ;;  %v1763_v53 = vmul.f32 %v3961_v59, %v1734_v35 }
 0x226   : > { %v2583_v27 = vcombine.low %v2561_v45, %v2568_v56  ;;  %v2184_v54 = vcombine.high %v2168_v8, %v2168_v8  ;;  %v2678_v13 = vcombine.low %v2161_v6, %v2175_v30  ;;  %v3153_v17 = vcombine.high %v2161_v6, %v2175_v30 }
 0x227   : > { %v2536_v20 = vcombine.low %v2528_v3, %v2535_v16  ;;  %v2680_v63 = vcombine.low %v2168_v8, %v4102_v31  ;;  %v2040_v0 = vcombine.high %v1778_v21, %v1778_v21  ;;  %v2047_v4 = vrot.slane %v1778_v21, %v3969_v25 }
 0x228   : > { %v4109_v42 = vrot.slane %v2583_v27, %v3969_v25  ;;  %v2694_v39 = vrot.slane %v2678_v13, %v3969_v25  ;;  %v2701_v5 = vrot.slane %v3153_v17, %v3969_v25  ;;  %v2732_v47 = vrot.slane %v2184_v54, %v3969_v25 }
 0x229   : > { %2892 = vst.msk [vmem:[%s3990_s19 + $0x30] sm:$0xff] %vm2884_vm13, %v2536_v20  ;;  %v2708_v12 = vrot.slane %v2680_v63, %v3969_v25  ;;  %v2054_v3 = vrot.slane %v2040_v0, %v3969_v25  ;;  %v2055_v48 = vcombine.high %v2047_v4, %v2047_v4  ;;  %v2063_v23 = vrot.slane %v2047_v4, %v3969_v25 }
 0x22a   : > { %v2709_v32 = vcombine.low %v2687_v15, %v2694_v39  ;;  %v2739_v37 = vrot.slane %v2732_v47, %v3969_v25  ;;  %v1783_v14 = vadd.f32 %v3966_v58, %v1765_v18  ;;  %v1781_v40 = vadd.f32 %v3966_v58, %v1763_v53 }
 0x22b   : > { %v2710_v62 = vcombine.low %v2701_v5, %v2708_v12  ;;  %v2056_v51 = vcombine.high %v2054_v3, %v2054_v3  ;;  %v2070_v57 = vrot.slane %v2054_v3, %v3969_v25  ;;  %v2077_v28 = vrot.slane %v2055_v48, %v3969_v25 }
 0x22c   : > { %v2717_v19 = vrot.slane %v2709_v32, %v3969_v25  ;;  %2899 = vst.msk [vmem:[%s3990_s19 + $0x68] sm:$0x1] %vm2886_vm12, %v2739_v37  ;;  %v2291_v38 = vrot.slane %v1783_v14, %v3969_v25  ;;  %v2186_v22 = vcombine.high %v4102_v31, %v4102_v31  ;;  %v2187_v11 = vcombine.high %v1781_v40, %v1781_v40 }
 0x22d   : > { %v2724_v26 = vrot.slane %v2710_v62, %v3969_v25  ;;  %v2084_v35 = vrot.slane %v2056_v51, %v3969_v25  ;;  %v2086_v49 = vcombine.high %v2070_v57, %v2070_v57  ;;  %v2553_v7 = vcombine.low %v2063_v23, %v2077_v28 }
 0x22e   : > { %v3151_v61 = vcombine.high %v2063_v23, %v2077_v28  ;;  %v2606_v33 = vrot.slane %v2070_v57, %v3969_v25  ;;  %v2298_v29 = vrot.slane %v2291_v38, %v3969_v25  ;;  %v2194_v15 = vrot.slane %v1781_v40, %v3969_v25 }
 0x22f   : > { %v2725_v34 = vcombine.low %v2717_v19, %v2724_v26  ;;  %v2088_v52 = vcombine.high %v2084_v35, %v2084_v35  ;;  %v2575_v36 = vrot.slane %v2553_v7, %v3969_v25  ;;  %v2614_v60 = vcombine.low %v2084_v35, %v2086_v49 }
 0x230   : > { %v2582_v1 = vrot.slane %v3151_v61, %v3969_v25  ;;  %v2613_v43 = vrot.slane %v2606_v33, %v3969_v25  ;;  %v2858_v50 = vrot.slane %v2298_v29, %v3969_v25  ;;  %v2201_v44 = vrot.slane %v2187_v11, %v3969_v25 }
 0x231   : > { %2898 = vst.msk [vmem:[%s3990_s19 + $0x60] sm:$0xff] %vm2884_vm13, %v2725_v34  ;;  %v2615_v55 = vcombine.low %v2088_v52, %v4061_v10  ;;  %v2624_v41 = vrot.slane %v2614_v60, %v3969_v25  ;;  %v1764_v24 = vmul.f32 %v3961_v59, %v1737_v46  ;;  %v2202_v56 = vcombine.high %v2194_v15, %v2194_v15 }
 0x232   : > { %v2584_v2 = vcombine.low %v2575_v36, %v2582_v1  ;;  %2895 = vst.msk [vmem:[%s3990_s19 + $0x48] sm:$0x1] %vm2886_vm12, %v2613_v43  ;;  %v2865_v45 = vrot.slane %v2858_v50, %v3969_v25  ;;  %v2210_v6 = vrot.slane %v2194_v15, %v3969_v25  ;;  %v2203_v30 = vcombine.high %v2201_v44, %v2201_v44 }
 0x233   : > { %v2631_v8 = vrot.slane %v2615_v55, %v3969_v25  ;;  %v2217_v16 = vrot.slane %v2201_v44, %v3969_v25  ;;  %v1782_v10 = vadd.f32 %v3966_v58, %v1764_v24  ;;  %v2224_v59 = vrot.slane %v2202_v56, %v3969_v25 }
 0x234   : > { %v2598_v31 = vrot.slane %v2584_v2, %v3969_v25  ;;  %2903 = vst.msk [vmem:[%s3990_s19 + $0x88] sm:$0x1] %vm2886_vm12, %v2865_v45  ;;  %v2232_v21 = vcombine.high %v2210_v6, %v2210_v6  ;;  %v2740_v18 = vcombine.low %v2186_v22, %v2210_v6  ;;  %v2231_v54 = vrot.slane %v2203_v30, %v3969_v25 }
 0x235   : > { %v2646_v27 = vcombine.low %v2624_v41, %v2631_v8  ;;  %v2233_v13 = vcombine.high %v2217_v16, %v2217_v16  ;;  %v2236_v17 = vcombine.high %v1782_v10, %v1782_v10  ;;  %v2661_v20 = vrot.slane %v4090_v9, %v3969_v25 }
 0x236   : > { %v2599_v63 = vcombine.low %v4109_v42, %v2598_v31  ;;  %v2234_v58 = vcombine.high %v2224_v59, %v2224_v59  ;;  %v2741_v0 = vcombine.low %v2224_v59, %v2232_v21  ;;  %v2235_v39 = vcombine.high %v2231_v54, %v2231_v54 }
 0x237   : > { %v2654_v4 = vrot.slane %v2646_v27, %v3969_v25  ;;  %v2743_v5 = vcombine.low %v2231_v54, %v2233_v13  ;;  %v2243_v47 = vrot.slane %v1782_v10, %v3969_v25  ;;  %v2750_v3 = vrot.slane %v2740_v18, %v3969_v25 }
 0x238   : > { %2894 = vst.msk [vmem:[%s3990_s19 + $0x40] sm:$0xff] %vm2884_vm13, %v2599_v63  ;;  %v2742_v12 = vcombine.low %v2234_v58, %v2217_v16  ;;  %v2757_v48 = vrot.slane %v2741_v0, %v3969_v25  ;;  %v2250_v9 = vrot.slane %v2236_v17, %v3969_v25  ;;  %v2795_v32 = vrot.slane %v2235_v39, %v3969_v25 }
 0x239   : > { %v2662_v42 = vcombine.low %v2654_v4, %v2661_v20  ;;  %v2771_v23 = vrot.slane %v2743_v5, %v3969_v25  ;;  %v2251_v37 = vcombine.high %v2243_v47, %v2243_v47  ;;  %v2259_v57 = vrot.slane %v2243_v47, %v3969_v25 }
 0x23a   : > { %v2764_v14 = vrot.slane %v2742_v12, %v3969_v25  ;;  %v2772_v53 = vcombine.low %v2750_v3, %v2757_v48  ;;  %v2252_v62 = vcombine.high %v2250_v9, %v2250_v9  ;;  %v2802_v51 = vrot.slane %v2795_v32, %v3969_v25 }
 0x23b   : > { %2896 = vst.msk [vmem:[%s3990_s19 + $0x50] sm:$0xff] %vm2884_vm13, %v2662_v42  ;;  %v2273_v28 = vrot.slane %v2251_v37, %v3969_v25  ;;  %v2266_v38 = vrot.slane %v2250_v9, %v3969_v25 }
 0x23c   : > { %v2773_v19 = vcombine.low %v2764_v14, %v2771_v23  ;;  %v2280_v40 = vrot.slane %v2252_v62, %v3969_v25  ;;  %2901 = vst.msk [vmem:[%s3990_s19 + $0x78] sm:$0x1] %vm2886_vm12, %v2802_v51  ;;  %v2780_v35 = vrot.slane %v2772_v53, %v3969_v25 }
 0x23d   : > { %v2803_v22 = vcombine.low %v2259_v57, %v2273_v28  ;;  %v3154_v26 = vcombine.high %v2259_v57, %v2273_v28 }
 0x23e   : > { %v2787_v49 = vrot.slane %v2773_v19, %v3969_v25  ;;  %v2805_v7 = vcombine.low %v2266_v38, %v2280_v40  ;;  %v3155_v61 = vcombine.high %v2266_v38, %v2280_v40 }
 0x23f   : > { %v2813_v33 = vrot.slane %v2803_v22, %v3969_v25  ;;  %v2820_v29 = vrot.slane %v3154_v26, %v3969_v25 }
 0x240   : > { %v2788_v11 = vcombine.low %v2780_v35, %v2787_v49  ;;  %v2827_v46 = vrot.slane %v2805_v7, %v3969_v25  ;;  %v2834_v34 = vrot.slane %v3155_v61, %v3969_v25 }
 0x241   : > { %v2835_v52 = vcombine.low %v2813_v33, %v2820_v29 }
 0x242   : > { %2900 = vst.msk [vmem:[%s3990_s19 + $0x70] sm:$0xff] %vm2884_vm13, %v2788_v11  ;;  %v2836_v36 = vcombine.low %v2827_v46, %v2834_v34 }
 0x243   : > { %v2843_v60 = vrot.slane %v2835_v52, %v3969_v25 }
 0x244   : > { %v2850_v1 = vrot.slane %v2836_v36, %v3969_v25 }
 0x246   : > { %v2851_v43 = vcombine.low %v2843_v60, %v2850_v1 }
 0x248   : > { %2902 = vst.msk [vmem:[%s3990_s19 + $0x80] sm:$0xff] %vm2884_vm13, %v2851_v43 }
 0x249 PF: > { %s20_s15 = sadd.s32 1, %s3294_s15   ;;  %s4212_s13 = smov %s3290_s14 }
 0x24a   : > { %p17_p5 = scmp.ge.s32.totalorder %s20_s15, 4   ;;  %s4213_s14 = smov %s4215_s16 }
 0x24c   :  { %19 = sbr.rel (!%p17_p5) target bundleno = 2 (0x2), region = 212 }

</bundles_post_ra>
